<compile_context>
chip_gen: v7x
topology: tpu7x:2x2x1
jax: 0.10.0
libtpu: 0.0.40
codegen_flags: <defaults>
</compile_context>

<pallas_src>
import numpy as np
import jax
import jax.numpy as jnp
from jax import lax
from jax.experimental import pallas as pl
from jax.experimental.pallas import tpu as pltpu


def _round_up(n, m):
    return ((n + m - 1) // m) * m


# ----------------------------------------------------------------------------
# In-kernel helpers (all operate on (channels, flat-padded-spatial) values).
# ----------------------------------------------------------------------------
def _shift(x, s):
    """out[:, p] = x[:, p + s]; circular wrap only ever touches ring/tail cols."""
    if s == 0:
        return x
    L = x.shape[-1]
    return pltpu.roll(x, (-s) % L, 1)


def _conv3x3(x_flat, w_row, b_col, wp, relu):
    """SAME 3x3 conv as one K=9*Cin MXU matmul in the lane-dense flat layout.

    x_flat : (Cin, L)  zeros on the 1-px padding ring (and lane tail)
    w_row  : (Cout, 9*Cin), column = (ky*3 + kx)*Cin + ci
    b_col  : (Cout, 1)
    returns: (Cout, L) f32; interior columns hold the conv output, ring/tail = garbage
    """
    taps = []
    for dy in (-1, 0, 1):
        for dx in (-1, 0, 1):
            taps.append(_shift(x_flat, dy * wp + dx))
    patch = jnp.concatenate(taps, axis=0)                       # (9*Cin, L)
    acc = jnp.dot(w_row, patch, preferred_element_type=jnp.float32) + b_col
    return jnp.maximum(acc, 0.0) if relu else acc


def _pool2x2_max(a_flat, wp):
    """m[:, q] = max of the 2x2 window whose top-left flat-padded index is q."""
    m = jnp.maximum(a_flat, _shift(a_flat, 1))
    return jnp.maximum(m, _shift(m, wp))


# ----------------------------------------------------------------------------
# Fused forward pass: one pallas_call, grid over the batch.
# ----------------------------------------------------------------------------
def stacked_cnn_forward(x_nchw, params):
    B, Cin, H, W = x_nchw.shape
    C = params["w1"].shape[-1]          # hidden_units
    N = params["wl"].shape[-1]          # output_shape
    Hp1, Wp1 = H + 2, W + 2
    Ho, Wo = H // 2, W // 2
    Hp2, Wp2 = Ho + 2, Wo + 2
    Hf, Wf = Ho // 2, Wo // 2
    L1 = _round_up(Hp1 * Wp1, 128)      # flat padded grid, lane-aligned
    L2 = _round_up(Hp2 * Wp2, 128)
    Np = _round_up(N, 128)              # lane-dense logits

    # ---- one-time layout glue (wrapper side, outside the hot path) ----------
    # Pad the input-channel dim to a full sublane tile so every im2col piece is
    # 8-sublane aligned (dummy channels are zero, their weights are zero).
    Cp = _round_up(Cin, 8)
    w1 = params["w1"]
    if Cp != Cin:
        x_nchw = jnp.pad(x_nchw, ((0, 0), (0, Cp - Cin), (0, 0), (0, 0)))
        w1 = jnp.pad(w1, ((0, 0), (0, 0), (0, Cp - Cin), (0, 0)))

    xf = jnp.pad(x_nchw.astype(jnp.float32), ((0, 0), (0, 0), (1, 1), (1, 1)))
    xf = xf.reshape(B, Cp, Hp1 * Wp1)
    xf = jnp.pad(xf, ((0, 0), (0, 0), (0, L1 - Hp1 * Wp1)))     # (B, Cp, L1)

    cw = lambda w: w.reshape(9 * w.shape[2], w.shape[3]).T.astype(jnp.float32)
    cb = lambda b: b.reshape(-1, 1).astype(jnp.float32)
    w1r, b1c = cw(w1), cb(params["b1"])
    w2r, b2c = cw(params["w2"]), cb(params["b2"])
    w3r, b3c = cw(params["w3"]), cb(params["b3"])
    w4r, b4c = cw(params["w4"]), cb(params["b4"])

    # 1-px ring masks (1.0 interior / 0.0 ring+tail) for the conv->conv handoffs.
    def ring_mask(hp, wp, L):
        m = np.zeros((hp, wp), np.float32)
        m[1:hp - 1, 1:wp - 1] = 1.0
        out = np.zeros((1, L), np.float32)
        out[0, :hp * wp] = m.reshape(-1)
        return jnp.asarray(out)

    mask1 = ring_mask(Hp1, Wp1, L1)
    mask2 = ring_mask(Hp2, Wp2, L2)

    # Pool-1 gather + re-pad as one constant 0/1 selection matmul:
    # column t=(yo+1)*Wp2+(xo+1) picks the 2x2-max sitting at q=(2yo+1)*Wp1+(2xo+1);
    # every ring/tail column stays exactly zero -> conv3's input is born zero-padded.
    s1 = np.zeros((L1, L2), np.float32)
    for yo in range(Ho // 2 * 2 // 2 * 0 + Hf * 2):  # == range(Ho) kept explicit below
        pass
    s1 = np.zeros((L1, L2), np.float32)
    for yo in range(Ho):
        for xo in range(Wo):
            s1[(2 * yo + 1) * Wp1 + (2 * xo + 1), (yo + 1) * Wp2 + (xo + 1)] = 1.0
    s1 = jnp.asarray(s1)

    # Pool-2 gather + PyTorch-order Flatten folded into the Linear weight:
    # A[c, (2yo+1)*Wp2 + (2xo+1), n] = wl[c*Hf*Wf + yo*Wf + xo, n], zero elsewhere.
    wl = params["wl"].astype(jnp.float32).reshape(C, Hf, Wf, N)
    A = jnp.zeros((C, Hf, 2, Wf, 2, N), jnp.float32).at[:, :, 1, :, 1, :].set(wl)
    A = A.reshape(C, Ho, Wo, N)
    A = jnp.pad(A, ((0, 0), (0, Hp2 - Ho), (0, Wp2 - Wo), (0, 0)))
    A = A.reshape(C, Hp2 * Wp2, N)
    A = jnp.pad(A, ((0, 0), (0, L2 - Hp2 * Wp2), (0, Np - N)))   # (C, L2, Np)
    blp = jnp.pad(params["bl"].astype(jnp.float32).reshape(1, N),
                  ((0, 0), (0, Np - N)))                         # (1, Np)

    def kernel(x_ref, w1_ref, b1_ref, mk1_ref, w2_ref, b2_ref, s1_ref,
               w3_ref, b3_ref, mk2_ref, w4_ref, b4_ref, a_ref, bl_ref, o_ref):
        x = x_ref[0]                                             # (Cp, L1)

        # conv_block_1: Conv -> ReLU -> Conv -> MaxPool2d(2)
        h = _conv3x3(x, w1_ref[...], b1_ref[...], Wp1, True)
        h = h * mk1_ref[...]                                     # re-zero padding ring
        h = _conv3x3(h, w2_ref[...], b2_ref[...], Wp1, False)
        h = _pool2x2_max(h, Wp1)
        h = jnp.dot(h, s1_ref[...], preferred_element_type=jnp.float32)   # (C, L2)

        # conv_block_2: Conv -> ReLU -> Conv -> MaxPool2d(2)
        h = _conv3x3(h, w3_ref[...], b3_ref[...], Wp2, True)
        h = h * mk2_ref[...]
        h = _conv3x3(h, w4_ref[...], b4_ref[...], Wp2, False)
        h = _pool2x2_max(h, Wp2)                                 # (C, L2)

        # linear_stack: Flatten + Linear (pool-2 gather folded into a_ref rows)
        out = bl_ref[...]                                        # (1, Np)
        for c in range(C):
            out = out + jnp.dot(h[c:c + 1, :], a_ref[c],
                                preferred_element_type=jnp.float32)
        o_ref[0] = out

    def full_spec(arr):
        nd = arr.ndim
        return pl.BlockSpec(arr.shape, lambda b, _nd=nd: (0,) * _nd)

    out = pl.pallas_call(
        kernel,
        out_shape=jax.ShapeDtypeStruct((B, 1, Np), jnp.float32),
        grid=(B,),
        in_specs=[
            pl.BlockSpec((1, Cp, L1), lambda b: (b, 0, 0)),
            full_spec(w1r), full_spec(b1c), full_spec(mask1),
            full_spec(w2r), full_spec(b2c), full_spec(s1),
            full_spec(w3r), full_spec(b3c), full_spec(mask2),
            full_spec(w4r), full_spec(b4c), full_spec(A), full_spec(blp),
        ],
        out_specs=pl.BlockSpec((1, 1, Np), lambda b: (b, 0, 0)),
        compiler_params=pltpu.CompilerParams(
            dimension_semantics=("parallel",)),
    )(xf, w1r, b1c, mask1, w2r, b2c, s1, w3r, b3c, mask2, w4r, b4c, A, blp)

    return out[:, 0, :N]


# ----------------------------------------------------------------------------
# Pure-JAX reference (lax.conv / reduce_window) for a correctness check.
# ----------------------------------------------------------------------------
def reference_forward(x_nchw, params):
    def conv(x, w_hwio, b, relu):
        w_oihw = jnp.transpose(w_hwio, (3, 2, 0, 1))
        y = lax.conv_general_dilated(
            x, w_oihw, (1, 1), "SAME",
            dimension_numbers=("NCHW", "OIHW", "NCHW"))
        y = y + b.reshape(1, -1, 1, 1)
        return jnp.maximum(y, 0.0) if relu else y

    def pool(x):
        return lax.reduce_window(x, -jnp.inf, lax.max,
                                 (1, 1, 2, 2), (1, 1, 2, 2), "VALID")

    x = conv(x_nchw, params["w1"], params["b1"], True)
    x = conv(x, params["w2"], params["b2"], False)
    x = pool(x)
    x = conv(x, params["w3"], params["b3"], True)
    x = conv(x, params["w4"], params["b4"], False)
    x = pool(x)
    x = x.reshape(x.shape[0], -1)                    # PyTorch NCHW flatten order
    return x @ params["wl"] + params["bl"]


def init_params(key, c_in, hidden, n_out):
    ks = jax.random.split(key, 10)

    def conv_w(k, cin, cout):
        bound = 1.0 / (cin * 9) ** 0.5
        return jax.random.uniform(k, (3, 3, cin, cout), jnp.float32, -bound, bound)

    def conv_b(k, cin, cout):
        bound = 1.0 / (cin * 9) ** 0.5
        return jax.random.uniform(k, (cout,), jnp.float32, -bound, bound)

    kf = hidden * 7 * 7
    lb = 1.0 / kf ** 0.5
    return {
        "w1": conv_w(ks[0], c_in, hidden),   "b1": conv_b(ks[1], c_in, hidden),
        "w2": conv_w(ks[2], hidden, hidden), "b2": conv_b(ks[3], hidden, hidden),
        "w3": conv_w(ks[4], hidden, hidden), "b3": conv_b(ks[5], hidden, hidden),
        "w4": conv_w(ks[6], hidden, hidden), "b4": conv_b(ks[7], hidden, hidden),
        "wl": jax.random.uniform(ks[8], (kf, n_out), jnp.float32, -lb, lb),
        "bl": jax.random.uniform(ks[9], (n_out,), jnp.float32, -lb, lb),
    }


if __name__ == "__main__":
    # StackedCNN(input_shape=1, hidden_units=8, output_shape=10); the Linear's
    # in_features = hidden*7*7 implies 28x28 spatial input (two 2x2 max-pools).
    B, C_IN, HIDDEN, N_OUT, HW = 4, 1, 8, 10, 28

    key = jax.random.PRNGKey(0)
    k_params, k_x = jax.random.split(key)
    params = init_params(k_params, C_IN, HIDDEN, N_OUT)
    x = jax.random.normal(k_x, (B, C_IN, HW, HW), jnp.float32)

    out = jax.jit(stacked_cnn_forward)(x, params)
    out = jax.block_until_ready(out)

    ref = reference_forward(x, params)
    max_err = float(jnp.max(jnp.abs(out - ref)))
    assert out.shape == (B, N_OUT), out.shape
    assert max_err < 2e-3, f"mismatch vs reference: {max_err}"

    print("KERNEL_OK")
</pallas_src>

<mosaic_0001>
module attributes {stable_mosaic.version = 11 : i64} {
  func.func @kernel(%arg0: i32, %arg1: memref<1x8x1024xf32, #tpu.memory_space<vmem>>, %arg2: memref<8x72xf32, #tpu.memory_space<vmem>>, %arg3: memref<8x1xf32, #tpu.memory_space<vmem>>, %arg4: memref<1x1024xf32, #tpu.memory_space<vmem>>, %arg5: memref<8x72xf32, #tpu.memory_space<vmem>>, %arg6: memref<8x1xf32, #tpu.memory_space<vmem>>, %arg7: memref<1024x256xf32, #tpu.memory_space<vmem>>, %arg8: memref<8x72xf32, #tpu.memory_space<vmem>>, %arg9: memref<8x1xf32, #tpu.memory_space<vmem>>, %arg10: memref<1x256xf32, #tpu.memory_space<vmem>>, %arg11: memref<8x72xf32, #tpu.memory_space<vmem>>, %arg12: memref<8x1xf32, #tpu.memory_space<vmem>>, %arg13: memref<8x256x128xf32, #tpu.memory_space<vmem>>, %arg14: memref<1x128xf32, #tpu.memory_space<vmem>>, %arg15: memref<1x1x128xf32, #tpu.memory_space<vmem>>) attributes {dimension_semantics = [#tpu.dimension_semantics<parallel>], iteration_bounds = array<i64: 4>, scalar_prefetch = 0 : i64, scratch_operands = 0 : i64, tpu.core_type = #tpu.core_type<tc>, window_params = [{transform_indices = @transform_0, window_bounds = array<i64: 1, 8, 1024>}, {pipeline_mode = #tpu.pipeline_mode<synchronous>, transform_indices = @transform_1, window_bounds = array<i64: 8, 72>}, {pipeline_mode = #tpu.pipeline_mode<synchronous>, transform_indices = @transform_2, window_bounds = array<i64: 8, 1>}, {pipeline_mode = #tpu.pipeline_mode<synchronous>, transform_indices = @transform_3, window_bounds = array<i64: 1, 1024>}, {pipeline_mode = #tpu.pipeline_mode<synchronous>, transform_indices = @transform_4, window_bounds = array<i64: 8, 72>}, {pipeline_mode = #tpu.pipeline_mode<synchronous>, transform_indices = @transform_5, window_bounds = array<i64: 8, 1>}, {pipeline_mode = #tpu.pipeline_mode<synchronous>, transform_indices = @transform_6, window_bounds = array<i64: 1024, 256>}, {pipeline_mode = #tpu.pipeline_mode<synchronous>, transform_indices = @transform_7, window_bounds = array<i64: 8, 72>}, {pipeline_mode = #tpu.pipeline_mode<synchronous>, transform_indices = @transform_8, window_bounds = array<i64: 8, 1>}, {pipeline_mode = #tpu.pipeline_mode<synchronous>, transform_indices = @transform_9, window_bounds = array<i64: 1, 256>}, {pipeline_mode = #tpu.pipeline_mode<synchronous>, transform_indices = @transform_10, window_bounds = array<i64: 8, 72>}, {pipeline_mode = #tpu.pipeline_mode<synchronous>, transform_indices = @transform_11, window_bounds = array<i64: 8, 1>}, {pipeline_mode = #tpu.pipeline_mode<synchronous>, transform_indices = @transform_12, window_bounds = array<i64: 8, 256, 128>}, {pipeline_mode = #tpu.pipeline_mode<synchronous>, transform_indices = @transform_13, window_bounds = array<i64: 1, 128>}, {transform_indices = @transform_14, window_bounds = array<i64: 1, 1, 128>}]} {
    %c0 = arith.constant 0 : index
    %c0_0 = arith.constant 0 : index
    %c0_1 = arith.constant 0 : index
    %0 = vector.load %arg1[%c0, %c0_0, %c0_1] : memref<1x8x1024xf32, #tpu.memory_space<vmem>>, vector<1x8x1024xf32>
    %1 = vector.shape_cast %0 : vector<1x8x1024xf32> to vector<8x1024xf32>
    %c0_2 = arith.constant 0 : index
    %c0_3 = arith.constant 0 : index
    %2 = vector.load %arg2[%c0_2, %c0_3] : memref<8x72xf32, #tpu.memory_space<vmem>>, vector<8x72xf32>
    %c0_4 = arith.constant 0 : index
    %c0_5 = arith.constant 0 : index
    %3 = vector.load %arg3[%c0_4, %c0_5] : memref<8x1xf32, #tpu.memory_space<vmem>>, vector<8x1xf32>
    %c31_i32 = arith.constant 31 : i32
    %4 = tpu.dynamic_rotate %1 by %c31_i32 dim 1 : vector<8x1024xf32>, i32 -> vector<8x1024xf32>
    %c30_i32 = arith.constant 30 : i32
    %5 = tpu.dynamic_rotate %1 by %c30_i32 dim 1 : vector<8x1024xf32>, i32 -> vector<8x1024xf32>
    %c29_i32 = arith.constant 29 : i32
    %6 = tpu.dynamic_rotate %1 by %c29_i32 dim 1 : vector<8x1024xf32>, i32 -> vector<8x1024xf32>
    %c1_i32 = arith.constant 1 : i32
    %7 = tpu.dynamic_rotate %1 by %c1_i32 dim 1 : vector<8x1024xf32>, i32 -> vector<8x1024xf32>
    %c1023_i32 = arith.constant 1023 : i32
    %8 = tpu.dynamic_rotate %1 by %c1023_i32 dim 1 : vector<8x1024xf32>, i32 -> vector<8x1024xf32>
    %c995_i32 = arith.constant 995 : i32
    %9 = tpu.dynamic_rotate %1 by %c995_i32 dim 1 : vector<8x1024xf32>, i32 -> vector<8x1024xf32>
    %c994_i32 = arith.constant 994 : i32
    %10 = tpu.dynamic_rotate %1 by %c994_i32 dim 1 : vector<8x1024xf32>, i32 -> vector<8x1024xf32>
    %c993_i32 = arith.constant 993 : i32
    %11 = tpu.dynamic_rotate %1 by %c993_i32 dim 1 : vector<8x1024xf32>, i32 -> vector<8x1024xf32>
    %12 = tpu.concatenate %4, %5, %6, %7, %1, %8, %9, %10, %11 in 0 : vector<8x1024xf32>, vector<8x1024xf32>, vector<8x1024xf32>, vector<8x1024xf32>, vector<8x1024xf32>, vector<8x1024xf32>, vector<8x1024xf32>, vector<8x1024xf32>, vector<8x1024xf32> -> vector<72x1024xf32>
    %cst = arith.constant dense<0.000000e+00> : vector<8x1024xf32>
    %13 = tpu.matmul %2, %12, %cst {dimension_numbers = #tpu.dot_dimension_numbers<[1], [0], [0], [1], [0, 0, 1, 1], [], []>} : vector<8x72xf32>, vector<72x1024xf32>, vector<8x1024xf32> -> vector<8x1024xf32>
    %14 = vector.broadcast %3 : vector<8x1xf32> to vector<8x1024xf32>
    %15 = arith.addf %13, %14 : vector<8x1024xf32>
    %cst_6 = arith.constant 0.000000e+00 : f32
    %16 = vector.broadcast %cst_6 : f32 to vector<8x1024xf32>
    %17 = arith.maximumf %15, %16 : vector<8x1024xf32>
    %c0_7 = arith.constant 0 : index
    %c0_8 = arith.constant 0 : index
    %18 = vector.load %arg4[%c0_7, %c0_8] : memref<1x1024xf32, #tpu.memory_space<vmem>>, vector<1x1024xf32>
    %19 = vector.broadcast %18 : vector<1x1024xf32> to vector<8x1024xf32>
    %20 = arith.mulf %17, %19 : vector<8x1024xf32>
    %c0_9 = arith.constant 0 : index
    %c0_10 = arith.constant 0 : index
    %21 = vector.load %arg5[%c0_9, %c0_10] : memref<8x72xf32, #tpu.memory_space<vmem>>, vector<8x72xf32>
    %c0_11 = arith.constant 0 : index
    %c0_12 = arith.constant 0 : index
    %22 = vector.load %arg6[%c0_11, %c0_12] : memref<8x1xf32, #tpu.memory_space<vmem>>, vector<8x1xf32>
    %c31_i32_13 = arith.constant 31 : i32
    %23 = tpu.dynamic_rotate %20 by %c31_i32_13 dim 1 : vector<8x1024xf32>, i32 -> vector<8x1024xf32>
    %c30_i32_14 = arith.constant 30 : i32
    %24 = tpu.dynamic_rotate %20 by %c30_i32_14 dim 1 : vector<8x1024xf32>, i32 -> vector<8x1024xf32>
    %c29_i32_15 = arith.constant 29 : i32
    %25 = tpu.dynamic_rotate %20 by %c29_i32_15 dim 1 : vector<8x1024xf32>, i32 -> vector<8x1024xf32>
    %c1_i32_16 = arith.constant 1 : i32
    %26 = tpu.dynamic_rotate %20 by %c1_i32_16 dim 1 : vector<8x1024xf32>, i32 -> vector<8x1024xf32>
    %c1023_i32_17 = arith.constant 1023 : i32
    %27 = tpu.dynamic_rotate %20 by %c1023_i32_17 dim 1 : vector<8x1024xf32>, i32 -> vector<8x1024xf32>
    %c995_i32_18 = arith.constant 995 : i32
    %28 = tpu.dynamic_rotate %20 by %c995_i32_18 dim 1 : vector<8x1024xf32>, i32 -> vector<8x1024xf32>
    %c994_i32_19 = arith.constant 994 : i32
    %29 = tpu.dynamic_rotate %20 by %c994_i32_19 dim 1 : vector<8x1024xf32>, i32 -> vector<8x1024xf32>
    %c993_i32_20 = arith.constant 993 : i32
    %30 = tpu.dynamic_rotate %20 by %c993_i32_20 dim 1 : vector<8x1024xf32>, i32 -> vector<8x1024xf32>
    %31 = tpu.concatenate %23, %24, %25, %26, %20, %27, %28, %29, %30 in 0 : vector<8x1024xf32>, vector<8x1024xf32>, vector<8x1024xf32>, vector<8x1024xf32>, vector<8x1024xf32>, vector<8x1024xf32>, vector<8x1024xf32>, vector<8x1024xf32>, vector<8x1024xf32> -> vector<72x1024xf32>
    %cst_21 = arith.constant dense<0.000000e+00> : vector<8x1024xf32>
    %32 = tpu.matmul %21, %31, %cst_21 {dimension_numbers = #tpu.dot_dimension_numbers<[1], [0], [0], [1], [0, 0, 1, 1], [], []>} : vector<8x72xf32>, vector<72x1024xf32>, vector<8x1024xf32> -> vector<8x1024xf32>
    %33 = vector.broadcast %22 : vector<8x1xf32> to vector<8x1024xf32>
    %34 = arith.addf %32, %33 : vector<8x1024xf32>
    %c1023_i32_22 = arith.constant 1023 : i32
    %35 = tpu.dynamic_rotate %34 by %c1023_i32_22 dim 1 : vector<8x1024xf32>, i32 -> vector<8x1024xf32>
    %36 = arith.maximumf %34, %35 : vector<8x1024xf32>
    %c994_i32_23 = arith.constant 994 : i32
    %37 = tpu.dynamic_rotate %36 by %c994_i32_23 dim 1 : vector<8x1024xf32>, i32 -> vector<8x1024xf32>
    %38 = arith.maximumf %36, %37 : vector<8x1024xf32>
    %c0_24 = arith.constant 0 : index
    %c0_25 = arith.constant 0 : index
    %39 = vector.load %arg7[%c0_24, %c0_25] : memref<1024x256xf32, #tpu.memory_space<vmem>>, vector<1024x256xf32>
    %cst_26 = arith.constant dense<0.000000e+00> : vector<8x256xf32>
    %40 = tpu.matmul %38, %39, %cst_26 {dimension_numbers = #tpu.dot_dimension_numbers<[1], [0], [0], [1], [0, 0, 1, 1], [], []>} : vector<8x1024xf32>, vector<1024x256xf32>, vector<8x256xf32> -> vector<8x256xf32>
    %c0_27 = arith.constant 0 : index
    %c0_28 = arith.constant 0 : index
    %41 = vector.load %arg8[%c0_27, %c0_28] : memref<8x72xf32, #tpu.memory_space<vmem>>, vector<8x72xf32>
    %c0_29 = arith.constant 0 : index
    %c0_30 = arith.constant 0 : index
    %42 = vector.load %arg9[%c0_29, %c0_30] : memref<8x1xf32, #tpu.memory_space<vmem>>, vector<8x1xf32>
    %c17_i32 = arith.constant 17 : i32
    %43 = tpu.dynamic_rotate %40 by %c17_i32 dim 1 : vector<8x256xf32>, i32 -> vector<8x256xf32>
    %c16_i32 = arith.constant 16 : i32
    %44 = tpu.dynamic_rotate %40 by %c16_i32 dim 1 : vector<8x256xf32>, i32 -> vector<8x256xf32>
    %c15_i32 = arith.constant 15 : i32
    %45 = tpu.dynamic_rotate %40 by %c15_i32 dim 1 : vector<8x256xf32>, i32 -> vector<8x256xf32>
    %c1_i32_31 = arith.constant 1 : i32
    %46 = tpu.dynamic_rotate %40 by %c1_i32_31 dim 1 : vector<8x256xf32>, i32 -> vector<8x256xf32>
    %c255_i32 = arith.constant 255 : i32
    %47 = tpu.dynamic_rotate %40 by %c255_i32 dim 1 : vector<8x256xf32>, i32 -> vector<8x256xf32>
    %c241_i32 = arith.constant 241 : i32
    %48 = tpu.dynamic_rotate %40 by %c241_i32 dim 1 : vector<8x256xf32>, i32 -> vector<8x256xf32>
    %c240_i32 = arith.constant 240 : i32
    %49 = tpu.dynamic_rotate %40 by %c240_i32 dim 1 : vector<8x256xf32>, i32 -> vector<8x256xf32>
    %c239_i32 = arith.constant 239 : i32
    %50 = tpu.dynamic_rotate %40 by %c239_i32 dim 1 : vector<8x256xf32>, i32 -> vector<8x256xf32>
    %51 = tpu.concatenate %43, %44, %45, %46, %40, %47, %48, %49, %50 in 0 : vector<8x256xf32>, vector<8x256xf32>, vector<8x256xf32>, vector<8x256xf32>, vector<8x256xf32>, vector<8x256xf32>, vector<8x256xf32>, vector<8x256xf32>, vector<8x256xf32> -> vector<72x256xf32>
    %cst_32 = arith.constant dense<0.000000e+00> : vector<8x256xf32>
    %52 = tpu.matmul %41, %51, %cst_32 {dimension_numbers = #tpu.dot_dimension_numbers<[1], [0], [0], [1], [0, 0, 1, 1], [], []>} : vector<8x72xf32>, vector<72x256xf32>, vector<8x256xf32> -> vector<8x256xf32>
    %53 = vector.broadcast %42 : vector<8x1xf32> to vector<8x256xf32>
    %54 = arith.addf %52, %53 : vector<8x256xf32>
    %cst_33 = arith.constant 0.000000e+00 : f32
    %55 = vector.broadcast %cst_33 : f32 to vector<8x256xf32>
    %56 = arith.maximumf %54, %55 : vector<8x256xf32>
    %c0_34 = arith.constant 0 : index
    %c0_35 = arith.constant 0 : index
    %57 = vector.load %arg10[%c0_34, %c0_35] : memref<1x256xf32, #tpu.memory_space<vmem>>, vector<1x256xf32>
    %58 = vector.broadcast %57 : vector<1x256xf32> to vector<8x256xf32>
    %59 = arith.mulf %56, %58 : vector<8x256xf32>
    %c0_36 = arith.constant 0 : index
    %c0_37 = arith.constant 0 : index
    %60 = vector.load %arg11[%c0_36, %c0_37] : memref<8x72xf32, #tpu.memory_space<vmem>>, vector<8x72xf32>
    %c0_38 = arith.constant 0 : index
    %c0_39 = arith.constant 0 : index
    %61 = vector.load %arg12[%c0_38, %c0_39] : memref<8x1xf32, #tpu.memory_space<vmem>>, vector<8x1xf32>
    %c17_i32_40 = arith.constant 17 : i32
    %62 = tpu.dynamic_rotate %59 by %c17_i32_40 dim 1 : vector<8x256xf32>, i32 -> vector<8x256xf32>
    %c16_i32_41 = arith.constant 16 : i32
    %63 = tpu.dynamic_rotate %59 by %c16_i32_41 dim 1 : vector<8x256xf32>, i32 -> vector<8x256xf32>
    %c15_i32_42 = arith.constant 15 : i32
    %64 = tpu.dynamic_rotate %59 by %c15_i32_42 dim 1 : vector<8x256xf32>, i32 -> vector<8x256xf32>
    %c1_i32_43 = arith.constant 1 : i32
    %65 = tpu.dynamic_rotate %59 by %c1_i32_43 dim 1 : vector<8x256xf32>, i32 -> vector<8x256xf32>
    %c255_i32_44 = arith.constant 255 : i32
    %66 = tpu.dynamic_rotate %59 by %c255_i32_44 dim 1 : vector<8x256xf32>, i32 -> vector<8x256xf32>
    %c241_i32_45 = arith.constant 241 : i32
    %67 = tpu.dynamic_rotate %59 by %c241_i32_45 dim 1 : vector<8x256xf32>, i32 -> vector<8x256xf32>
    %c240_i32_46 = arith.constant 240 : i32
    %68 = tpu.dynamic_rotate %59 by %c240_i32_46 dim 1 : vector<8x256xf32>, i32 -> vector<8x256xf32>
    %c239_i32_47 = arith.constant 239 : i32
    %69 = tpu.dynamic_rotate %59 by %c239_i32_47 dim 1 : vector<8x256xf32>, i32 -> vector<8x256xf32>
    %70 = tpu.concatenate %62, %63, %64, %65, %59, %66, %67, %68, %69 in 0 : vector<8x256xf32>, vector<8x256xf32>, vector<8x256xf32>, vector<8x256xf32>, vector<8x256xf32>, vector<8x256xf32>, vector<8x256xf32>, vector<8x256xf32>, vector<8x256xf32> -> vector<72x256xf32>
    %cst_48 = arith.constant dense<0.000000e+00> : vector<8x256xf32>
    %71 = tpu.matmul %60, %70, %cst_48 {dimension_numbers = #tpu.dot_dimension_numbers<[1], [0], [0], [1], [0, 0, 1, 1], [], []>} : vector<8x72xf32>, vector<72x256xf32>, vector<8x256xf32> -> vector<8x256xf32>
    %72 = vector.broadcast %61 : vector<8x1xf32> to vector<8x256xf32>
    %73 = arith.addf %71, %72 : vector<8x256xf32>
    %c255_i32_49 = arith.constant 255 : i32
    %74 = tpu.dynamic_rotate %73 by %c255_i32_49 dim 1 : vector<8x256xf32>, i32 -> vector<8x256xf32>
    %75 = arith.maximumf %73, %74 : vector<8x256xf32>
    %c240_i32_50 = arith.constant 240 : i32
    %76 = tpu.dynamic_rotate %75 by %c240_i32_50 dim 1 : vector<8x256xf32>, i32 -> vector<8x256xf32>
    %77 = arith.maximumf %75, %76 : vector<8x256xf32>
    %c0_51 = arith.constant 0 : index
    %c0_52 = arith.constant 0 : index
    %78 = vector.load %arg14[%c0_51, %c0_52] : memref<1x128xf32, #tpu.memory_space<vmem>>, vector<1x128xf32>
    %79 = vector.extract_strided_slice %77 {offsets = [0, 0], sizes = [1, 256], strides = [1, 1]} : vector<8x256xf32> to vector<1x256xf32>
    %c0_53 = arith.constant 0 : index
    %c0_54 = arith.constant 0 : index
    %c0_55 = arith.constant 0 : index
    %80 = vector.load %arg13[%c0_53, %c0_54, %c0_55] : memref<8x256x128xf32, #tpu.memory_space<vmem>>, vector<1x256x128xf32>
    %81 = vector.shape_cast %80 : vector<1x256x128xf32> to vector<256x128xf32>
    %cst_56 = arith.constant dense<0.000000e+00> : vector<1x128xf32>
    %82 = tpu.matmul %79, %81, %cst_56 {dimension_numbers = #tpu.dot_dimension_numbers<[1], [0], [0], [1], [0, 0, 1, 1], [], []>} : vector<1x256xf32>, vector<256x128xf32>, vector<1x128xf32> -> vector<1x128xf32>
    %83 = arith.addf %78, %82 : vector<1x128xf32>
    %84 = vector.extract_strided_slice %77 {offsets = [1, 0], sizes = [1, 256], strides = [1, 1]} : vector<8x256xf32> to vector<1x256xf32>
    %c1 = arith.constant 1 : index
    %c0_57 = arith.constant 0 : index
    %c0_58 = arith.constant 0 : index
    %85 = vector.load %arg13[%c1, %c0_57, %c0_58] : memref<8x256x128xf32, #tpu.memory_space<vmem>>, vector<1x256x128xf32>
    %86 = vector.shape_cast %85 : vector<1x256x128xf32> to vector<256x128xf32>
    %cst_59 = arith.constant dense<0.000000e+00> : vector<1x128xf32>
    %87 = tpu.matmul %84, %86, %cst_59 {dimension_numbers = #tpu.dot_dimension_numbers<[1], [0], [0], [1], [0, 0, 1, 1], [], []>} : vector<1x256xf32>, vector<256x128xf32>, vector<1x128xf32> -> vector<1x128xf32>
    %88 = arith.addf %83, %87 : vector<1x128xf32>
    %89 = vector.extract_strided_slice %77 {offsets = [2, 0], sizes = [1, 256], strides = [1, 1]} : vector<8x256xf32> to vector<1x256xf32>
    %c2 = arith.constant 2 : index
    %c0_60 = arith.constant 0 : index
    %c0_61 = arith.constant 0 : index
    %90 = vector.load %arg13[%c2, %c0_60, %c0_61] : memref<8x256x128xf32, #tpu.memory_space<vmem>>, vector<1x256x128xf32>
    %91 = vector.shape_cast %90 : vector<1x256x128xf32> to vector<256x128xf32>
    %cst_62 = arith.constant dense<0.000000e+00> : vector<1x128xf32>
    %92 = tpu.matmul %89, %91, %cst_62 {dimension_numbers = #tpu.dot_dimension_numbers<[1], [0], [0], [1], [0, 0, 1, 1], [], []>} : vector<1x256xf32>, vector<256x128xf32>, vector<1x128xf32> -> vector<1x128xf32>
    %93 = arith.addf %88, %92 : vector<1x128xf32>
    %94 = vector.extract_strided_slice %77 {offsets = [3, 0], sizes = [1, 256], strides = [1, 1]} : vector<8x256xf32> to vector<1x256xf32>
    %c3 = arith.constant 3 : index
    %c0_63 = arith.constant 0 : index
    %c0_64 = arith.constant 0 : index
    %95 = vector.load %arg13[%c3, %c0_63, %c0_64] : memref<8x256x128xf32, #tpu.memory_space<vmem>>, vector<1x256x128xf32>
    %96 = vector.shape_cast %95 : vector<1x256x128xf32> to vector<256x128xf32>
    %cst_65 = arith.constant dense<0.000000e+00> : vector<1x128xf32>
    %97 = tpu.matmul %94, %96, %cst_65 {dimension_numbers = #tpu.dot_dimension_numbers<[1], [0], [0], [1], [0, 0, 1, 1], [], []>} : vector<1x256xf32>, vector<256x128xf32>, vector<1x128xf32> -> vector<1x128xf32>
    %98 = arith.addf %93, %97 : vector<1x128xf32>
    %99 = vector.extract_strided_slice %77 {offsets = [4, 0], sizes = [1, 256], strides = [1, 1]} : vector<8x256xf32> to vector<1x256xf32>
    %c4 = arith.constant 4 : index
    %c0_66 = arith.constant 0 : index
    %c0_67 = arith.constant 0 : index
    %100 = vector.load %arg13[%c4, %c0_66, %c0_67] : memref<8x256x128xf32, #tpu.memory_space<vmem>>, vector<1x256x128xf32>
    %101 = vector.shape_cast %100 : vector<1x256x128xf32> to vector<256x128xf32>
    %cst_68 = arith.constant dense<0.000000e+00> : vector<1x128xf32>
    %102 = tpu.matmul %99, %101, %cst_68 {dimension_numbers = #tpu.dot_dimension_numbers<[1], [0], [0], [1], [0, 0, 1, 1], [], []>} : vector<1x256xf32>, vector<256x128xf32>, vector<1x128xf32> -> vector<1x128xf32>
    %103 = arith.addf %98, %102 : vector<1x128xf32>
    %104 = vector.extract_strided_slice %77 {offsets = [5, 0], sizes = [1, 256], strides = [1, 1]} : vector<8x256xf32> to vector<1x256xf32>
    %c5 = arith.constant 5 : index
    %c0_69 = arith.constant 0 : index
    %c0_70 = arith.constant 0 : index
    %105 = vector.load %arg13[%c5, %c0_69, %c0_70] : memref<8x256x128xf32, #tpu.memory_space<vmem>>, vector<1x256x128xf32>
    %106 = vector.shape_cast %105 : vector<1x256x128xf32> to vector<256x128xf32>
    %cst_71 = arith.constant dense<0.000000e+00> : vector<1x128xf32>
    %107 = tpu.matmul %104, %106, %cst_71 {dimension_numbers = #tpu.dot_dimension_numbers<[1], [0], [0], [1], [0, 0, 1, 1], [], []>} : vector<1x256xf32>, vector<256x128xf32>, vector<1x128xf32> -> vector<1x128xf32>
    %108 = arith.addf %103, %107 : vector<1x128xf32>
    %109 = vector.extract_strided_slice %77 {offsets = [6, 0], sizes = [1, 256], strides = [1, 1]} : vector<8x256xf32> to vector<1x256xf32>
    %c6 = arith.constant 6 : index
    %c0_72 = arith.constant 0 : index
    %c0_73 = arith.constant 0 : index
    %110 = vector.load %arg13[%c6, %c0_72, %c0_73] : memref<8x256x128xf32, #tpu.memory_space<vmem>>, vector<1x256x128xf32>
    %111 = vector.shape_cast %110 : vector<1x256x128xf32> to vector<256x128xf32>
    %cst_74 = arith.constant dense<0.000000e+00> : vector<1x128xf32>
    %112 = tpu.matmul %109, %111, %cst_74 {dimension_numbers = #tpu.dot_dimension_numbers<[1], [0], [0], [1], [0, 0, 1, 1], [], []>} : vector<1x256xf32>, vector<256x128xf32>, vector<1x128xf32> -> vector<1x128xf32>
    %113 = arith.addf %108, %112 : vector<1x128xf32>
    %114 = vector.extract_strided_slice %77 {offsets = [7, 0], sizes = [1, 256], strides = [1, 1]} : vector<8x256xf32> to vector<1x256xf32>
    %c7 = arith.constant 7 : index
    %c0_75 = arith.constant 0 : index
    %c0_76 = arith.constant 0 : index
    %115 = vector.load %arg13[%c7, %c0_75, %c0_76] : memref<8x256x128xf32, #tpu.memory_space<vmem>>, vector<1x256x128xf32>
    %116 = vector.shape_cast %115 : vector<1x256x128xf32> to vector<256x128xf32>
    %cst_77 = arith.constant dense<0.000000e+00> : vector<1x128xf32>
    %117 = tpu.matmul %114, %116, %cst_77 {dimension_numbers = #tpu.dot_dimension_numbers<[1], [0], [0], [1], [0, 0, 1, 1], [], []>} : vector<1x256xf32>, vector<256x128xf32>, vector<1x128xf32> -> vector<1x128xf32>
    %118 = arith.addf %113, %117 : vector<1x128xf32>
    %c0_78 = arith.constant 0 : index
    %c0_79 = arith.constant 0 : index
    %c0_80 = arith.constant 0 : index
    %119 = vector.load %arg15[%c0_78, %c0_79, %c0_80] : memref<1x1x128xf32, #tpu.memory_space<vmem>>, vector<1x1x128xf32>
    %120 = vector.shape_cast %119 : vector<1x1x128xf32> to vector<1x128xf32>
    %121 = vector.shape_cast %118 : vector<1x128xf32> to vector<1x1x128xf32>
    tpu.vector_store %arg15[%c0_78, %c0_79, %c0_80], %121 {strides = array<i32>} : memref<1x1x128xf32, #tpu.memory_space<vmem>>, vector<1x1x128xf32>,
    return
  }
  func.func @transform_0(%arg0: i32) -> (i32, i32, i32) {
    %c0_i32 = arith.constant 0 : i32
    %c0_i32_0 = arith.constant 0 : i32
    %c0_i32_1 = arith.constant 0 : i32
    return %arg0, %c0_i32, %c0_i32_0 : i32, i32, i32
  }
  func.func @transform_1(%arg0: i32) -> (i32, i32) {
    %c0_i32 = arith.constant 0 : i32
    %c0_i32_0 = arith.constant 0 : i32
    %c0_i32_1 = arith.constant 0 : i32
    return %c0_i32, %c0_i32_0 : i32, i32
  }
  func.func @transform_2(%arg0: i32) -> (i32, i32) {
    %c0_i32 = arith.constant 0 : i32
    %c0_i32_0 = arith.constant 0 : i32
    %c0_i32_1 = arith.constant 0 : i32
    return %c0_i32, %c0_i32_0 : i32, i32
  }
  func.func @transform_3(%arg0: i32) -> (i32, i32) {
    %c0_i32 = arith.constant 0 : i32
    %c0_i32_0 = arith.constant 0 : i32
    %c0_i32_1 = arith.constant 0 : i32
    return %c0_i32, %c0_i32_0 : i32, i32
  }
  func.func @transform_4(%arg0: i32) -> (i32, i32) {
    %c0_i32 = arith.constant 0 : i32
    %c0_i32_0 = arith.constant 0 : i32
    %c0_i32_1 = arith.constant 0 : i32
    return %c0_i32, %c0_i32_0 : i32, i32
  }
  func.func @transform_5(%arg0: i32) -> (i32, i32) {
    %c0_i32 = arith.constant 0 : i32
    %c0_i32_0 = arith.constant 0 : i32
    %c0_i32_1 = arith.constant 0 : i32
    return %c0_i32, %c0_i32_0 : i32, i32
  }
  func.func @transform_6(%arg0: i32) -> (i32, i32) {
    %c0_i32 = arith.constant 0 : i32
    %c0_i32_0 = arith.constant 0 : i32
    %c0_i32_1 = arith.constant 0 : i32
    return %c0_i32, %c0_i32_0 : i32, i32
  }
  func.func @transform_7(%arg0: i32) -> (i32, i32) {
    %c0_i32 = arith.constant 0 : i32
    %c0_i32_0 = arith.constant 0 : i32
    %c0_i32_1 = arith.constant 0 : i32
    return %c0_i32, %c0_i32_0 : i32, i32
  }
  func.func @transform_8(%arg0: i32) -> (i32, i32) {
    %c0_i32 = arith.constant 0 : i32
    %c0_i32_0 = arith.constant 0 : i32
    %c0_i32_1 = arith.constant 0 : i32
    return %c0_i32, %c0_i32_0 : i32, i32
  }
  func.func @transform_9(%arg0: i32) -> (i32, i32) {
    %c0_i32 = arith.constant 0 : i32
    %c0_i32_0 = arith.constant 0 : i32
    %c0_i32_1 = arith.constant 0 : i32
    return %c0_i32, %c0_i32_0 : i32, i32
  }
  func.func @transform_10(%arg0: i32) -> (i32, i32) {
    %c0_i32 = arith.constant 0 : i32
    %c0_i32_0 = arith.constant 0 : i32
    %c0_i32_1 = arith.constant 0 : i32
    return %c0_i32, %c0_i32_0 : i32, i32
  }
  func.func @transform_11(%arg0: i32) -> (i32, i32) {
    %c0_i32 = arith.constant 0 : i32
    %c0_i32_0 = arith.constant 0 : i32
    %c0_i32_1 = arith.constant 0 : i32
    return %c0_i32, %c0_i32_0 : i32, i32
  }
  func.func @transform_12(%arg0: i32) -> (i32, i32, i32) {
    %c0_i32 = arith.constant 0 : i32
    %c0_i32_0 = arith.constant 0 : i32
    %c0_i32_1 = arith.constant 0 : i32
    %c0_i32_2 = arith.constant 0 : i32
    return %c0_i32, %c0_i32_0, %c0_i32_1 : i32, i32, i32
  }
  func.func @transform_13(%arg0: i32) -> (i32, i32) {
    %c0_i32 = arith.constant 0 : i32
    %c0_i32_0 = arith.constant 0 : i32
    %c0_i32_1 = arith.constant 0 : i32
    return %c0_i32, %c0_i32_0 : i32, i32
  }
  func.func @transform_14(%arg0: i32) -> (i32, i32, i32) {
    %c0_i32 = arith.constant 0 : i32
    %c0_i32_0 = arith.constant 0 : i32
    %c0_i32_1 = arith.constant 0 : i32
    return %arg0, %c0_i32, %c0_i32_0 : i32, i32, i32
  }
}

</mosaic_0001>

<bundles_post_ra>
// kernel: stacked_cnn_forward.1
= control target key start
LH: loop header
LB: loop body
LE: loop exit
PB: predicated region body
PF: predicated region fallthrough
CT: control target
= control target key end

     0   :  { %s7861_s0 = inlined_call_operand.vmem [shape: f32[4,8,1024], index: 0, kind: input, shape index: {}]   ;;  %s7862_s1 = inlined_call_operand.vmem [shape: f32[8,72], index: 1, kind: input, shape index: {}]   ;;  %s7863_s2 = inlined_call_operand.vmem [shape: f32[8,1], index: 2, kind: input, shape index: {}]   ;;  %s7864_s3 = inlined_call_operand.vmem [shape: f32[1,1024], index: 3, kind: input, shape index: {}]   ;;  %s7865_s4 = inlined_call_operand.vmem [shape: f32[8,72], index: 4, kind: input, shape index: {}]   ;;  %s7866_s5 = inlined_call_operand.vmem [shape: f32[8,1], index: 5, kind: input, shape index: {}]   ;;  %s7867_s6 = inlined_call_operand.vmem [shape: f32[1024,256], index: 6, kind: input, shape index: {}]   ;;  %s7868_s7 = inlined_call_operand.vmem [shape: f32[8,72], index: 7, kind: input, shape index: {}]   ;;  %s7869_s8 = inlined_call_operand.vmem [shape: f32[8,1], index: 8, kind: input, shape index: {}]   ;;  %s7870_s9 = inlined_call_operand.vmem [shape: f32[1,256], index: 9, kind: input, shape index: {}]   ;;  %s7871_s10 = inlined_call_operand.vmem [shape: f32[8,72], index: 10, kind: input, shape index: {}]   ;;  %s7872_s11 = inlined_call_operand.vmem [shape: f32[8,1], index: 11, kind: input, shape index: {}]   ;;  %s7873_s12 = inlined_call_operand.vmem [shape: f32[8,256,128], index: 12, kind: input, shape index: {}]   ;;  %s7874_s13 = inlined_call_operand.vmem [shape: f32[1,128], index: 13, kind: input, shape index: {}]   ;;  %s7875_s14 = inlined_call_operand.hbm [shape: f32[4,1,128], index: 14, kind: output, shape index: {}]  }
   0x1   :  { %7891 = sst [smem:[#allocation7_spill]] %s7861_s0 }
   0x2   :  { %7892 = sst [smem:[#allocation8_spill]] %s7862_s1 }
   0x3   :  { %7893 = sst [smem:[#allocation9_spill]] %s7863_s2 }
   0x4   :  { %7894 = sst [smem:[#allocation10_spill]] %s7864_s3 }
   0x5   :  { %19 = vsyncpa [#allocation3], 0 }
   0x6   :  { %21 = vsyncpa [#allocation3 + $0x1], 0  ;;  %s5105_s29 = smov 0   ;;  %s5107_s30 = smov 0  }
   0x7   :  { %s5109_s15 = smov 0   ;;  %s5111_s16 = smov 0  }
   0x8 LB: > { %7895 = sst [smem:[#allocation5_spill]] %s5007_s15  ;;  %s5126_s17 = sadd.s32 4294967295, %s5011_s16   ;;  %s5011_s16 = sphi %s5111_s16, %s7914_s16   ;;  %s5007_s15 = sphi %s5109_s15, %s7911_s15   ;;  %s5003_s30 = sphi %s5107_s30, %s7913_s30   ;;  %s4999_s29 = sphi %s5105_s29, %s7912_s29  }
   0x9   : > { %s3345_s18 = sadd.s32 4294967294, %s5011_s16   ;;  %s5130_s19 = sadd.s32 1, %s5011_s16  }
   0xa   : > { %s333_s20 = sadd.s32 1, %s5007_s15  ;;  %s330_s21 = ssub.s32 %s5011_s16, %s5130_s19 }
   0xb   : > { %p343_p0 = scmp.ne.s32.totalorder %s5007_s15, %s5003_s30  ;;  %p331_p1 = scmp.eq.s32.totalorder %s330_s21, 0 }
   0xc   : > { %p344_p2 = scmp.eq.s32.totalorder %s5126_s17, 3  ;;  %p349_p3 = scmp.ne.s32.totalorder %s5003_s30, %s4999_s29 }
   0xd   : > { %p350_p4 = scmp.eq.s32.totalorder %s3345_s18, 3  ;;  %p3348_p7 = scmp.ge.s32.totalorder %s5011_s16, 1 }
   0xe   : > { %s5141_s22 = scalar_select %p331_p1, %s5007_s15, %s333_s20  }
   0xf   : > { %p5143_p5 = por %p344_p2, %p343_p0  ;;  %p5147_p6 = por %p350_p4, %p349_p3 }
  0x10   : > { %7896 = sst [smem:[#allocation6_spill]] %s5141_s22  ;;  %p415_p8 = scmp.lt.s32.totalorder %s5011_s16, 5 }
  0x12   : > { %p416_p9 = pnand %p3348_p7, %p415_p8 }
  0x13   : > { %p460_p10 = scmp.lt.s32.totalorder (!%p416_p9), %s5126_s17, 3  ;;  %s7899_s0 = sld [smem:[#allocation7_spill]] (!%p416_p9)  ;;  %v5020_v11 = vmov (!%p416_p9), 0.0   ;;  %v5022_v16 = vmov (!%p416_p9), 0   ;;  %v491_v18 = vlaneseq (!%p416_p9)  ;;  %vm682_vm8 = vcmask (!%p416_p9), 588800  }
  0x14   : > { %419 = sbr.rel (%p416_p9) target bundleno = 2909 (0xb5d), region = 76  ;;  %s7876_s20 = smov (!%p416_p9), 31   ;;  %750 = vmatprep.mubr.f32.mxu1 (!%p416_p9), %v5020_v11  ;;  %892 = vmatprep.mubr.f32.mxu0 (!%p416_p9), %v5020_v11 }
  0x15   : > { %s7884_s21 = smov (!%p416_p9), 30   ;;  %s7880_s27 = smov (!%p416_p9), 127   ;;  %4727 = vset.pattern.permute.xlu1 (!%p416_p9), %v5022_v16  ;;  %4903 = vset.pattern.permute.xlu0 (!%p416_p9), %v5022_v16  ;;  %v5259_v20 = vand.u32 (!%p416_p9), 127, %v491_v18 }
  0x16   : > { %s7889_s28 = smov (!%p416_p9), 98   ;;  %s7906_s2 = sld [smem:[#allocation9_spill]] (!%p416_p9) }
  0x17   : > { %vm493_vm0 = vcmp.lt.s32.totalorder (!%p416_p9), %v5259_v20, 31  ;;  %vm518_vm1 = vcmp.lt.s32.totalorder (!%p416_p9), %v5259_v20, 30  ;;  %vm568_vm2 = vcmp.lt.s32.totalorder (!%p416_p9), %v5259_v20, 1  ;;  %vm543_vm3 = vcmp.lt.s32.totalorder (!%p416_p9), %v5259_v20, 29  ;;  %s7907_s1 = sld [smem:[#allocation8_spill]] (!%p416_p9)  ;;  %s7908_s3 = sld [smem:[#allocation10_spill]] (!%p416_p9) }
  0x18   : > { %vm593_vm4 = vcmp.lt.s32.totalorder (!%p416_p9), %v5259_v20, 127  ;;  %vm643_vm5 = vcmp.lt.s32.totalorder (!%p416_p9), %v5259_v20, 98  ;;  %vm618_vm6 = vcmp.lt.s32.totalorder (!%p416_p9), %v5259_v20, 99  ;;  %vm668_vm7 = vcmp.lt.s32.totalorder (!%p416_p9), %v5259_v20, 97  ;;  %s5026_s22 = smov (!%p416_p9), 113   ;;  %s5027_s15 = smov (!%p416_p9), 111  }
  0x19   : > { %vm2131_vm9 = vcmp.lt.s32.totalorder (!%p416_p9), %v5259_v20, 16  ;;  %vm2124_vm10 = vcmp.lt.s32.totalorder (!%p416_p9), %v5259_v20, 17  ;;  %vm2138_vm11 = vcmp.lt.s32.totalorder (!%p416_p9), %v5259_v20, 15  ;;  %vm2157_vm12 = vcmp.lt.s32.totalorder (!%p416_p9), %v5259_v20, 113 }
  0x1a   : > { %vm2164_vm13 = vcmp.lt.s32.totalorder (!%p416_p9), %v5259_v20, 112  ;;  %vm2171_vm14 = vcmp.lt.s32.totalorder (!%p416_p9), %v5259_v20, 111 }
  0x1b   : > { %s461_s25 = scalar_select %p460_p10, %s5126_s17, 3 }
  0x1c   : > { %v474_v17 = vld [vmem:[%s7906_s2] sm:$0xff]  ;;  %s458_s2 = sand.u32 1, %s5003_s30  }
  0x1d   : > { %s3588_s26 = sshll.u32 %s461_s25, 6  ;;  %s7878_s25 = smov 1  }
  0x1e   : > { %s5158_s18 = scalar_lea.vmem %s7899_s0, %s3588_s26  ;;  %s7886_s26 = smov 29  }
  0x1f   : > { %v5161_v0 = vld [vmem:[%s5158_s18 + $0x10] sm:$0xff]  ;;  %v5164_v1 = vld [vmem:[%s5158_s18 + $0x38] sm:$0xff]  ;;  %v5167_v2 = vld [vmem:[%s5158_s18] sm:$0xff]  ;;  %s7903_s0 = smov 99  }
  0x20   : > { %v4612_v3 = vpack.i.bf16 %v5161_v0, %v5164_v1  ;;  %v5172_v4 = vld [vmem:[%s5158_s18 + $0x8] sm:$0xff]  ;;  %v5183_v6 = vld [vmem:[%s5158_s18 + $0x18] sm:$0xff]  ;;  %v5196_v9 = vld [vmem:[%s5158_s18 + $0x30] sm:$0xff] }
  0x21   : > { %v4602_v5 = vpack.i.bf16 %v5172_v4, %v5167_v2  ;;  %v4647_v7 = vpack.i.bf16 %v5183_v6, %v5167_v2  ;;  %v4642_v8 = vpack.i.bf16 %v5161_v0, %v5172_v4  ;;  %v4677_v10 = vpack.i.bf16 %v5196_v9, %v5183_v6  ;;  %v5214_v12 = vld [vmem:[%s5158_s18 + $0x20] sm:$0xff]  ;;  %v5224_v13 = vld [vmem:[%s5158_s18 + $0x28] sm:$0xff]  ;;  %s7905_s18 = smov 29  }
  0x22   : > { %4613 = vrot.lane.b32.xlu1 %v4612_v3, %s7876_s20  ;;  %v4697_v14 = vpack.i.bf16 %v5214_v12, %v5224_v13  ;;  %v4717_v15 = vpack.i.bf16 %v5196_v9, %v5164_v1 }
  0x23   : > { %4603 = vrot.lane.b32.xlu0 %v4602_v5, %s7876_s20  ;;  %s7882_s20 = smov 99  }
  0x26   : > { %4618 = vrot.lane.b32.xlu1 %v4612_v3, %s7884_s21 }
  0x27   : > { %4608 = vrot.lane.b32.xlu0 %v4602_v5, %s7884_s21 }
  0x2a   : > { %4628 = vrot.lane.b32.xlu1 %v4602_v5, %s7878_s25 }
  0x2b   : > { %4623 = vrot.lane.b32.xlu0 %v4602_v5, %s7886_s26 }
  0x2e   : > { %4638 = vrot.lane.b32.xlu1 %v4612_v3, %s7878_s25  ;;  %s7900_s25 = smov 31  }
  0x2f   : > { %4633 = vrot.lane.b32.xlu0 %v4612_v3, %s7886_s26 }
  0x32   : > { %4648 = vrot.lane.b32.xlu1 %v4647_v7, %s7880_s27 }
  0x33   : > { %4643 = vrot.lane.b32.xlu0 %v4642_v8, %s7880_s27  ;;  %s5021_s27 = smov 97  }
  0x36   : > { %4658 = vrot.lane.b32.xlu1 %v4642_v8, %s7889_s28 }
  0x37   : > { %4653 = vrot.lane.b32.xlu0 %v4642_v8, %s7882_s20 }
  0x3a   : > { %4668 = vrot.lane.b32.xlu1 %v4647_v7, %s7889_s28 }
  0x3b   : > { %4663 = vrot.lane.b32.xlu0 %v4647_v7, %s7882_s20  ;;  %s7901_s20 = smov 127  }
  0x3e   : > { %4678 = vrot.lane.b32.xlu1 %v4677_v10, %s7884_s21  ;;  %s7902_s21 = smov 1  }
  0x3f   : > { %4673 = vrot.lane.b32.xlu0 %v4677_v10, %s7900_s25 }
  0x42   : > { %656 = vrot.lane.b32.xlu1 %v5161_v0, %s5021_s27 }
  0x43   : > { %654 = vrot.lane.b32.xlu0 %v5172_v4, %s5021_s27 }
  0x46   : > { %4683 = vrot.lane.b32.xlu1 %v4677_v10, %s7886_s26  ;;  %s7904_s26 = smov 30  }
  0x47   : > { %652 = vrot.lane.b32.xlu0 %v5167_v2, %s5021_s27 }
  0x4a   : > { %585 = vrot.lane.b32.xlu1 %v5214_v12, %s7901_s20 }
  0x4b   : > { %4688 = vrot.lane.b32.xlu0 %v4677_v10, %s7902_s21 }
  0x4e   : > { %635 = vrot.lane.b32.xlu1 %v5214_v12, %s7889_s28 }
  0x4f   : > { %610 = vrot.lane.b32.xlu0 %v5214_v12, %s7903_s0 }
  0x52   : > { %660 = vrot.lane.b32.xlu1 %v5214_v12, %s5021_s27 }
  0x53   : > { %658 = vrot.lane.b32.xlu0 %v5183_v6, %s5021_s27 }
  0x56   : > { %4698 = vrot.lane.b32.xlu1 %v4697_v14, %s7904_s26 }
  0x57   : > { %4693 = vrot.lane.b32.xlu0 %v4697_v14, %s7900_s25 }
  0x5a   : > { %4708 = vrot.lane.b32.xlu1 %v4697_v14, %s7902_s21 }
  0x5b   : > { %4703 = vrot.lane.b32.xlu0 %v4697_v14, %s7905_s18 }
  0x5e   : > { %4718 = vrot.lane.b32.xlu1 %v4717_v15, %s7903_s0 }
  0x5f   : > { %4713 = vrot.lane.b32.xlu0 %v4717_v15, %s7901_s20 }
  0x62   : > { %587 = vrot.lane.b32.xlu1 %v5224_v13, %s7901_s20 }
  0x63   : > { %4723 = vrot.lane.b32.xlu0 %v4717_v15, %s7889_s28 }
  0x66   : > { %664 = vrot.lane.b32.xlu1 %v5196_v9, %s5021_s27 }
  0x67   : > { %666 = vrot.lane.b32.xlu0 %v5164_v1, %s5021_s27 }
  0x6a   : > { %637 = vrot.lane.b32.xlu1 %v5224_v13, %s7889_s28 }
  0x6b   : > { %612 = vrot.lane.b32.xlu0 %v5224_v13, %s7903_s0 }
  0x6e   : > { %679 = vperm.xlu1 %4727, %v474_v17  }
  0x6f   : > { %662 = vrot.lane.b32.xlu0 %v5224_v13, %s5021_s27 }
  0x94   : > { %v5256_v19 = vpop.permute.xlu1 %4613 }
  0x95   : > { %v5261_v21 = vpop.permute.xlu0 %4603  ;;  %v4615_v22 = vunpack.i.l.bf16 %v5256_v19 }
  0x96   : > { %v4606_v23 = vunpack.i.h.bf16 %v5261_v21  ;;  %v4605_v24 = vunpack.i.l.bf16 %v5261_v21 }
  0x98   : > { %v5266_v25 = vpop.permute.xlu1 %4618  ;;  %v500_v31 = vsel %vm493_vm0, %v4605_v24, %v4606_v23  ;;  %v501_v33 = vsel %vm493_vm0, %v4615_v22, %v4605_v24 }
  0x99   : > { %v4620_v26 = vunpack.i.l.bf16 %v5266_v25  ;;  %v5271_v27 = vpop.permute.xlu0 %4608 }
  0x9a   : > { %v4611_v28 = vunpack.i.h.bf16 %v5271_v27  ;;  %v4610_v29 = vunpack.i.l.bf16 %v5271_v27 }
  0x9c   : > { %v5277_v30 = vpop.permute.xlu1 %4628  ;;  %v525_v32 = vsel %vm518_vm1, %v4610_v29, %v4611_v28  ;;  %v526_v34 = vsel %vm518_vm1, %v4620_v26, %v4610_v29 }
  0x9d   : > { %v4631_v35 = vunpack.i.h.bf16 %v5277_v30  ;;  %v4630_v36 = vunpack.i.l.bf16 %v5277_v30  ;;  %v5297_v37 = vpop.permute.xlu0 %4623  ;;  %v3869_v38 = vpack.c.bf16 %v525_v32, %v500_v31  ;;  %v3871_v39 = vpack.c.bf16 %v526_v34, %v501_v33 }
  0x9e   : > { %v4626_v40 = vunpack.i.h.bf16 %v5297_v37  ;;  %v4625_v41 = vunpack.i.l.bf16 %v5297_v37 }
  0x9f   : > { %3870 = vmatprep.subr.bf16.mxu1 %v3869_v38  ;;  %v575_v42 = vsel %vm568_vm2, %v4630_v36, %v4631_v35 }
  0xa0   : > { %3872 = vmatpush1.bf16.msra.mxu1 %v3871_v39  ;;  %v5305_v43 = vpop.permute.xlu1 %4638  ;;  %v550_v44 = vsel %vm543_vm3, %v4625_v41, %v4626_v40  ;;  %v4616_v39 = vunpack.i.h.bf16 %v5256_v19 }
  0xa1   : > { %v4640_v45 = vunpack.i.l.bf16 %v5305_v43  ;;  %v5312_v46 = vpop.permute.xlu0 %4633  ;;  %v3873_v47 = vpack.c.bf16 %v575_v42, %v550_v44 }
  0xa2   : > { %v4635_v48 = vunpack.i.l.bf16 %v5312_v46 }
  0xa3   : > { %3874 = vmatprep.subr.bf16.mxu1 %v3873_v47  ;;  %v576_v49 = vsel %vm568_vm2, %v4640_v45, %v4630_v36  ;;  %v4621_v36 = vunpack.i.h.bf16 %v5266_v25 }
  0xa4   : > { %v5319_v50 = vpop.permute.xlu1 %4648  ;;  %v551_v51 = vsel %vm543_vm3, %v4635_v48, %v4625_v41 }
  0xa5   : > { %v4650_v52 = vunpack.i.l.bf16 %v5319_v50  ;;  %v5327_v53 = vpop.permute.xlu0 %4643  ;;  %v3875_v54 = vpack.c.bf16 %v576_v49, %v551_v51  ;;  %v524_v49 = vsel %vm518_vm1, %v4611_v28, %v4621_v36 }
  0xa6   : > { %v4646_v55 = vunpack.i.h.bf16 %v5327_v53  ;;  %v4645_v56 = vunpack.i.l.bf16 %v5327_v53 }
  0xa7   : > { %3876 = vmatpush1.bf16.msra.mxu1 %v3875_v54 }
  0xa8   : > { %v5331_v57 = vpop.permute.xlu1 %4658  ;;  %v599_v58 = vsel %vm593_vm4, %v4645_v56, %v4646_v55  ;;  %v600_v59 = vsel %vm593_vm4, %v4650_v52, %v4645_v56  ;;  %v5406_v56 = vld [vmem:[%s7907_s1] sm:$0xff]  ;;  %s7909_s1 = smov 98  }
  0xa9   : > { %v4661_v60 = vunpack.i.h.bf16 %v5331_v57  ;;  %v4660_v61 = vunpack.i.l.bf16 %v5331_v57  ;;  %v5345_v62 = vpop.permute.xlu0 %4653  ;;  %v3877_v63 = vpack.c.bf16 %v599_v58, %v5172_v4  ;;  %v3879_v3 = vpack.c.bf16 %v600_v59, %v5167_v2 }
  0xaa   : > { %v4656_v5 = vunpack.i.h.bf16 %v5345_v62  ;;  %v4655_v7 = vunpack.i.l.bf16 %v5345_v62  ;;  %v499_v58 = vsel %vm493_vm0, %v4606_v23, %v4616_v39  ;;  %v4641_v59 = vunpack.i.h.bf16 %v5305_v43 }
  0xab   : > { %3878 = vmatprep.subr.bf16.mxu1 %v3877_v63  ;;  %v649_v8 = vsel %vm643_vm5, %v4660_v61, %v4661_v60  ;;  %v3887_v63 = vpack.c.bf16 %v524_v49, %v499_v58 }
  0xac   : > { %3880 = vmatpush1.bf16.msra.mxu1 %v3879_v3  ;;  %v5355_v10 = vpop.permute.xlu1 %4668  ;;  %v624_v4 = vsel %vm618_vm6, %v4655_v7, %v4656_v5 }
  0xad   : > { %v4670_v2 = vunpack.i.l.bf16 %v5355_v10  ;;  %v5362_v14 = vpop.permute.xlu0 %4663  ;;  %v3881_v15 = vpack.c.bf16 %v649_v8, %v624_v4  ;;  %v574_v4 = vsel %vm568_vm2, %v4631_v35, %v4641_v59 }
  0xae   : > { %v4665_v16 = vunpack.i.l.bf16 %v5362_v14 }
  0xaf   : > { %3882 = vmatprep.subr.bf16.mxu1 %v3881_v15  ;;  %v650_v17 = vsel %vm643_vm5, %v4670_v2, %v4660_v61  ;;  %v4636_v61 = vunpack.i.h.bf16 %v5312_v46 }
  0xb0   : > { %v5369_v24 = vpop.permute.xlu1 %4678  ;;  %v625_v29 = vsel %vm618_vm6, %v4665_v16, %v4655_v7  ;;  %v4651_v7 = vunpack.i.h.bf16 %v5319_v50 }
  0xb1   : > { %v5375_v31 = vpop.permute.xlu0 %4673  ;;  %v3883_v32 = vpack.c.bf16 %v650_v17, %v625_v29  ;;  %v4680_v33 = vunpack.i.l.bf16 %v5369_v24  ;;  %v549_v15 = vsel %vm543_vm3, %v4626_v40, %v4636_v61  ;;  %v4671_v40 = vunpack.i.h.bf16 %v5355_v10 }
  0xb2   : > { %v4675_v34 = vunpack.i.l.bf16 %v5375_v31 }
  0xb3   : > { %3884 = vmatpush1.bf16.msra.mxu1 %v3883_v32  ;;  %v523_v47 = vsel %vm518_vm1, %v4621_v36, %v4680_v33  ;;  %v4666_v36 = vunpack.i.h.bf16 %v5362_v14 }
  0xb4   : > { %v5381_v38 = vpop.permute.xlu1 %656  ;;  %v498_v44 = vsel %vm493_vm0, %v4616_v39, %v4675_v34  ;;  %v3891_v39 = vpack.c.bf16 %v574_v4, %v549_v15 }
  0xb5   : > { %v655_v41 = vpop.permute.xlu0 %654  ;;  %v3885_v28 = vpack.c.bf16 %v523_v47, %v498_v44  ;;  %v4681_v44 = vunpack.i.h.bf16 %v5369_v24  ;;  %v4676_v47 = vunpack.i.h.bf16 %v5375_v31 }
  0xb6   : > { %v674_v42 = vsel %vm668_vm7, %v655_v41, %v5381_v38 }
  0xb7   : > { %702 = vmatprep.subr.mxu1 %v674_v42  ;;  %v519_v57 = vsel %vm518_vm1, %v4681_v44, %v4620_v26 }
  0xb8   : > { %v5399_v51 = vpop.permute.xlu1 %4683 }
  0xb9   : > { %v5401_v54 = vpop.permute.xlu0 %652  ;;  %v4685_v3 = vunpack.i.l.bf16 %v5399_v51 }
  0xba   : > { %v675_v27 = vsel %vm668_vm7, %v5401_v54, %v655_v41  ;;  %v598_v41 = vsel %vm593_vm4, %v4646_v55, %v4651_v7  ;;  %v648_v55 = vsel %vm643_vm5, %v4661_v60, %v4671_v40 }
  0xbb   : > { %703 = vmatpush1.msra.mxu1 %v675_v27  ;;  %v548_v32 = vsel %vm543_vm3, %v4636_v61, %v4685_v3 }
  0xbc   : > { %3351 = vmatmul.mubr.msk.f32.vlgmr.msra.gmra.mrb[0].mxu1 %vm682_vm8, %v5406_v56  ;;  %3886 = vmatprep.subr.bf16.mxu1 %v3885_v28  ;;  %v5420_v21 = vpop.permute.xlu1 %585  ;;  %v623_v28 = vsel %vm618_vm6, %v4656_v5, %v4666_v36  ;;  %v4686_v5 = vunpack.i.h.bf16 %v5399_v51 }
  0xbd   : > { %v5422_v23 = vpop.permute.xlu0 %4688  ;;  %3888 = vmatpush1.bf16.msra.mxu1 %v3887_v63  ;;  %821 = vmatprep.mubr.f32.mxu1 %v5020_v11  ;;  %v597_v17 = vsel %vm593_vm4, %v4651_v7, %v5420_v21 }
  0xbe   : > { %v4690_v8 = vunpack.i.l.bf16 %v5422_v23  ;;  %v3893_v42 = vpack.c.bf16 %v597_v17, %v5183_v6  ;;  %v3895_v6 = vpack.c.bf16 %v598_v41, %v5161_v0  ;;  %v494_v0 = vsel %vm493_vm0, %v4676_v47, %v4615_v22 }
  0xbf   : > { %v3899_v17 = vpack.c.bf16 %v648_v55, %v623_v28  ;;  %v3917_v25 = vpack.c.bf16 %v519_v57, %v494_v0 }
  0xc0   : > { %v5438_v29 = vpop.permute.xlu1 %635  ;;  %v573_v30 = vsel %vm568_vm2, %v4641_v59, %v4690_v8  ;;  %v4691_v59 = vunpack.i.h.bf16 %v5422_v23 }
  0xc1   : > { %v5448_v35 = vpop.permute.xlu0 %610  ;;  %v3889_v37 = vpack.c.bf16 %v573_v30, %v548_v32  ;;  %v647_v49 = vsel %vm643_vm5, %v4671_v40, %v5438_v29 }
  0xc2   : > { %v622_v58 = vsel %vm618_vm6, %v4666_v36, %v5448_v35  ;;  %v569_v26 = vsel %vm568_vm2, %v4691_v59, %v4640_v45 }
  0xc3   : > { %3890 = vmatprep.subr.bf16.mxu1 %v3889_v37  ;;  %v3897_v61 = vpack.c.bf16 %v647_v49, %v622_v58  ;;  %v544_v49 = vsel %vm543_vm3, %v4686_v5, %v4635_v48 }
  0xc4   : > { %3892 = vmatpush1.bf16.msra.mxu1 %v3891_v39  ;;  %v5465_v53 = vpop.permute.xlu1 %660 }
  0xc5   : > { %v659_v27 = vpop.permute.xlu0 %658  ;;  %3894 = vmatprep.subr.bf16.mxu1 %v3893_v42 }
  0xc6   : > { %v672_v37 = vsel %vm668_vm7, %v659_v27, %v5465_v53  ;;  %v673_v31 = vsel %vm668_vm7, %v5381_v38, %v659_v27 }
  0xc8   : > { %3896 = vmatpush1.bf16.msra.mxu1 %v3895_v6  ;;  %v4699_v63 = vpop.permute.xlu1 %4698 }
  0xc9   : > { %v4701_v60 = vunpack.i.h.bf16 %v4699_v63  ;;  %v4700_v62 = vunpack.i.l.bf16 %v4699_v63  ;;  %v4694_v7 = vpop.permute.xlu0 %4693  ;;  %3898 = vmatprep.subr.bf16.mxu1 %v3897_v61 }
  0xca   : > { %v4696_v4 = vunpack.i.h.bf16 %v4694_v7  ;;  %v4695_v15 = vunpack.i.l.bf16 %v4694_v7 }
  0xcb   : > { %v521_v19 = vsel %vm518_vm1, %v4701_v60, %v4700_v62  ;;  %v522_v22 = vsel %vm518_vm1, %v4680_v33, %v4701_v60  ;;  %v520_v32 = vsel %vm518_vm1, %v4700_v62, %v4681_v44 }
  0xcc   : > { %3900 = vmatpush1.bf16.msra.mxu1 %v3899_v17  ;;  %v4709_v30 = vpop.permute.xlu1 %4708  ;;  %v496_v24 = vsel %vm493_vm0, %v4696_v4, %v4695_v15  ;;  %v497_v43 = vsel %vm493_vm0, %v4675_v34, %v4696_v4  ;;  %v495_v45 = vsel %vm493_vm0, %v4695_v15, %v4676_v47  ;;  %v3921_v47 = vpack.c.bf16 %v569_v26, %v544_v49 }
  0xcd   : > { %v4711_v33 = vunpack.i.h.bf16 %v4709_v30  ;;  %v4710_v40 = vunpack.i.l.bf16 %v4709_v30  ;;  %v4704_v36 = vpop.permute.xlu0 %4703  ;;  %773 = vmatprep.subr.mxu1 %v672_v37  ;;  %v3901_v39 = vpack.c.bf16 %v521_v19, %v496_v24  ;;  %v3903_v44 = vpack.c.bf16 %v522_v22, %v497_v43 }
  0xce   : > { %v4706_v41 = vunpack.i.h.bf16 %v4704_v36  ;;  %v4705_v42 = vunpack.i.l.bf16 %v4704_v36  ;;  %v3919_v6 = vpack.c.bf16 %v520_v32, %v495_v45  ;;  %v978_v36 = vld [vmem:[%s7908_s3] sm:$0xff] }
  0xcf   : > { %3902 = vmatprep.subr.bf16.mxu0 %v3901_v39  ;;  %v571_v34 = vsel %vm568_vm2, %v4711_v33, %v4710_v40  ;;  %v572_v58 = vsel %vm568_vm2, %v4690_v8, %v4711_v33  ;;  %v570_v27 = vsel %vm568_vm2, %v4710_v40, %v4691_v59 }
  0xd0   : > { %774 = vmatpush1.msra.mxu1 %v673_v31  ;;  %3904 = vmatpush1.bf16.msra.mxu0 %v3903_v44  ;;  %v4719_v46 = vpop.permute.xlu1 %4718  ;;  %v546_v48 = vsel %vm543_vm3, %v4706_v41, %v4705_v42  ;;  %v547_v38 = vsel %vm543_vm3, %v4685_v3, %v4706_v41  ;;  %v545_v23 = vsel %vm543_vm3, %v4705_v42, %v4686_v5 }
  0xd1   : > { %v4714_v55 = vpop.permute.xlu0 %4713  ;;  %3352 = vmatmul.mubr.msk.f32.vlgmr.msra.gmra.mrb[2].mxu1 %vm682_vm8, %v5406_v56  ;;  %3918 = vmatprep.subr.bf16.mxu1 %v3917_v25  ;;  %v3905_v8 = vpack.c.bf16 %v571_v34, %v546_v48  ;;  %v3907_v63 = vpack.c.bf16 %v572_v58, %v547_v38  ;;  %v3923_v51 = vpack.c.bf16 %v570_v27, %v545_v23  ;;  %v4720_v3 = vunpack.i.l.bf16 %v4719_v46 }
  0xd2   : > { %v4716_v28 = vunpack.i.h.bf16 %v4714_v55  ;;  %v4715_v61 = vunpack.i.l.bf16 %v4714_v55  ;;  %3920 = vmatpush1.bf16.msra.mxu1 %v3919_v6  ;;  %963 = vmatprep.mubr.f32.mxu1 %v5020_v11 }
  0xd3   : > { %3906 = vmatprep.subr.bf16.mxu0 %v3905_v8  ;;  %3922 = vmatprep.subr.bf16.mxu1 %v3921_v47 }
  0xd4   : > { %3908 = vmatpush1.bf16.msra.mxu0 %v3907_v63  ;;  %v588_v59 = vpop.permute.xlu1 %587  ;;  %v601_v0 = vsel %vm593_vm4, %v4715_v61, %v4650_v52  ;;  %v594_v57 = vsel %vm593_vm4, %v4716_v28, %v4715_v61  ;;  %v4721_v52 = vunpack.i.h.bf16 %v4719_v46 }
  0xd5   : > { %v595_v60 = vsel %vm593_vm4, %v588_v59, %v4716_v28  ;;  %v596_v62 = vsel %vm593_vm4, %v5420_v21, %v588_v59  ;;  %v4724_v7 = vpop.permute.xlu0 %4723  ;;  %v3925_v5 = vpack.c.bf16 %v601_v0, %v5164_v1  ;;  %v3927_v19 = vpack.c.bf16 %v594_v57, %v5196_v9 }
  0xd6   : > { %v3909_v4 = vpack.c.bf16 %v595_v60, %v5224_v13  ;;  %v3911_v50 = vpack.c.bf16 %v596_v62, %v5214_v12  ;;  %v4726_v15 = vunpack.i.h.bf16 %v4724_v7  ;;  %v4725_v17 = vunpack.i.l.bf16 %v4724_v7  ;;  %3924 = vmatpush1.bf16.msra.mxu1 %v3923_v51 }
  0xd7   : > { %3926 = vmatprep.subr.bf16.mxu1 %v3925_v5  ;;  %v626_v21 = vsel %vm618_vm6, %v4720_v3, %v4665_v16  ;;  %v619_v9 = vsel %vm618_vm6, %v4721_v52, %v4720_v3 }
  0xd8   : > { %v665_v22 = vpop.permute.xlu1 %664  ;;  %3910 = vmatprep.subr.bf16.mxu0 %v3909_v4  ;;  %v651_v1 = vsel %vm643_vm5, %v4725_v17, %v4670_v2  ;;  %v644_v12 = vsel %vm643_vm5, %v4726_v15, %v4725_v17 }
  0xd9   : > { %v667_v13 = vpop.permute.xlu0 %666  ;;  %3912 = vmatpush1.bf16.msra.mxu0 %v3911_v50  ;;  %v3929_v25 = vpack.c.bf16 %v651_v1, %v626_v21  ;;  %v3931_v14 = vpack.c.bf16 %v644_v12, %v619_v9 }
  0xda   : > { %3928 = vmatpush1.bf16.msra.mxu1 %v3927_v19  ;;  %v676_v37 = vsel %vm668_vm7, %v667_v13, %v5401_v54  ;;  %v669_v45 = vsel %vm668_vm7, %v665_v22, %v667_v13 }
  0xdb   : > { %3930 = vmatprep.subr.bf16.mxu1 %v3929_v25 }
  0xdc   : > { %v638_v26 = vpop.permute.xlu1 %637 }
  0xdd   : > { %v645_v16 = vsel %vm643_vm5, %v638_v26, %v4726_v15  ;;  %v646_v10 = vsel %vm643_vm5, %v5438_v29, %v638_v26  ;;  %v613_v2 = vpop.permute.xlu0 %612 }
  0xde   : > { %v620_v32 = vsel %vm618_vm6, %v613_v2, %v4721_v52  ;;  %v621_v30 = vsel %vm618_vm6, %v5448_v35, %v613_v2  ;;  %3932 = vmatpush1.bf16.msra.mxu1 %v3931_v14  ;;  %v5589_v35 = vshrl.u32 %v491_v18, 7 }
  0xdf   : > { %v3913_v24 = vpack.c.bf16 %v645_v16, %v620_v32  ;;  %v3915_v43 = vpack.c.bf16 %v646_v10, %v621_v30  ;;  %915 = vmatprep.subr.mxu1 %v676_v37 }
  0xe0   : > { %v1006_v40 = vsub.s32 6, %v5589_v35  ;;  %v1002_v41 = vsub.s32 5, %v5589_v35  ;;  %v990_v23 = vsub.s32 2, %v5589_v35  ;;  %v994_v3 = vsub.s32 3, %v5589_v35 }
  0xe1   : > { %v663_v29 = vpop.permute.xlu0 %662  ;;  %3914 = vmatprep.subr.bf16.mxu0 %v3913_v24  ;;  %v998_v15 = vsub.s32 4, %v5589_v35  ;;  %v1010_v25 = vsub.s32 7, %v5589_v35 }
  0xe2   : > { %3916 = vmatpush1.bf16.msra.mxu0 %v3915_v43  ;;  %916 = vmatpush1.msra.mxu1 %v669_v45  ;;  %v670_v33 = vsel %vm668_vm7, %v663_v29, %v665_v22  ;;  %v671_v54 = vsel %vm668_vm7, %v5465_v53, %v663_v29  ;;  %v1007_v39 = vrot.slane %v978_v36, %v1006_v40  ;;  %v982_v53 = vsub.s32 0, %v5589_v35  ;;  %v1029_v43 = vld [vmem:[%s7866_s5] sm:$0xff] }
  0xe3   : > { %844 = vmatprep.subr.mxu0 %v670_v33  ;;  %3354 = vmatmul.mubr.msk.f32.vlgmr.msra.gmra.mrb[4].mxu1 %vm682_vm8, %v5406_v56  ;;  %v1003_v42 = vrot.slane %v978_v36, %v1002_v41  ;;  %v991_v28 = vrot.slane %v978_v36, %v990_v23  ;;  %v995_v57 = vrot.slane %v978_v36, %v994_v3 }
  0xe4   : > { %1365 = vmatprep.mubr.f32.mxu1 %v5020_v11  ;;  %v983_v18 = vrot.slane %v978_v36, %v982_v53  ;;  %v999_v21 = vrot.slane %v978_v36, %v998_v15  ;;  %v1011_v2 = vrot.slane %v978_v36, %v1010_v25 }
  0xe6   : > { %845 = vmatpush1.msra.mxu0 %v671_v54 }
  0xe7   : > { %3353 = vmatmul.mubr.msk.f32.vlgmr.msra.gmra.mrb[0].mxu0 %vm682_vm8, %v5406_v56  ;;  %v986_v56 = vsub.s32 1, %v5589_v35  ;;  %v2270_v35 = vld [vmem:[%s7872_s11] sm:$0xff] }
  0xe8   : > { %1294 = vmatprep.mubr.f32.mxu0 %v5020_v11 }
  0xe9   : > { %v987_v58 = vrot.slane %v978_v36, %v986_v56 }
  0xed   : > { %v680_v44 = vpop.permute.xlu1 %679 }
 0x18f   : > { %v752_v49 = vpop.f32.mrb[0].mxu1 }
 0x190   : > { %v753_v31 = vadd.f32 %v752_v49, %v680_v44  ;;  %v754_v34 = vpop.f32.mrb[1].mxu1 }
 0x191   : > { %v755_v47 = vadd.f32 %v754_v34, %v680_v44 }
 0x192   : > { %v970_v6 = vmax.f32 %v753_v31, 0.0 }
 0x193   : > { %v971_v46 = vmax.f32 %v755_v47, 0.0 }
 0x194   : > { %v5602_v48 = vmul.f32 %v983_v18, %v970_v6 }
 0x195   : > { %v5604_v38 = vmul.f32 %v987_v58, %v971_v46 }
 0x196   : > { %1126 = vrot.lane.b32.xlu0 %v5602_v48, %s7901_s20 }
 0x197   : > { %v4728_v27 = vpack.i.bf16 %v5604_v38, %v5602_v48 }
 0x19a   : > { %4729 = vrot.lane.b32.xlu0 %v4728_v27, %s7900_s25 }
 0x19e   : > { %4734 = vrot.lane.b32.xlu0 %v4728_v27, %s7904_s26 }
 0x1a2   : > { %4739 = vrot.lane.b32.xlu0 %v4728_v27, %s7905_s18 }
 0x1a4   : > { %v823_v55 = vpop.f32.mrb[2].mxu1 }
 0x1a5   : > { %v824_v8 = vadd.f32 %v823_v55, %v680_v44  ;;  %v825_v61 = vpop.f32.mrb[3].mxu1 }
 0x1a6   : > { %4744 = vrot.lane.b32.xlu0 %v4728_v27, %s7902_s21  ;;  %v826_v51 = vadd.f32 %v825_v61, %v680_v44 }
 0x1a7   : > { %v972_v63 = vmax.f32 %v824_v8, 0.0 }
 0x1a8   : > { %v973_v0 = vmax.f32 %v826_v51, 0.0 }
 0x1a9   : > { %v5616_v59 = vmul.f32 %v991_v28, %v972_v63 }
 0x1aa   : > { %v5622_v62 = vmul.f32 %v995_v57, %v973_v0 }
 0x1ab   : > { %v4753_v60 = vpack.i.bf16 %v5616_v59, %v5604_v38 }
 0x1ac   : > { %v4763_v7 = vpack.i.bf16 %v5622_v62, %v5616_v59 }
 0x1ad   : > { %4754 = vrot.lane.b32.xlu1 %v4753_v60, %s7903_s0  ;;  %4749 = vrot.lane.b32.xlu0 %v4753_v60, %s7901_s20 }
 0x1b1   : > { %4759 = vrot.lane.b32.xlu1 %v4753_v60, %s7889_s28 }
 0x1b5   : > { %4764 = vrot.lane.b32.xlu1 %v4763_v7, %s7900_s25 }
 0x1b6   : > { %v965_v5 = vpop.f32.mrb[4].mxu1 }
 0x1b7   : > { %v966_v4 = vadd.f32 %v965_v5, %v680_v44  ;;  %v967_v50 = vpop.f32.mrb[5].mxu1 }
 0x1b8   : > { %v968_v13 = vadd.f32 %v967_v50, %v680_v44 }
 0x1b9   : > { %v976_v17 = vmax.f32 %v966_v4, 0.0  ;;  %4769 = vrot.lane.b32.xlu1 %v4763_v7, %s7904_s26 }
 0x1ba   : > { %v894_v52 = vpop.f32.mrb[0].mxu0  ;;  %v977_v10 = vmax.f32 %v968_v13, 0.0 }
 0x1bb   : > { %v5630_v19 = vmul.f32 %v1007_v39, %v976_v17  ;;  %v895_v22 = vadd.f32 %v894_v52, %v680_v44  ;;  %v896_v1 = vpop.f32.mrb[1].mxu0 }
 0x1bc   : > { %v897_v12 = vadd.f32 %v896_v1, %v680_v44  ;;  %v5642_v30 = vmul.f32 %v1011_v2, %v977_v10 }
 0x1bd   : > { %v974_v9 = vmax.f32 %v895_v22, 0.0  ;;  %4774 = vrot.lane.b32.xlu1 %v4763_v7, %s7905_s18 }
 0x1be   : > { %v975_v14 = vmax.f32 %v897_v12, 0.0 }
 0x1bf   : > { %v5634_v26 = vmul.f32 %v999_v21, %v974_v9 }
 0x1c0   : > { %v5636_v16 = vmul.f32 %v1003_v42, %v975_v14 }
 0x1c1   : > { %4779 = vrot.lane.b32.xlu1 %v4763_v7, %s7902_s21  ;;  %v4788_v32 = vpack.i.bf16 %v5634_v26, %v5622_v62 }
 0x1c2   : > { %v4798_v37 = vpack.i.bf16 %v5636_v16, %v5634_v26  ;;  %v4818_v24 = vpack.i.bf16 %v5630_v19, %v5636_v16 }
 0x1c3   : > { %4789 = vrot.lane.b32.xlu0 %v4788_v32, %s7903_s0 }
 0x1c5   : > { %4784 = vrot.lane.b32.xlu1 %v4788_v32, %s7901_s20 }
 0x1c7   : > { %1044 = vrot.lane.b32.xlu0 %v5642_v30, %s7900_s25 }
 0x1c9   : > { %1068 = vrot.lane.b32.xlu1 %v5642_v30, %s7904_s26 }
 0x1cb   : > { %1092 = vrot.lane.b32.xlu0 %v5642_v30, %s7905_s18 }
 0x1cd   : > { %1116 = vrot.lane.b32.xlu1 %v5642_v30, %s7902_s21 }
 0x1cf   : > { %4794 = vrot.lane.b32.xlu0 %v4788_v32, %s7889_s28 }
 0x1d1   : > { %1150 = vrot.lane.b32.xlu1 %v5602_v48, %s7903_s0 }
 0x1d3   : > { %1174 = vrot.lane.b32.xlu0 %v5602_v48, %s7889_s28 }
 0x1d5   : > { %1200 = vrot.lane.b32.xlu1 %v5604_v38, %s5021_s27 }
 0x1d7   : > { %1202 = vrot.lane.b32.xlu0 %v5616_v59, %s5021_s27 }
 0x1d9   : > { %1204 = vrot.lane.b32.xlu1 %v5622_v62, %s5021_s27 }
 0x1db   : > { %1206 = vrot.lane.b32.xlu0 %v5634_v26, %s5021_s27 }
 0x1dd   : > { %1198 = vrot.lane.b32.xlu1 %v5602_v48, %s5021_s27 }
 0x1df   : > { %4799 = vrot.lane.b32.xlu0 %v4798_v37, %s7900_s25 }
 0x1e1   : > { %4804 = vrot.lane.b32.xlu1 %v4798_v37, %s7904_s26 }
 0x1e3   : > { %4809 = vrot.lane.b32.xlu0 %v4798_v37, %s7905_s18 }
 0x1e5   : > { %4814 = vrot.lane.b32.xlu1 %v4798_v37, %s7902_s21 }
 0x1e7   : > { %4819 = vrot.lane.b32.xlu0 %v4818_v24, %s7901_s20 }
 0x1e9   : > { %4824 = vrot.lane.b32.xlu1 %v4818_v24, %s7903_s0 }
 0x1eb   : > { %4829 = vrot.lane.b32.xlu0 %v4818_v24, %s7889_s28 }
 0x1ed   : > { %1208 = vrot.lane.b32.xlu1 %v5636_v16, %s5021_s27 }
 0x1ef   : > { %1210 = vrot.lane.b32.xlu0 %v5630_v19, %s5021_s27 }
 0x1f1   : > { %1042 = vrot.lane.b32.xlu1 %v5630_v19, %s7900_s25  ;;  %s5028_s25 = smov 112  }
 0x1f3   : > { %1066 = vrot.lane.b32.xlu0 %v5630_v19, %s7904_s26 }
 0x1f5   : > { %1090 = vrot.lane.b32.xlu1 %v5630_v19, %s7905_s18  ;;  %s5025_s18 = smov 15  }
 0x1f7   : > { %1114 = vrot.lane.b32.xlu0 %v5630_v19, %s7902_s21 }
 0x1f9   : > { %1140 = vrot.lane.b32.xlu1 %v5642_v30, %s7901_s20 }
 0x1fb   : > { %1164 = vrot.lane.b32.xlu0 %v5642_v30, %s7903_s0 }
 0x1fd   : > { %1188 = vrot.lane.b32.xlu1 %v5642_v30, %s7889_s28 }
 0x1ff   : > { %1212 = vrot.lane.b32.xlu0 %v5642_v30, %s5021_s27  ;;  %s5023_s27 = smov 16  }
 0x201   : > { %1224 = vperm.xlu1 %4727, %v1029_v43  }
 0x208   : > { %v5702_v45 = vpop.permute.xlu0 %1126 }
 0x20c   : > { %v4730_v29 = vpop.permute.xlu0 %4729 }
 0x20d   : > { %v4732_v33 = vunpack.i.h.bf16 %v4730_v29  ;;  %v4731_v54 = vunpack.i.l.bf16 %v4730_v29 }
 0x20f   : > { %v1052_v41 = vsel %vm493_vm0, %v4731_v54, %v4732_v33 }
 0x210   : > { %v4735_v40 = vpop.permute.xlu0 %4734 }
 0x211   : > { %v4737_v36 = vunpack.i.h.bf16 %v4735_v40  ;;  %v4736_v39 = vunpack.i.l.bf16 %v4735_v40 }
 0x213   : > { %v1076_v42 = vsel %vm518_vm1, %v4736_v39, %v4737_v36 }
 0x214   : > { %v3933_v44 = vpack.c.bf16 %v1076_v42, %v1052_v41  ;;  %v5712_v18 = vpop.permute.xlu0 %4739 }
 0x215   : > { %v4742_v5 = vunpack.i.h.bf16 %v5712_v18  ;;  %v4741_v32 = vunpack.i.l.bf16 %v5712_v18 }
 0x216   : > { %3934 = vmatprep.subr.bf16.mxu0 %v3933_v44 }
 0x218   : > { %v4745_v23 = vpop.permute.xlu0 %4744 }
 0x219   : > { %v4747_v4 = vunpack.i.h.bf16 %v4745_v23  ;;  %v4746_v12 = vunpack.i.l.bf16 %v4745_v23 }
 0x21b   : > { %v1124_v41 = vsel %vm568_vm2, %v4746_v12, %v4747_v4 }
 0x21f   : > { %v5708_v49 = vpop.permute.xlu1 %4754  ;;  %v4750_v0 = vpop.permute.xlu0 %4749 }
 0x220   : > { %v4752_v14 = vunpack.i.h.bf16 %v4750_v0  ;;  %v4751_v29 = vunpack.i.l.bf16 %v4750_v0 }
 0x223   : > { %v5710_v31 = vpop.permute.xlu1 %4759 }
 0x224   : > { %v4761_v23 = vunpack.i.l.bf16 %v5710_v31 }
 0x227   : > { %v5714_v34 = vpop.permute.xlu1 %4764 }
 0x228   : > { %v4767_v47 = vunpack.i.h.bf16 %v5714_v34  ;;  %v4766_v58 = vunpack.i.l.bf16 %v5714_v34 }
 0x22a   : > { %v1051_v55 = vsel %vm493_vm0, %v4732_v33, %v4766_v58  ;;  %v1050_v28 = vsel %vm493_vm0, %v4766_v58, %v4767_v47 }
 0x22b   : > { %v5718_v6 = vpop.permute.xlu1 %4769 }
 0x22c   : > { %v4772_v46 = vunpack.i.h.bf16 %v5718_v6  ;;  %v4771_v27 = vunpack.i.l.bf16 %v5718_v6 }
 0x22e   : > { %v1075_v8 = vsel %vm518_vm1, %v4737_v36, %v4771_v27  ;;  %v1074_v61 = vsel %vm518_vm1, %v4771_v27, %v4772_v46  ;;  %v4762_v27 = vunpack.i.h.bf16 %v5710_v31  ;;  %v4757_v31 = vunpack.i.h.bf16 %v5708_v49 }
 0x22f   : > { %v3951_v63 = vpack.c.bf16 %v1075_v8, %v1051_v55  ;;  %v5734_v51 = vpop.permute.xlu1 %4774  ;;  %v3949_v3 = vpack.c.bf16 %v1074_v61, %v1050_v28 }
 0x230   : > { %v4777_v57 = vunpack.i.h.bf16 %v5734_v51  ;;  %v4776_v60 = vunpack.i.l.bf16 %v5734_v51 }
 0x231   : > { %3950 = vmatprep.subr.bf16.mxu1 %v3949_v3 }
 0x232   : > { %3952 = vmatpush1.bf16.msra.mxu1 %v3951_v63  ;;  %v1099_v52 = vsel %vm543_vm3, %v4742_v5, %v4776_v60  ;;  %v1098_v21 = vsel %vm543_vm3, %v4776_v60, %v4777_v57  ;;  %v4756_v63 = vunpack.i.l.bf16 %v5708_v49  ;;  %v1148_v60 = vsel %vm593_vm4, %v5702_v45, %v4751_v29 }
 0x233   : > { %v5738_v7 = vpop.permute.xlu1 %4779 }
 0x234   : > { %v4782_v50 = vunpack.i.h.bf16 %v5738_v7  ;;  %v4781_v15 = vunpack.i.l.bf16 %v5738_v7 }
 0x235   : > { %v5743_v17 = vpop.permute.xlu0 %4789 }
 0x236   : > { %v1123_v22 = vsel %vm568_vm2, %v4747_v4, %v4781_v15  ;;  %v1122_v1 = vsel %vm568_vm2, %v4781_v15, %v4782_v50  ;;  %v4791_v8 = vunpack.i.l.bf16 %v5743_v17 }
 0x237   : > { %v3955_v13 = vpack.c.bf16 %v1123_v22, %v1099_v52  ;;  %v5757_v25 = vpop.permute.xlu1 %4784  ;;  %v3953_v9 = vpack.c.bf16 %v1122_v1, %v1098_v21  ;;  %v1195_v22 = vsel %vm643_vm5, %v4761_v23, %v4762_v27 }
 0x238   : > { %v4787_v10 = vunpack.i.h.bf16 %v5757_v25  ;;  %v4786_v2 = vunpack.i.l.bf16 %v5757_v25  ;;  %v1170_v49 = vsel %vm618_vm6, %v4757_v31, %v4791_v8 }
 0x239   : > { %v5762_v37 = vpop.permute.xlu0 %1044  ;;  %3954 = vmatprep.subr.bf16.mxu1 %v3953_v9 }
 0x23a   : > { %v1146_v24 = vsel %vm593_vm4, %v4752_v14, %v4786_v2  ;;  %3956 = vmatpush1.bf16.msra.mxu1 %v3955_v13  ;;  %v1145_v43 = vsel %vm593_vm4, %v4786_v2, %v4787_v10  ;;  %v1053_v42 = vsel %vm493_vm0, %v5762_v37, %v4731_v54  ;;  %v1147_v54 = vsel %vm593_vm4, %v4751_v29, %v4752_v14 }
 0x23b   : > { %v3959_v33 = vpack.c.bf16 %v1146_v24, %v5616_v59  ;;  %v5771_v40 = vpop.permute.xlu1 %1068  ;;  %v3957_v36 = vpack.c.bf16 %v1145_v43, %v5622_v62  ;;  %v1100_v59 = vsel %vm543_vm3, %v4741_v32, %v4742_v5  ;;  %v3941_v15 = vpack.c.bf16 %v1147_v54, %v5604_v38 }
 0x23c   : > { %v1077_v44 = vsel %vm518_vm1, %v5771_v40, %v4736_v39  ;;  %v3937_v62 = vpack.c.bf16 %v1124_v41, %v1100_v59  ;;  %v4792_v39 = vunpack.i.h.bf16 %v5743_v17  ;;  %v1171_v2 = vsel %vm618_vm6, %v4756_v63, %v4757_v31 }
 0x23d   : > { %v3935_v18 = vpack.c.bf16 %v1077_v44, %v1053_v42  ;;  %v5782_v58 = vpop.permute.xlu0 %1092  ;;  %3958 = vmatprep.subr.bf16.mxu1 %v3957_v36  ;;  %v3945_v24 = vpack.c.bf16 %v1195_v22, %v1171_v2 }
 0x23e   : > { %3960 = vmatpush1.bf16.msra.mxu1 %v3959_v33  ;;  %v1101_v28 = vsel %vm543_vm3, %v5782_v58, %v4741_v32  ;;  %v1169_v1 = vsel %vm618_vm6, %v4791_v8, %v4792_v39 }
 0x23f   : > { %v5788_v55 = vpop.permute.xlu1 %1116  ;;  %3936 = vmatpush1.bf16.msra.mxu0 %v3935_v18  ;;  %v5847_v18 = vld [vmem:[%s7865_s4] sm:$0xff] }
 0x240   : > { %v1125_v61 = vsel %vm568_vm2, %v5788_v55, %v4746_v12  ;;  %3938 = vmatprep.subr.bf16.mxu0 %v3937_v62  ;;  %v3943_v12 = vpack.c.bf16 %v1148_v60, %v5602_v48 }
 0x241   : > { %v3939_v3 = vpack.c.bf16 %v1125_v61, %v1101_v28  ;;  %v5802_v0 = vpop.permute.xlu0 %4794 }
 0x242   : > { %v4797_v5 = vunpack.i.h.bf16 %v5802_v0  ;;  %v4796_v4 = vunpack.i.l.bf16 %v5802_v0 }
 0x243   : > { %v5810_v52 = vpop.permute.xlu1 %1150  ;;  %3940 = vmatpush1.bf16.msra.mxu0 %v3939_v3 }
 0x244   : > { %v1194_v21 = vsel %vm643_vm5, %v4762_v27, %v4796_v4  ;;  %3942 = vmatprep.subr.bf16.mxu0 %v3941_v15  ;;  %v1193_v38 = vsel %vm643_vm5, %v4796_v4, %v4797_v5  ;;  %v1172_v29 = vsel %vm618_vm6, %v5810_v52, %v4756_v63 }
 0x245   : > { %v3963_v13 = vpack.c.bf16 %v1194_v21, %v1170_v49  ;;  %v5827_v9 = vpop.permute.xlu0 %1174  ;;  %v3961_v14 = vpack.c.bf16 %v1193_v38, %v1169_v1 }
 0x246   : > { %v1196_v32 = vsel %vm643_vm5, %v5827_v9, %v4761_v23 }
 0x247   : > { %v1201_v43 = vpop.permute.xlu1 %1200  ;;  %3944 = vmatpush1.bf16.msra.mxu0 %v3943_v12  ;;  %3962 = vmatprep.subr.bf16.mxu1 %v3961_v14  ;;  %v3947_v48 = vpack.c.bf16 %v1196_v32, %v1172_v29 }
 0x248   : > { %3946 = vmatprep.subr.bf16.mxu0 %v3945_v24  ;;  %3964 = vmatpush1.bf16.msra.mxu1 %v3963_v13 }
 0x249   : > { %v1203_v33 = vpop.permute.xlu0 %1202 }
 0x24a   : > { %v1219_v36 = vsel %vm668_vm7, %v1201_v43, %v1203_v33 }
 0x24b   : > { %v1205_v41 = vpop.permute.xlu1 %1204  ;;  %3948 = vmatpush1.bf16.msra.mxu0 %v3947_v48 }
 0x24c   : > { %1246 = vmatprep.subr.mxu0 %v1219_v36  ;;  %v1218_v59 = vsel %vm668_vm7, %v1203_v33, %v1205_v41 }
 0x24d   : > { %v5839_v42 = vpop.permute.xlu0 %1206 }
 0x24e   : > { %v1217_v44 = vsel %vm668_vm7, %v1205_v41, %v5839_v42 }
 0x24f   : > { %v5851_v62 = vpop.permute.xlu1 %1198  ;;  %1317 = vmatprep.subr.mxu1 %v1217_v44 }
 0x250   : > { %v1220_v27 = vsel %vm668_vm7, %v5851_v62, %v1201_v43  ;;  %1318 = vmatpush1.msra.mxu1 %v1218_v59 }
 0x251   : > { %v5856_v23 = vpop.permute.xlu0 %4799  ;;  %1247 = vmatpush1.msra.mxu0 %v1220_v27  ;;  %3356 = vmatmul.mubr.msk.f32.vlgmr.msra.gmra.mrb[6].mxu1 %vm682_vm8, %v5847_v18 }
 0x252   : > { %v4802_v54 = vunpack.i.h.bf16 %v5856_v23  ;;  %v4801_v8 = vunpack.i.l.bf16 %v5856_v23  ;;  %3355 = vmatmul.mubr.msk.f32.vlgmr.msra.gmra.mrb[2].mxu0 %vm682_vm8, %v5847_v18  ;;  %1507 = vmatprep.mubr.f32.mxu1 %v5020_v11 }
 0x253   : > { %v4805_v28 = vpop.permute.xlu1 %4804  ;;  %1436 = vmatprep.mubr.f32.mxu0 %v5020_v11 }
 0x254   : > { %v4807_v61 = vunpack.i.h.bf16 %v4805_v28  ;;  %v4806_v31 = vunpack.i.l.bf16 %v4805_v28  ;;  %v1049_v63 = vsel %vm493_vm0, %v4767_v47, %v4801_v8  ;;  %v1048_v60 = vsel %vm493_vm0, %v4801_v8, %v4802_v54 }
 0x255   : > { %v5870_v3 = vpop.permute.xlu0 %4809 }
 0x256   : > { %v1073_v4 = vsel %vm518_vm1, %v4772_v46, %v4806_v31  ;;  %v4812_v15 = vunpack.i.h.bf16 %v5870_v3  ;;  %v4811_v22 = vunpack.i.l.bf16 %v5870_v3  ;;  %v1072_v34 = vsel %vm518_vm1, %v4806_v31, %v4807_v61 }
 0x257   : > { %v3967_v49 = vpack.c.bf16 %v1073_v4, %v1049_v63  ;;  %v4815_v21 = vpop.permute.xlu1 %4814  ;;  %v3965_v47 = vpack.c.bf16 %v1072_v34, %v1048_v60 }
 0x258   : > { %v4817_v1 = vunpack.i.h.bf16 %v4815_v21  ;;  %v4816_v38 = vunpack.i.l.bf16 %v4815_v21  ;;  %v1097_v6 = vsel %vm543_vm3, %v4777_v57, %v4811_v22  ;;  %v1096_v46 = vsel %vm543_vm3, %v4811_v22, %v4812_v15 }
 0x259   : > { %v4820_v12 = vpop.permute.xlu0 %4819  ;;  %3966 = vmatprep.subr.bf16.mxu0 %v3965_v47 }
 0x25a   : > { %v1121_v13 = vsel %vm568_vm2, %v4782_v50, %v4816_v38  ;;  %v4822_v14 = vunpack.i.h.bf16 %v4820_v12  ;;  %v4821_v2 = vunpack.i.l.bf16 %v4820_v12  ;;  %3968 = vmatpush1.bf16.msra.mxu0 %v3967_v49  ;;  %v1120_v32 = vsel %vm568_vm2, %v4816_v38, %v4817_v1 }
 0x25b   : > { %v3971_v51 = vpack.c.bf16 %v1121_v13, %v1097_v6  ;;  %v5894_v24 = vpop.permute.xlu1 %4824  ;;  %v3969_v57 = vpack.c.bf16 %v1120_v32, %v1096_v46 }
 0x25c   : > { %v4827_v43 = vunpack.i.h.bf16 %v5894_v24  ;;  %v4826_v29 = vunpack.i.l.bf16 %v5894_v24  ;;  %v1143_v7 = vsel %vm593_vm4, %v4821_v2, %v4822_v14  ;;  %v1144_v50 = vsel %vm593_vm4, %v4787_v10, %v4821_v2 }
 0x25d   : > { %v4830_v48 = vpop.permute.xlu0 %4829  ;;  %3970 = vmatprep.subr.bf16.mxu0 %v3969_v57  ;;  %v3973_v33 = vpack.c.bf16 %v1143_v7, %v5636_v16  ;;  %v3975_v59 = vpack.c.bf16 %v1144_v50, %v5634_v26  ;;  %v1579_v50 = vld [vmem:[%s7867_s6 + $0x8] sm:$0xff] }
 0x25e   : > { %v4832_v36 = vunpack.i.h.bf16 %v4830_v48  ;;  %v4831_v41 = vunpack.i.l.bf16 %v4830_v48  ;;  %3972 = vmatpush1.bf16.msra.mxu0 %v3971_v51  ;;  %v1167_v27 = vsel %vm618_vm6, %v4826_v29, %v4827_v43  ;;  %v1168_v8 = vsel %vm618_vm6, %v4792_v39, %v4826_v29  ;;  %v1581_v48 = vld [vmem:[%s7867_s6 + $0x18] sm:$0xff] }
 0x25f   : > { %v1209_v44 = vpop.permute.xlu1 %1208  ;;  %3974 = vmatprep.subr.bf16.mxu0 %v3973_v33  ;;  %v1578_v33 = vld [vmem:[%s7867_s6] sm:$0xff] }
 0x260   : > { %v1191_v25 = vsel %vm643_vm5, %v4831_v41, %v4832_v36  ;;  %v1192_v10 = vsel %vm643_vm5, %v4797_v5, %v4831_v41  ;;  %v1216_v22 = vsel %vm668_vm7, %v5839_v42, %v1209_v44  ;;  %v1580_v41 = vld [vmem:[%s7867_s6 + $0x10] sm:$0xff] }
 0x261   : > { %v1211_v23 = vpop.permute.xlu0 %1210  ;;  %v3977_v16 = vpack.c.bf16 %v1191_v25, %v1167_v27  ;;  %v3979_v28 = vpack.c.bf16 %v1192_v10, %v1168_v8  ;;  %v3999_v27 = vpack.c.bf16 %v1580_v41, %v1578_v33  ;;  %v1582_v10 = vld [vmem:[%s7867_s6 + $0x20] sm:$0xff]  ;;  %v1589_v8 = vld [vmem:[%s7867_s6 + $0x58] sm:$0xff] }
 0x262   : > { %3976 = vmatpush1.bf16.msra.mxu0 %v3975_v59  ;;  %v1215_v63 = vsel %vm668_vm7, %v1209_v44, %v1211_v23  ;;  %v1583_v44 = vld [vmem:[%s7867_s6 + $0x28] sm:$0xff]  ;;  %v1585_v59 = vld [vmem:[%s7867_s6 + $0x38] sm:$0xff] }
 0x263   : > { %v1043_v26 = vpop.permute.xlu1 %1042  ;;  %3978 = vmatprep.subr.bf16.mxu0 %v3977_v16  ;;  %v4001_v25 = vpack.c.bf16 %v1585_v59, %v1583_v44  ;;  %v1587_v16 = vld [vmem:[%s7867_s6 + $0x48] sm:$0xff]  ;;  %v1617_v33 = vld [vmem:[%s7867_s6 + $0x138] sm:$0xff]  ;;  %v1614_v59 = vld [vmem:[%s7867_s6 + $0x120] sm:$0xff] }
 0x264   : > { %v1046_v0 = vsel %vm493_vm0, %v1043_v26, %v5762_v37  ;;  %v1047_v5 = vsel %vm493_vm0, %v4802_v54, %v1043_v26 }
 0x265   : > { %v1067_v31 = vpop.permute.xlu0 %1066 }
 0x266   : > { %v1070_v17 = vsel %vm518_vm1, %v1067_v31, %v5771_v40  ;;  %v1071_v39 = vsel %vm518_vm1, %v4807_v61, %v1067_v31  ;;  %3980 = vmatpush1.bf16.msra.mxu0 %v3979_v28  ;;  %v4005_v28 = vpack.c.bf16 %v1589_v8, %v1587_v16  ;;  %v1586_v31 = vld [vmem:[%s7867_s6 + $0x40] sm:$0xff] }
 0x267   : > { %v3981_v3 = vpack.c.bf16 %v1070_v17, %v1046_v0  ;;  %v3983_v60 = vpack.c.bf16 %v1071_v39, %v1047_v5  ;;  %v1091_v4 = vpop.permute.xlu1 %1090  ;;  %1388 = vmatprep.subr.mxu0 %v1215_v63  ;;  %v1588_v63 = vld [vmem:[%s7867_s6 + $0x50] sm:$0xff]  ;;  %v1591_v0 = vld [vmem:[%s7867_s6 + $0x68] sm:$0xff]  ;;  %v1593_v5 = vld [vmem:[%s7867_s6 + $0x78] sm:$0xff] }
 0x268   : > { %v1094_v37 = vsel %vm543_vm3, %v1091_v4, %v5782_v58  ;;  %v1095_v40 = vsel %vm543_vm3, %v4812_v15, %v1091_v4  ;;  %v4007_v17 = vpack.c.bf16 %v1588_v63, %v1586_v31  ;;  %v4009_v39 = vpack.c.bf16 %v1593_v5, %v1591_v0  ;;  %v1595_v4 = vld [vmem:[%s7867_s6 + $0x88] sm:$0xff]  ;;  %v1625_v63 = vld [vmem:[%s7867_s6 + $0x178] sm:$0xff] }
 0x269   : > { %v1115_v54 = vpop.permute.xlu0 %1114  ;;  %3982 = vmatprep.subr.bf16.mxu1 %v3981_v3  ;;  %v1590_v3 = vld [vmem:[%s7867_s6 + $0x60] sm:$0xff]  ;;  %v1623_v31 = vld [vmem:[%s7867_s6 + $0x168] sm:$0xff] }
 0x26a   : > { %v1118_v61 = vsel %vm568_vm2, %v1115_v54, %v5788_v55  ;;  %v1119_v34 = vsel %vm568_vm2, %v4817_v1, %v1115_v54  ;;  %1389 = vmatpush1.msra.mxu0 %v1216_v22  ;;  %3984 = vmatpush1.bf16.msra.mxu1 %v3983_v60  ;;  %v1592_v60 = vld [vmem:[%s7867_s6 + $0x70] sm:$0xff]  ;;  %v1597_v22 = vld [vmem:[%s7867_s6 + $0x98] sm:$0xff]  ;;  %v4041_v5 = vpack.c.bf16 %v1625_v63, %v1623_v31  ;;  %v1647_v63 = vld [vmem:[%s7867_s6 + $0x228] sm:$0xff] }
 0x26b   : > { %v3985_v49 = vpack.c.bf16 %v1118_v61, %v1094_v37  ;;  %v3987_v42 = vpack.c.bf16 %v1119_v34, %v1095_v40  ;;  %v1141_v21 = vpop.permute.xlu1 %1140  ;;  %3357 = vmatmul.mubr.msk.f32.vlgmr.msra.gmra.mrb[4].mxu0 %vm682_vm8, %v5847_v18  ;;  %v4011_v37 = vpack.c.bf16 %v1592_v60, %v1590_v3  ;;  %v4013_v54 = vpack.c.bf16 %v1597_v22, %v1595_v4  ;;  %v1594_v40 = vld [vmem:[%s7867_s6 + $0x80] sm:$0xff]  ;;  %v1596_v61 = vld [vmem:[%s7867_s6 + $0x90] sm:$0xff]  ;;  %v1599_v34 = vld [vmem:[%s7867_s6 + $0xa8] sm:$0xff] }
 0x26c   : > { %v1149_v58 = vsel %vm593_vm4, %v1141_v21, %v5702_v45  ;;  %v1142_v15 = vsel %vm593_vm4, %v4822_v14, %v1141_v21  ;;  %v1627_v3 = vld [vmem:[%s7867_s6 + $0x188] sm:$0xff]  ;;  %v1629_v60 = vld [vmem:[%s7867_s6 + $0x198] sm:$0xff] }
 0x26d   : > { %v3989_v55 = vpack.c.bf16 %v1149_v58, %v5642_v30  ;;  %v1165_v47 = vpop.permute.xlu0 %1164  ;;  %3986 = vmatprep.subr.bf16.mxu1 %v3985_v49  ;;  %v3991_v38 = vpack.c.bf16 %v1142_v15, %v5630_v19  ;;  %v1601_v49 = vld [vmem:[%s7867_s6 + $0xb8] sm:$0xff]  ;;  %v1598_v15 = vld [vmem:[%s7867_s6 + $0xa0] sm:$0xff]  ;;  %v4045_v22 = vpack.c.bf16 %v1629_v60, %v1627_v3 }
 0x26e   : > { %3988 = vmatpush1.bf16.msra.mxu1 %v3987_v42  ;;  %v1173_v6 = vsel %vm618_vm6, %v1165_v47, %v5810_v52  ;;  %v1166_v30 = vsel %vm618_vm6, %v4827_v43, %v1165_v47  ;;  %v4015_v42 = vpack.c.bf16 %v1596_v61, %v1594_v40  ;;  %v4017_v58 = vpack.c.bf16 %v1601_v49, %v1599_v34  ;;  %v1631_v40 = vld [vmem:[%s7867_s6 + $0x1a8] sm:$0xff]  ;;  %v1633_v61 = vld [vmem:[%s7867_s6 + $0x1b8] sm:$0xff] }
 0x26f   : > { %v1189_v1 = vpop.permute.xlu1 %1188  ;;  %3990 = vmatprep.subr.bf16.mxu1 %v3989_v55  ;;  %v1600_v55 = vld [vmem:[%s7867_s6 + $0xb0] sm:$0xff]  ;;  %v4049_v49 = vpack.c.bf16 %v1633_v61, %v1631_v40  ;;  %v1646_v40 = vld [vmem:[%s7867_s6 + $0x220] sm:$0xff] }
 0x270   : > { %v1197_v45 = vsel %vm643_vm5, %v1189_v1, %v5827_v9  ;;  %v1190_v12 = vsel %vm643_vm5, %v4832_v36, %v1189_v1  ;;  %v3997_v36 = vpack.c.bf16 %v1581_v48, %v1579_v50  ;;  %v1603_v1 = vld [vmem:[%s7867_s6 + $0xc8] sm:$0xff]  ;;  %v1612_v50 = vld [vmem:[%s7867_s6 + $0x110] sm:$0xff] }
 0x271   : > { %v3993_v46 = vpack.c.bf16 %v1197_v45, %v1173_v6  ;;  %v1213_v13 = vpop.permute.xlu0 %1212  ;;  %v3995_v14 = vpack.c.bf16 %v1190_v12, %v1166_v30  ;;  %v4019_v6 = vpack.c.bf16 %v1600_v55, %v1598_v15  ;;  %v1602_v12 = vld [vmem:[%s7867_s6 + $0xc0] sm:$0xff]  ;;  %v1607_v30 = vld [vmem:[%s7867_s6 + $0xe8] sm:$0xff]  ;;  %v1648_v61 = vld [vmem:[%s7867_s6 + $0x230] sm:$0xff] }
 0x272   : > { %3992 = vmatpush1.bf16.msra.mxu1 %v3991_v38  ;;  %v1221_v19 = vsel %vm668_vm7, %v1213_v13, %v5851_v62  ;;  %v1214_v52 = vsel %vm668_vm7, %v1211_v23, %v1213_v13  ;;  %v1584_v23 = vld [vmem:[%s7867_s6 + $0x30] sm:$0xff]  ;;  %3998 = vmatprep.subr.bf16.mxu0 %v3997_v36  ;;  %v1605_v38 = vld [vmem:[%s7867_s6 + $0xd8] sm:$0xff]  ;;  %v1615_v48 = vld [vmem:[%s7867_s6 + $0x128] sm:$0xff] }
 0x273   : > { %3994 = vmatprep.subr.bf16.mxu1 %v3993_v46  ;;  %4000 = vmatpush1.bf16.msra.mxu0 %v3999_v27  ;;  %v4003_v26 = vpack.c.bf16 %v1584_v23, %v1582_v10  ;;  %v4021_v45 = vpack.c.bf16 %v1605_v38, %v1603_v1  ;;  %v1604_v46 = vld [vmem:[%s7867_s6 + $0xd0] sm:$0xff]  ;;  %v1609_v13 = vld [vmem:[%s7867_s6 + $0xf8] sm:$0xff]  ;;  %v4033_v44 = vpack.c.bf16 %v1617_v33, %v1615_v48  ;;  %v1619_v10 = vld [vmem:[%s7867_s6 + $0x148] sm:$0xff] }
 0x274   : > { %4002 = vmatprep.subr.bf16.mxu0 %v4001_v25  ;;  %v1616_v27 = vld [vmem:[%s7867_s6 + $0x130] sm:$0xff]  ;;  %v1621_v23 = vld [vmem:[%s7867_s6 + $0x158] sm:$0xff]  ;;  %v1635_v55 = vld [vmem:[%s7867_s6 + $0x1c8] sm:$0xff] }
 0x275   : > { %v4035_v16 = vpack.c.bf16 %v1616_v27, %v1614_v59  ;;  %v4037_v8 = vpack.c.bf16 %v1621_v23, %v1619_v10  ;;  %v1637_v1 = vld [vmem:[%s7867_s6 + $0x1d8] sm:$0xff] }
 0x276   : > { %3996 = vmatpush1.bf16.msra.mxu1 %v3995_v14  ;;  %v4023_v14 = vpack.c.bf16 %v1604_v46, %v1602_v12  ;;  %v4053_v38 = vpack.c.bf16 %v1637_v1, %v1635_v55  ;;  %v1639_v46 = vld [vmem:[%s7867_s6 + $0x1e8] sm:$0xff] }
 0x277   : > { %1459 = vmatprep.subr.mxu1 %v1221_v19  ;;  %4004 = vmatpush1.bf16.msra.mxu0 %v4003_v26  ;;  %v4025_v19 = vpack.c.bf16 %v1609_v13, %v1607_v30  ;;  %v1618_v26 = vld [vmem:[%s7867_s6 + $0x140] sm:$0xff]  ;;  %v1641_v30 = vld [vmem:[%s7867_s6 + $0x1f8] sm:$0xff] }
 0x278   : > { %4006 = vmatprep.subr.bf16.mxu0 %v4005_v28  ;;  %v1620_v28 = vld [vmem:[%s7867_s6 + $0x150] sm:$0xff]  ;;  %v4057_v13 = vpack.c.bf16 %v1641_v30, %v1639_v46 }
 0x279   : > { %v4039_v0 = vpack.c.bf16 %v1620_v28, %v1618_v26  ;;  %v1644_v28 = vld [vmem:[%s7867_s6 + $0x210] sm:$0xff] }
 0x27a   : > { %1460 = vmatpush1.msra.mxu1 %v1214_v52  ;;  %v1606_v52 = vld [vmem:[%s7867_s6 + $0xe0] sm:$0xff] }
 0x27b   : > { %3358 = vmatmul.mubr.msk.f32.vlgmr.msra.gmra.mrb[8].mxu1 %vm682_vm8, %v5847_v18  ;;  %4008 = vmatpush1.bf16.msra.mxu0 %v4007_v17  ;;  %v1622_v17 = vld [vmem:[%s7867_s6 + $0x160] sm:$0xff] }
 0x27c   : > { %2246 = vmatprep.mubr.f32.mxu1 %v5020_v11  ;;  %4010 = vmatprep.subr.bf16.mxu0 %v4009_v39  ;;  %v1624_v39 = vld [vmem:[%s7867_s6 + $0x170] sm:$0xff] }
 0x27d   : > { %v4043_v4 = vpack.c.bf16 %v1624_v39, %v1622_v17 }
 0x27f   : > { %4012 = vmatpush1.bf16.msra.mxu0 %v4011_v37  ;;  %v1626_v37 = vld [vmem:[%s7867_s6 + $0x180] sm:$0xff] }
 0x280   : > { %v5970_v9 = vpop.permute.xlu1 %1224  ;;  %4014 = vmatprep.subr.bf16.mxu0 %v4013_v54  ;;  %v1628_v54 = vld [vmem:[%s7867_s6 + $0x190] sm:$0xff] }
 0x281   : > { %v4047_v34 = vpack.c.bf16 %v1628_v54, %v1626_v37 }
 0x283   : > { %4016 = vmatpush1.bf16.msra.mxu0 %v4015_v42  ;;  %v1630_v42 = vld [vmem:[%s7867_s6 + $0x1a0] sm:$0xff] }
 0x284   : > { %4018 = vmatprep.subr.bf16.mxu0 %v4017_v58  ;;  %v1632_v58 = vld [vmem:[%s7867_s6 + $0x1b0] sm:$0xff] }
 0x285   : > { %v4051_v15 = vpack.c.bf16 %v1632_v58, %v1630_v42 }
 0x287   : > { %4020 = vmatpush1.bf16.msra.mxu0 %v4019_v6  ;;  %v1634_v6 = vld [vmem:[%s7867_s6 + $0x1c0] sm:$0xff] }
 0x288   : > { %4022 = vmatprep.subr.bf16.mxu0 %v4021_v45  ;;  %v1636_v45 = vld [vmem:[%s7867_s6 + $0x1d0] sm:$0xff] }
 0x289   : > { %v4055_v12 = vpack.c.bf16 %v1636_v45, %v1634_v6  ;;  %v1650_v6 = vld [vmem:[%s7867_s6 + $0x240] sm:$0xff]  ;;  %v1652_v45 = vld [vmem:[%s7867_s6 + $0x250] sm:$0xff] }
 0x28b   : > { %4024 = vmatpush1.bf16.msra.mxu0 %v4023_v14  ;;  %v1638_v14 = vld [vmem:[%s7867_s6 + $0x1e0] sm:$0xff] }
 0x28c   : > { %4026 = vmatprep.subr.bf16.mxu0 %v4025_v19  ;;  %v1640_v19 = vld [vmem:[%s7867_s6 + $0x1f0] sm:$0xff] }
 0x324   : > { %v1367_v2 = vpop.f32.mrb[6].mxu1 }
 0x325   : > { %v1296_v32 = vpop.f32.mrb[2].mxu0  ;;  %v1369_v51 = vpop.f32.mrb[7].mxu1  ;;  %v5979_v43 = vadd.f32 %v1367_v2, %v5970_v9  ;;  %v1608_v2 = vld [vmem:[%s7867_s6 + $0xf0] sm:$0xff] }
 0x326   : > { %v5973_v24 = vadd.f32 %v1296_v32, %v5970_v9  ;;  %v5976_v62 = vadd.f32 %v1369_v51, %v5970_v9  ;;  %v1298_v57 = vpop.f32.mrb[3].mxu0  ;;  %v1611_v32 = vld [vmem:[%s7867_s6 + $0x108] sm:$0xff]  ;;  %v1613_v51 = vld [vmem:[%s7867_s6 + $0x118] sm:$0xff] }
 0x327   : > { %v5982_v29 = vadd.f32 %v1298_v57, %v5970_v9  ;;  %v4027_v57 = vpack.c.bf16 %v1608_v2, %v1606_v52  ;;  %v4059_v52 = vpack.c.bf16 %v1640_v19, %v1638_v14  ;;  %v1657_v14 = vld [vmem:[%s7867_s6 + $0x278] sm:$0xff] }
 0x328   : > { %v4838_v18 = vpack.i.bf16 %v5973_v24, %v5976_v62 }
 0x329   : > { %v4833_v7 = vpack.i.bf16 %v5979_v43, %v5982_v29  ;;  %4028 = vmatpush1.bf16.msra.mxu0 %v4027_v57 }
 0x32a   : > { %4839 = vrot.lane.b32.xlu1 %v4838_v18, %s7901_s20  ;;  %v4029_v18 = vpack.c.bf16 %v1613_v51, %v1611_v32 }
 0x32b   : > { %4834 = vrot.lane.b32.xlu0 %v4833_v7, %s7901_s20  ;;  %v1610_v7 = vld [vmem:[%s7867_s6 + $0x100] sm:$0xff] }
 0x32c   : > { %v4031_v36 = vpack.c.bf16 %v1612_v50, %v1610_v7  ;;  %4030 = vmatprep.subr.bf16.mxu0 %v4029_v18 }
 0x32e   : > { %4032 = vmatpush1.bf16.msra.mxu0 %v4031_v36 }
 0x32f   : > { %4034 = vmatprep.subr.bf16.mxu0 %v4033_v44 }
 0x332   : > { %4036 = vmatpush1.bf16.msra.mxu0 %v4035_v16 }
 0x333   : > { %4038 = vmatprep.subr.bf16.mxu0 %v4037_v8 }
 0x336   : > { %4040 = vmatpush1.bf16.msra.mxu0 %v4039_v0  ;;  %v1649_v0 = vld [vmem:[%s7867_s6 + $0x238] sm:$0xff] }
 0x337   : > { %4042 = vmatprep.subr.bf16.mxu0 %v4041_v5  ;;  %v4065_v54 = vpack.c.bf16 %v1649_v0, %v1647_v63  ;;  %v1666_v0 = vld [vmem:[%s7867_s6 + $0x2c0] sm:$0xff] }
 0x33a   : > { %4044 = vmatpush1.bf16.msra.mxu0 %v4043_v4 }
 0x33b   : > { %4046 = vmatprep.subr.bf16.mxu0 %v4045_v22 }
 0x33e   : > { %v6056_v21 = vpop.f32.mrb[4].mxu0  ;;  %4048 = vmatpush1.bf16.msra.mxu0 %v4047_v34  ;;  %v1651_v34 = vld [vmem:[%s7867_s6 + $0x248] sm:$0xff] }
 0x33f   : > { %v6064_v47 = vpop.f32.mrb[5].mxu0  ;;  %4050 = vmatprep.subr.bf16.mxu0 %v4049_v49  ;;  %v1439_v27 = vadd.f32 %v6056_v21, %v5970_v9  ;;  %v1645_v21 = vld [vmem:[%s7867_s6 + $0x218] sm:$0xff] }
 0x340   : > { %v1441_v10 = vadd.f32 %v6064_v47, %v5970_v9  ;;  %v1653_v49 = vld [vmem:[%s7867_s6 + $0x258] sm:$0xff] }
 0x341   : > { %v4069_v30 = vpack.c.bf16 %v1653_v49, %v1651_v34  ;;  %v1674_v34 = vld [vmem:[%s7867_s6 + $0x300] sm:$0xff]  ;;  %v1676_v49 = vld [vmem:[%s7867_s6 + $0x310] sm:$0xff] }
 0x342   : > { %4052 = vmatpush1.bf16.msra.mxu0 %v4051_v15  ;;  %v4848_v16 = vpack.i.bf16 %v1441_v10, %v1439_v27 }
 0x343   : > { %4054 = vmatprep.subr.bf16.mxu0 %v4053_v38  ;;  %v4067_v38 = vpack.c.bf16 %v1648_v61, %v1646_v40 }
 0x346   : > { %4056 = vmatpush1.bf16.msra.mxu0 %v4055_v12 }
 0x347   : > { %4058 = vmatprep.subr.bf16.mxu0 %v4057_v13  ;;  %v1655_v13 = vld [vmem:[%s7867_s6 + $0x268] sm:$0xff] }
 0x34a   : > { %4060 = vmatpush1.bf16.msra.mxu0 %v4059_v52 }
 0x34e   : > { %v6108_v41 = vpop.f32.mrb[8].mxu1 }
 0x34f   : > { %v6116_v25 = vpop.f32.mrb[9].mxu1 }
 0x39c   : > { %v6190_v2 = vpop.permute.xlu1 %4839 }
 0x39d   : > { %v4842_v32 = vunpack.i.h.bf16 %v6190_v2  ;;  %v4841_v51 = vunpack.i.l.bf16 %v6190_v2  ;;  %v4835_v57 = vpop.permute.xlu0 %4834  ;;  %v1656_v2 = vld [vmem:[%s7867_s6 + $0x270] sm:$0xff] }
 0x39e   : > { %v4837_v18 = vunpack.i.h.bf16 %v4835_v57  ;;  %v4836_v7 = vunpack.i.l.bf16 %v4835_v57  ;;  %v4071_v57 = vpack.c.bf16 %v1652_v45, %v1650_v6  ;;  %v1678_v6 = vld [vmem:[%s7867_s6 + $0x320] sm:$0xff]  ;;  %v1680_v45 = vld [vmem:[%s7867_s6 + $0x330] sm:$0xff] }
 0x3a0   : > { %v1534_v50 = vsel %vm593_vm4, %v4837_v18, %v4841_v51  ;;  %v1535_v48 = vsel %vm593_vm4, %v4836_v7, %v4837_v18  ;;  %v1536_v33 = vsel %vm593_vm4, %v4842_v32, %v4836_v7 }
 0x3a1   : > { %v1538_v36 = vmax.f32 %v5973_v24, %v1536_v33  ;;  %v1539_v44 = vmax.f32 %v5982_v29, %v1535_v48  ;;  %v6205_v59 = vmax.f32 %v5979_v43, %v1534_v50  ;;  %v1510_v24 = vadd.f32 %v6108_v41, %v5970_v9  ;;  %v1643_v29 = vld [vmem:[%s7867_s6 + $0x208] sm:$0xff]  ;;  %v1654_v33 = vld [vmem:[%s7867_s6 + $0x260] sm:$0xff] }
 0x3a2   : > { %v1512_v43 = vadd.f32 %v6116_v25, %v5970_v9  ;;  %v4061_v47 = vpack.c.bf16 %v1645_v21, %v1643_v29  ;;  %v1642_v25 = vld [vmem:[%s7867_s6 + $0x200] sm:$0xff]  ;;  %v4073_v48 = vpack.c.bf16 %v1657_v14, %v1655_v13  ;;  %v1684_v14 = vld [vmem:[%s7867_s6 + $0x350] sm:$0xff] }
 0x3a3   : > { %1546 = vrot.lane.b32.xlu1 %v1538_v36, %s7909_s1  ;;  %v4843_v23 = vpack.i.bf16 %v6205_v59, %v1539_v44  ;;  %v4063_v4 = vpack.c.bf16 %v1644_v28, %v1642_v25  ;;  %v1669_v25 = vld [vmem:[%s7867_s6 + $0x2d8] sm:$0xff]  ;;  %v1682_v13 = vld [vmem:[%s7867_s6 + $0x340] sm:$0xff] }
 0x3a4   : > { %4062 = vmatprep.subr.bf16.mxu0 %v4061_v47  ;;  %v4858_v8 = vpack.i.bf16 %v1512_v43, %v1510_v24  ;;  %v1662_v47 = vld [vmem:[%s7867_s6 + $0x2a0] sm:$0xff] }
 0x3a5   : > { %4844 = vrot.lane.b32.xlu0 %v4843_v23, %s7909_s1  ;;  %v1658_v23 = vld [vmem:[%s7867_s6 + $0x280] sm:$0xff] }
 0x3a9   : > { %4849 = vrot.lane.b32.xlu0 %v4848_v16, %s7901_s20  ;;  %v1660_v16 = vld [vmem:[%s7867_s6 + $0x290] sm:$0xff] }
 0x3aa   : > { %v4079_v29 = vpack.c.bf16 %v1660_v16, %v1658_v23  ;;  %v1695_v23 = vld [vmem:[%s7867_s6 + $0x3a8] sm:$0xff]  ;;  %v1697_v16 = vld [vmem:[%s7867_s6 + $0x3b8] sm:$0xff] }
 0x3ad   : > { %4859 = vrot.lane.b32.xlu0 %v4858_v8, %s7901_s20  ;;  %v1664_v8 = vld [vmem:[%s7867_s6 + $0x2b0] sm:$0xff] }
 0x3ae   : > { %v4083_v28 = vpack.c.bf16 %v1664_v8, %v1662_v47  ;;  %v1699_v47 = vld [vmem:[%s7867_s6 + $0x3c8] sm:$0xff]  ;;  %v1701_v8 = vld [vmem:[%s7867_s6 + $0x3d8] sm:$0xff] }
 0x415   : > { %v6236_v31 = vpop.permute.xlu1 %1546 }
 0x417   : > { %v6226_v26 = vpop.permute.xlu0 %4844 }
 0x418   : > { %v4847_v41 = vunpack.i.h.bf16 %v6226_v26  ;;  %v4846_v9 = vunpack.i.l.bf16 %v6226_v26 }
 0x41a   : > { %v1568_v5 = vsel %vm643_vm5, %v6236_v31, %v4846_v9  ;;  %v1567_v17 = vsel %vm643_vm5, %v4846_v9, %v4847_v41  ;;  %v1667_v9 = vld [vmem:[%s7867_s6 + $0x2c8] sm:$0xff] }
 0x41b   : > { %v1570_v39 = vmax.f32 %v1538_v36, %v1568_v5  ;;  %v4850_v3 = vpop.permute.xlu0 %4849  ;;  %v1571_v60 = vmax.f32 %v1539_v44, %v1567_v17  ;;  %v1659_v36 = vld [vmem:[%s7867_s6 + $0x288] sm:$0xff]  ;;  %v1661_v44 = vld [vmem:[%s7867_s6 + $0x298] sm:$0xff]  ;;  %v4085_v63 = vpack.c.bf16 %v1669_v25, %v1667_v9  ;;  %v1668_v5 = vld [vmem:[%s7867_s6 + $0x2d0] sm:$0xff]  ;;  %v4117_v25 = vpack.c.bf16 %v1701_v8, %v1699_v47 }
 0x41c   : > { %v4852_v22 = vunpack.i.h.bf16 %v4850_v3  ;;  %v4851_v37 = vunpack.i.l.bf16 %v4850_v3  ;;  %v1671_v17 = vld [vmem:[%s7867_s6 + $0x2e8] sm:$0xff]  ;;  %v4087_v3 = vpack.c.bf16 %v1668_v5, %v1666_v0  ;;  %v1705_v5 = vld [vmem:[%s7867_s6 + $0x3f8] sm:$0xff] }
 0x41d   : > { %1898 = vmatprep.mubr.f32.mxu0 %v1571_v60  ;;  %v1703_v0 = vld [vmem:[%s7867_s6 + $0x3e8] sm:$0xff]  ;;  %v1729_v47 = vld [vmem:[%s7867_s6 + $0x4b8] sm:$0xff] }
 0x41e   : > { %v1532_v42 = vsel %vm593_vm4, %v4851_v37, %v4852_v22  ;;  %v1533_v58 = vsel %vm593_vm4, %v4841_v51, %v4851_v37  ;;  %1899 = vmatmul.mubr.f32.vlgmr.msra.gmra.mrb[6].mxu0 %v1570_v39  ;;  %v1673_v39 = vld [vmem:[%s7867_s6 + $0x2f8] sm:$0xff]  ;;  %v1675_v37 = vld [vmem:[%s7867_s6 + $0x308] sm:$0xff] }
 0x41f   : > { %v4860_v15 = vpop.permute.xlu0 %4859  ;;  %v6268_v55 = vmax.f32 %v5976_v62, %v1533_v58  ;;  %v6270_v1 = vmax.f32 %v1439_v27, %v1532_v42  ;;  %4064 = vmatpush1.bf16.msra.mxu0 %v4063_v4  ;;  %v4075_v27 = vpack.c.bf16 %v1656_v2, %v1654_v33  ;;  %v4089_v60 = vpack.c.bf16 %v1673_v39, %v1671_v17  ;;  %v1670_v4 = vld [vmem:[%s7867_s6 + $0x2e0] sm:$0xff]  ;;  %v1679_v42 = vld [vmem:[%s7867_s6 + $0x328] sm:$0xff]  ;;  %v1681_v58 = vld [vmem:[%s7867_s6 + $0x338] sm:$0xff] }
 0x420   : > { %v4862_v12 = vunpack.i.h.bf16 %v4860_v15  ;;  %v4861_v46 = vunpack.i.l.bf16 %v4860_v15  ;;  %4066 = vmatprep.subr.bf16.mxu0 %v4065_v54  ;;  %v1677_v54 = vld [vmem:[%s7867_s6 + $0x318] sm:$0xff]  ;;  %v4095_v15 = vpack.c.bf16 %v1676_v49, %v1674_v34  ;;  %v1688_v33 = vld [vmem:[%s7867_s6 + $0x370] sm:$0xff]  ;;  %v1691_v2 = vld [vmem:[%s7867_s6 + $0x388] sm:$0xff]  ;;  %v4121_v39 = vpack.c.bf16 %v1705_v5, %v1703_v0 }
 0x421   : > { %v4853_v62 = vpack.i.bf16 %v6270_v1, %v6268_v55  ;;  %v4093_v61 = vpack.c.bf16 %v1677_v54, %v1675_v37  ;;  %v1706_v49 = vld [vmem:[%s7867_s6 + $0x400] sm:$0xff]  ;;  %v1733_v0 = vld [vmem:[%s7867_s6 + $0x4d8] sm:$0xff] }
 0x422   : > { %v1530_v19 = vsel %vm593_vm4, %v4861_v46, %v4862_v12  ;;  %v1531_v52 = vsel %vm593_vm4, %v4852_v22, %v4861_v46  ;;  %v1537_v51 = vsel %vm593_vm4, %v4862_v12, %v4842_v32  ;;  %v1672_v22 = vld [vmem:[%s7867_s6 + $0x2f0] sm:$0xff]  ;;  %v1683_v12 = vld [vmem:[%s7867_s6 + $0x348] sm:$0xff]  ;;  %v1685_v46 = vld [vmem:[%s7867_s6 + $0x358] sm:$0xff] }
 0x423   : > { %4854 = vrot.lane.b32.xlu1 %v4853_v62, %s7909_s1  ;;  %v6295_v18 = vmax.f32 %v1512_v43, %v1537_v51  ;;  %v6297_v7 = vmax.f32 %v1441_v10, %v1531_v52  ;;  %v6299_v50 = vmax.f32 %v1510_v24, %v1530_v19  ;;  %4068 = vmatpush1.bf16.msra.mxu0 %v4067_v38  ;;  %v1663_v24 = vld [vmem:[%s7867_s6 + $0x2a8] sm:$0xff]  ;;  %v1665_v43 = vld [vmem:[%s7867_s6 + $0x2b8] sm:$0xff] }
 0x424   : > { %4070 = vmatprep.subr.bf16.mxu0 %v4069_v30  ;;  %v4077_v10 = vpack.c.bf16 %v1661_v44, %v1659_v36  ;;  %v4081_v21 = vpack.c.bf16 %v1665_v43, %v1663_v24  ;;  %v4091_v40 = vpack.c.bf16 %v1672_v22, %v1670_v4  ;;  %v4097_v38 = vpack.c.bf16 %v1681_v58, %v1679_v42  ;;  %v1687_v19 = vld [vmem:[%s7867_s6 + $0x368] sm:$0xff]  ;;  %v1689_v52 = vld [vmem:[%s7867_s6 + $0x378] sm:$0xff]  ;;  %v1708_v42 = vld [vmem:[%s7867_s6 + $0x410] sm:$0xff] }
 0x425   : > { %1560 = vrot.lane.b32.xlu0 %v6295_v18, %s7909_s1  ;;  %v4863_v32 = vpack.i.bf16 %v6299_v50, %v6297_v7  ;;  %v4099_v30 = vpack.c.bf16 %v1680_v45, %v1678_v6  ;;  %v4101_v62 = vpack.c.bf16 %v1685_v46, %v1683_v12  ;;  %v4103_v51 = vpack.c.bf16 %v1684_v14, %v1682_v13  ;;  %v1707_v4 = vld [vmem:[%s7867_s6 + $0x408] sm:$0xff]  ;;  %v1709_v22 = vld [vmem:[%s7867_s6 + $0x418] sm:$0xff]  ;;  %v1712_v14 = vld [vmem:[%s7867_s6 + $0x430] sm:$0xff] }
 0x426   : > { %v4113_v43 = vpack.c.bf16 %v1697_v16, %v1695_v23  ;;  %v4125_v54 = vpack.c.bf16 %v1709_v22, %v1707_v4  ;;  %v1711_v58 = vld [vmem:[%s7867_s6 + $0x428] sm:$0xff]  ;;  %v1725_v23 = vld [vmem:[%s7867_s6 + $0x498] sm:$0xff] }
 0x427   : > { %4864 = vrot.lane.b32.xlu1 %v4863_v32, %s7909_s1  ;;  %4072 = vmatpush1.bf16.msra.mxu0 %v4071_v57  ;;  %v4105_v57 = vpack.c.bf16 %v1689_v52, %v1687_v19  ;;  %v1693_v32 = vld [vmem:[%s7867_s6 + $0x398] sm:$0xff]  ;;  %s5024_s1 = smov 17  }
 0x428   : > { %4074 = vmatprep.subr.bf16.mxu0 %v4073_v48  ;;  %v1686_v48 = vld [vmem:[%s7867_s6 + $0x360] sm:$0xff]  ;;  %v4109_v44 = vpack.c.bf16 %v1693_v32, %v1691_v2  ;;  %v1719_v2 = vld [vmem:[%s7867_s6 + $0x468] sm:$0xff]  ;;  %v1737_v4 = vld [vmem:[%s7867_s6 + $0x4f8] sm:$0xff] }
 0x429   : > { %v4107_v36 = vpack.c.bf16 %v1688_v33, %v1686_v48  ;;  %v1714_v48 = vld [vmem:[%s7867_s6 + $0x440] sm:$0xff]  ;;  %v1716_v33 = vld [vmem:[%s7867_s6 + $0x450] sm:$0xff] }
 0x42a   : > { %v4135_v32 = vpack.c.bf16 %v1716_v33, %v1714_v48  ;;  %v1751_v48 = vld [vmem:[%s7867_s6 + $0x568] sm:$0xff]  ;;  %v1753_v33 = vld [vmem:[%s7867_s6 + $0x578] sm:$0xff] }
 0x42b   : > { %4076 = vmatpush1.bf16.msra.mxu0 %v4075_v27  ;;  %v1690_v27 = vld [vmem:[%s7867_s6 + $0x380] sm:$0xff] }
 0x42c   : > { %4078 = vmatprep.subr.bf16.mxu0 %v4077_v10  ;;  %v1692_v10 = vld [vmem:[%s7867_s6 + $0x390] sm:$0xff] }
 0x42d   : > { %v4111_v24 = vpack.c.bf16 %v1692_v10, %v1690_v27  ;;  %v1720_v27 = vld [vmem:[%s7867_s6 + $0x470] sm:$0xff]  ;;  %v1723_v10 = vld [vmem:[%s7867_s6 + $0x488] sm:$0xff] }
 0x42f   : > { %4080 = vmatpush1.bf16.msra.mxu0 %v4079_v29  ;;  %v1694_v29 = vld [vmem:[%s7867_s6 + $0x3a0] sm:$0xff] }
 0x430   : > { %4082 = vmatprep.subr.bf16.mxu0 %v4081_v21  ;;  %v1696_v21 = vld [vmem:[%s7867_s6 + $0x3b0] sm:$0xff] }
 0x431   : > { %v4115_v9 = vpack.c.bf16 %v1696_v21, %v1694_v29  ;;  %v1724_v29 = vld [vmem:[%s7867_s6 + $0x490] sm:$0xff]  ;;  %v1727_v21 = vld [vmem:[%s7867_s6 + $0x4a8] sm:$0xff] }
 0x433   : > { %4084 = vmatpush1.bf16.msra.mxu0 %v4083_v28  ;;  %v1698_v28 = vld [vmem:[%s7867_s6 + $0x3c0] sm:$0xff] }
 0x434   : > { %4086 = vmatprep.subr.bf16.mxu0 %v4085_v63  ;;  %v1700_v63 = vld [vmem:[%s7867_s6 + $0x3d0] sm:$0xff] }
 0x435   : > { %v4119_v17 = vpack.c.bf16 %v1700_v63, %v1698_v28  ;;  %v1728_v28 = vld [vmem:[%s7867_s6 + $0x4b0] sm:$0xff]  ;;  %v1731_v63 = vld [vmem:[%s7867_s6 + $0x4c8] sm:$0xff] }
 0x437   : > { %4088 = vmatpush1.bf16.msra.mxu0 %v4087_v3  ;;  %v1702_v3 = vld [vmem:[%s7867_s6 + $0x3e0] sm:$0xff] }
 0x438   : > { %4090 = vmatprep.subr.bf16.mxu0 %v4089_v60  ;;  %v1704_v60 = vld [vmem:[%s7867_s6 + $0x3f0] sm:$0xff] }
 0x439   : > { %v4123_v37 = vpack.c.bf16 %v1704_v60, %v1702_v3  ;;  %v1732_v3 = vld [vmem:[%s7867_s6 + $0x4d0] sm:$0xff]  ;;  %v1735_v60 = vld [vmem:[%s7867_s6 + $0x4e8] sm:$0xff] }
 0x43b   : > { %4092 = vmatpush1.bf16.msra.mxu0 %v4091_v40 }
 0x43c   : > { %4094 = vmatprep.subr.bf16.mxu0 %v4093_v61 }
 0x43f   : > { %4096 = vmatpush1.bf16.msra.mxu0 %v4095_v15  ;;  %v1713_v15 = vld [vmem:[%s7867_s6 + $0x438] sm:$0xff] }
 0x440   : > { %4098 = vmatprep.subr.bf16.mxu0 %v4097_v38  ;;  %v4129_v26 = vpack.c.bf16 %v1713_v15, %v1711_v58 }
 0x443   : > { %4100 = vmatpush1.bf16.msra.mxu0 %v4099_v30  ;;  %v4127_v30 = vpack.c.bf16 %v1708_v42, %v1706_v49  ;;  %v1739_v49 = vld [vmem:[%s7867_s6 + $0x508] sm:$0xff]  ;;  %v1741_v42 = vld [vmem:[%s7867_s6 + $0x518] sm:$0xff] }
 0x444   : > { %4102 = vmatprep.subr.bf16.mxu0 %v4101_v62  ;;  %v4157_v15 = vpack.c.bf16 %v1741_v42, %v1739_v49 }
 0x447   : > { %4104 = vmatpush1.bf16.msra.mxu0 %v4103_v51 }
 0x448   : > { %4106 = vmatprep.subr.bf16.mxu0 %v4105_v57 }
 0x44b   : > { %4108 = vmatpush1.bf16.msra.mxu0 %v4107_v36 }
 0x44c   : > { %4110 = vmatprep.subr.bf16.mxu0 %v4109_v44  ;;  %v1718_v44 = vld [vmem:[%s7867_s6 + $0x460] sm:$0xff] }
 0x44d   : > { %v4139_v16 = vpack.c.bf16 %v1720_v27, %v1718_v44  ;;  %v1755_v44 = vld [vmem:[%s7867_s6 + $0x588] sm:$0xff]  ;;  %v1757_v27 = vld [vmem:[%s7867_s6 + $0x598] sm:$0xff] }
 0x44f   : > { %4112 = vmatpush1.bf16.msra.mxu0 %v4111_v24  ;;  %v4141_v24 = vpack.c.bf16 %v1725_v23, %v1723_v10  ;;  %v4173_v23 = vpack.c.bf16 %v1757_v27, %v1755_v44  ;;  %v1786_v27 = vld [vmem:[%s7867_s6 + $0x680] sm:$0xff] }
 0x450   : > { %4114 = vmatprep.subr.bf16.mxu0 %v4113_v43  ;;  %v1722_v43 = vld [vmem:[%s7867_s6 + $0x480] sm:$0xff] }
 0x451   : > { %v4143_v8 = vpack.c.bf16 %v1724_v29, %v1722_v43  ;;  %v1759_v43 = vld [vmem:[%s7867_s6 + $0x5a8] sm:$0xff]  ;;  %v1761_v29 = vld [vmem:[%s7867_s6 + $0x5b8] sm:$0xff] }
 0x453   : > { %4116 = vmatpush1.bf16.msra.mxu0 %v4115_v9  ;;  %v4145_v9 = vpack.c.bf16 %v1729_v47, %v1727_v21  ;;  %v4177_v47 = vpack.c.bf16 %v1761_v29, %v1759_v43  ;;  %v1790_v29 = vld [vmem:[%s7867_s6 + $0x6a0] sm:$0xff] }
 0x454   : > { %4118 = vmatprep.subr.bf16.mxu0 %v4117_v25  ;;  %v1726_v25 = vld [vmem:[%s7867_s6 + $0x4a0] sm:$0xff] }
 0x455   : > { %v4147_v5 = vpack.c.bf16 %v1728_v28, %v1726_v25  ;;  %v1763_v25 = vld [vmem:[%s7867_s6 + $0x5c8] sm:$0xff]  ;;  %v1765_v28 = vld [vmem:[%s7867_s6 + $0x5d8] sm:$0xff] }
 0x457   : > { %4120 = vmatpush1.bf16.msra.mxu0 %v4119_v17  ;;  %v4149_v17 = vpack.c.bf16 %v1733_v0, %v1731_v63  ;;  %v4181_v0 = vpack.c.bf16 %v1765_v28, %v1763_v25  ;;  %v1794_v28 = vld [vmem:[%s7867_s6 + $0x6c0] sm:$0xff] }
 0x458   : > { %4122 = vmatprep.subr.bf16.mxu0 %v4121_v39  ;;  %v1730_v39 = vld [vmem:[%s7867_s6 + $0x4c0] sm:$0xff] }
 0x459   : > { %v4151_v22 = vpack.c.bf16 %v1732_v3, %v1730_v39  ;;  %v1767_v39 = vld [vmem:[%s7867_s6 + $0x5e8] sm:$0xff]  ;;  %v1769_v3 = vld [vmem:[%s7867_s6 + $0x5f8] sm:$0xff] }
 0x45b   : > { %4124 = vmatpush1.bf16.msra.mxu0 %v4123_v37  ;;  %v4153_v37 = vpack.c.bf16 %v1737_v4, %v1735_v60  ;;  %v4185_v4 = vpack.c.bf16 %v1769_v3, %v1767_v39  ;;  %v1798_v3 = vld [vmem:[%s7867_s6 + $0x6e0] sm:$0xff] }
 0x45c   : > { %4126 = vmatprep.subr.bf16.mxu0 %v4125_v54  ;;  %v1734_v54 = vld [vmem:[%s7867_s6 + $0x4e0] sm:$0xff] }
 0x495   : > { %v6462_v40 = vpop.permute.xlu1 %4854 }
 0x496   : > { %v4857_v61 = vunpack.i.h.bf16 %v6462_v40  ;;  %v4856_v34 = vunpack.i.l.bf16 %v6462_v40 }
 0x497   : > { %v6679_v49 = vpop.permute.xlu0 %1560 }
 0x498   : > { %v1566_v38 = vsel %vm643_vm5, %v4847_v41, %v4856_v34  ;;  %v1565_v6 = vsel %vm643_vm5, %v4856_v34, %v4857_v61  ;;  %v1710_v41 = vld [vmem:[%s7867_s6 + $0x420] sm:$0xff]  ;;  %v1736_v34 = vld [vmem:[%s7867_s6 + $0x4f0] sm:$0xff] }
 0x499   : > { %v1572_v45 = vmax.f32 %v6205_v59, %v1566_v38  ;;  %v6487_v12 = vpop.permute.xlu1 %4864  ;;  %v1573_v46 = vmax.f32 %v6268_v55, %v1565_v6  ;;  %v1715_v59 = vld [vmem:[%s7867_s6 + $0x448] sm:$0xff]  ;;  %v1717_v55 = vld [vmem:[%s7867_s6 + $0x458] sm:$0xff]  ;;  %v4131_v51 = vpack.c.bf16 %v1712_v14, %v1710_v41  ;;  %v4155_v58 = vpack.c.bf16 %v1736_v34, %v1734_v54  ;;  %v1738_v38 = vld [vmem:[%s7867_s6 + $0x500] sm:$0xff] }
 0x49a   : > { %v4867_v62 = vunpack.i.h.bf16 %v6487_v12  ;;  %v4866_v13 = vunpack.i.l.bf16 %v6487_v12  ;;  %v4133_v57 = vpack.c.bf16 %v1717_v55, %v1715_v59  ;;  %v1740_v6 = vld [vmem:[%s7867_s6 + $0x510] sm:$0xff]  ;;  %v1742_v41 = vld [vmem:[%s7867_s6 + $0x520] sm:$0xff]  ;;  %v1747_v59 = vld [vmem:[%s7867_s6 + $0x548] sm:$0xff] }
 0x49b   : > { %1969 = vmatprep.mubr.f32.mxu0 %v1573_v46  ;;  %v1745_v46 = vld [vmem:[%s7867_s6 + $0x538] sm:$0xff]  ;;  %v1744_v14 = vld [vmem:[%s7867_s6 + $0x530] sm:$0xff]  ;;  %v1771_v54 = vld [vmem:[%s7867_s6 + $0x608] sm:$0xff] }
 0x49c   : > { %1970 = vmatmul.mubr.f32.vlgmr.msra.gmra.mrb[6].mxu0 %v1572_v45  ;;  %v1563_v19 = vsel %vm643_vm5, %v4866_v13, %v4867_v62  ;;  %v1743_v45 = vld [vmem:[%s7867_s6 + $0x528] sm:$0xff]  ;;  %v1749_v55 = vld [vmem:[%s7867_s6 + $0x558] sm:$0xff] }
 0x49d   : > { %4128 = vmatpush1.bf16.msra.mxu0 %v4127_v30  ;;  %v1575_v52 = vmax.f32 %v6297_v7, %v1563_v19  ;;  %v1721_v7 = vld [vmem:[%s7867_s6 + $0x478] sm:$0xff]  ;;  %v4159_v30 = vpack.c.bf16 %v1740_v6, %v1738_v38  ;;  %v4163_v19 = vpack.c.bf16 %v1744_v14, %v1742_v41  ;;  %v1772_v38 = vld [vmem:[%s7867_s6 + $0x610] sm:$0xff]  ;;  %v1564_v6 = vsel %vm643_vm5, %v4857_v61, %v4866_v13  ;;  %v1774_v61 = vld [vmem:[%s7867_s6 + $0x620] sm:$0xff] }
 0x49e   : > { %4130 = vmatprep.subr.bf16.mxu0 %v4129_v26  ;;  %v4137_v36 = vpack.c.bf16 %v1721_v7, %v1719_v2  ;;  %v4161_v26 = vpack.c.bf16 %v1745_v46, %v1743_v45  ;;  %v4169_v7 = vpack.c.bf16 %v1753_v33, %v1751_v48  ;;  %v1773_v34 = vld [vmem:[%s7867_s6 + $0x618] sm:$0xff]  ;;  %v1775_v45 = vld [vmem:[%s7867_s6 + $0x628] sm:$0xff]  ;;  %v1574_v40 = vmax.f32 %v6270_v1, %v1564_v6  ;;  %v1776_v13 = vld [vmem:[%s7867_s6 + $0x630] sm:$0xff] }
 0x49f   : > { %2040 = vmatprep.mubr.f32.mxu0 %v1575_v52  ;;  %v4165_v52 = vpack.c.bf16 %v1749_v55, %v1747_v59  ;;  %v1777_v46 = vld [vmem:[%s7867_s6 + $0x638] sm:$0xff]  ;;  %v4195_v59 = vpack.c.bf16 %v1776_v13, %v1774_v61  ;;  %v1782_v33 = vld [vmem:[%s7867_s6 + $0x660] sm:$0xff]  ;;  %v1812_v13 = vld [vmem:[%s7867_s6 + $0x750] sm:$0xff] }
 0x4a0   : > { %v4193_v41 = vpack.c.bf16 %v1777_v46, %v1775_v45  ;;  %v1781_v1 = vld [vmem:[%s7867_s6 + $0x658] sm:$0xff]  ;;  %v1806_v45 = vld [vmem:[%s7867_s6 + $0x720] sm:$0xff]  ;;  %v1808_v46 = vld [vmem:[%s7867_s6 + $0x730] sm:$0xff] }
 0x4a1   : > { %4132 = vmatpush1.bf16.msra.mxu0 %v4131_v51  ;;  %v1746_v51 = vld [vmem:[%s7867_s6 + $0x540] sm:$0xff] }
 0x4a2   : > { %4134 = vmatprep.subr.bf16.mxu0 %v4133_v57  ;;  %v1748_v57 = vld [vmem:[%s7867_s6 + $0x550] sm:$0xff]  ;;  %v1810_v61 = vld [vmem:[%s7867_s6 + $0x740] sm:$0xff] }
 0x4a3   : > { %v4167_v2 = vpack.c.bf16 %v1748_v57, %v1746_v51  ;;  %v1785_v51 = vld [vmem:[%s7867_s6 + $0x678] sm:$0xff] }
 0x4a5   : > { %4136 = vmatpush1.bf16.msra.mxu0 %v4135_v32  ;;  %v1750_v32 = vld [vmem:[%s7867_s6 + $0x560] sm:$0xff] }
 0x4a6   : > { %4138 = vmatprep.subr.bf16.mxu0 %v4137_v36  ;;  %v1752_v36 = vld [vmem:[%s7867_s6 + $0x570] sm:$0xff] }
 0x4a7   : > { %v4171_v10 = vpack.c.bf16 %v1752_v36, %v1750_v32  ;;  %v1789_v32 = vld [vmem:[%s7867_s6 + $0x698] sm:$0xff] }
 0x4a9   : > { %4140 = vmatpush1.bf16.msra.mxu0 %v4139_v16  ;;  %v1754_v16 = vld [vmem:[%s7867_s6 + $0x580] sm:$0xff] }
 0x4aa   : > { %4142 = vmatprep.subr.bf16.mxu0 %v4141_v24  ;;  %v1756_v24 = vld [vmem:[%s7867_s6 + $0x590] sm:$0xff] }
 0x4ab   : > { %v4175_v21 = vpack.c.bf16 %v1756_v24, %v1754_v16  ;;  %v1793_v16 = vld [vmem:[%s7867_s6 + $0x6b8] sm:$0xff] }
 0x4ad   : > { %4144 = vmatpush1.bf16.msra.mxu0 %v4143_v8  ;;  %v1758_v8 = vld [vmem:[%s7867_s6 + $0x5a0] sm:$0xff] }
 0x4ae   : > { %4146 = vmatprep.subr.bf16.mxu0 %v4145_v9  ;;  %v1760_v9 = vld [vmem:[%s7867_s6 + $0x5b0] sm:$0xff] }
 0x4af   : > { %v4179_v63 = vpack.c.bf16 %v1760_v9, %v1758_v8  ;;  %v1797_v8 = vld [vmem:[%s7867_s6 + $0x6d8] sm:$0xff] }
 0x4b1   : > { %4148 = vmatpush1.bf16.msra.mxu0 %v4147_v5  ;;  %v1762_v5 = vld [vmem:[%s7867_s6 + $0x5c0] sm:$0xff] }
 0x4b2   : > { %4150 = vmatprep.subr.bf16.mxu0 %v4149_v17  ;;  %v1764_v17 = vld [vmem:[%s7867_s6 + $0x5d0] sm:$0xff] }
 0x4b3   : > { %v4183_v60 = vpack.c.bf16 %v1764_v17, %v1762_v5  ;;  %v1801_v5 = vld [vmem:[%s7867_s6 + $0x6f8] sm:$0xff] }
 0x4b5   : > { %4152 = vmatpush1.bf16.msra.mxu0 %v4151_v22  ;;  %v1766_v22 = vld [vmem:[%s7867_s6 + $0x5e0] sm:$0xff] }
 0x4b6   : > { %4154 = vmatprep.subr.bf16.mxu0 %v4153_v37  ;;  %v1768_v37 = vld [vmem:[%s7867_s6 + $0x5f0] sm:$0xff] }
 0x4b7   : > { %v4187_v42 = vpack.c.bf16 %v1768_v37, %v1766_v22  ;;  %v1805_v22 = vld [vmem:[%s7867_s6 + $0x718] sm:$0xff] }
 0x4b9   : > { %4156 = vmatpush1.bf16.msra.mxu0 %v4155_v58  ;;  %v4189_v58 = vpack.c.bf16 %v1773_v34, %v1771_v54  ;;  %v1802_v34 = vld [vmem:[%s7867_s6 + $0x700] sm:$0xff] }
 0x4ba   : > { %4158 = vmatprep.subr.bf16.mxu0 %v4157_v15  ;;  %v1770_v15 = vld [vmem:[%s7867_s6 + $0x600] sm:$0xff] }
 0x4bd   : > { %4160 = vmatpush1.bf16.msra.mxu0 %v4159_v30  ;;  %v1569_v30 = vsel %vm643_vm5, %v6679_v49, %v6236_v31  ;;  %v1779_v31 = vld [vmem:[%s7867_s6 + $0x648] sm:$0xff] }
 0x4be   : > { %4162 = vmatprep.subr.bf16.mxu0 %v4161_v26  ;;  %v4191_v26 = vpack.c.bf16 %v1772_v38, %v1770_v15  ;;  %v1577_v14 = vmax.f32 %v6295_v18, %v1569_v30  ;;  %v4197_v55 = vpack.c.bf16 %v1781_v1, %v1779_v31  ;;  %v1780_v18 = vld [vmem:[%s7867_s6 + $0x650] sm:$0xff]  ;;  %v1809_v15 = vld [vmem:[%s7867_s6 + $0x738] sm:$0xff]  ;;  %v1811_v30 = vld [vmem:[%s7867_s6 + $0x748] sm:$0xff]  ;;  %v4231_v1 = vpack.c.bf16 %v1812_v13, %v1810_v61 }
 0x4bf   : > { %v1817_v31 = vld [vmem:[%s7867_s6 + $0x778] sm:$0xff] }
 0x4c1   : > { %4164 = vmatpush1.bf16.msra.mxu0 %v4163_v19  ;;  %v1778_v19 = vld [vmem:[%s7867_s6 + $0x640] sm:$0xff] }
 0x4c2   : > { %4166 = vmatprep.subr.bf16.mxu0 %v4165_v52  ;;  %v1783_v52 = vld [vmem:[%s7867_s6 + $0x668] sm:$0xff]  ;;  %v4199_v57 = vpack.c.bf16 %v1780_v18, %v1778_v19  ;;  %v1816_v19 = vld [vmem:[%s7867_s6 + $0x770] sm:$0xff] }
 0x4c3   : > { %v4201_v48 = vpack.c.bf16 %v1785_v51, %v1783_v52  ;;  %v1819_v18 = vld [vmem:[%s7867_s6 + $0x788] sm:$0xff]  ;;  %v1821_v52 = vld [vmem:[%s7867_s6 + $0x798] sm:$0xff] }
 0x4c5   : > { %4168 = vmatpush1.bf16.msra.mxu0 %v4167_v2  ;;  %v1784_v2 = vld [vmem:[%s7867_s6 + $0x670] sm:$0xff] }
 0x4c6   : > { %4170 = vmatprep.subr.bf16.mxu0 %v4169_v7  ;;  %v1787_v7 = vld [vmem:[%s7867_s6 + $0x688] sm:$0xff]  ;;  %v4203_v36 = vpack.c.bf16 %v1784_v2, %v1782_v33  ;;  %v1820_v33 = vld [vmem:[%s7867_s6 + $0x790] sm:$0xff] }
 0x4c7   : > { %v4205_v44 = vpack.c.bf16 %v1789_v32, %v1787_v7  ;;  %v1823_v2 = vld [vmem:[%s7867_s6 + $0x7a8] sm:$0xff]  ;;  %v1825_v7 = vld [vmem:[%s7867_s6 + $0x7b8] sm:$0xff] }
 0x4c9   : > { %4172 = vmatpush1.bf16.msra.mxu0 %v4171_v10  ;;  %v1788_v10 = vld [vmem:[%s7867_s6 + $0x690] sm:$0xff] }
 0x4ca   : > { %4174 = vmatprep.subr.bf16.mxu0 %v4173_v23  ;;  %v1791_v23 = vld [vmem:[%s7867_s6 + $0x6a8] sm:$0xff]  ;;  %v4207_v24 = vpack.c.bf16 %v1788_v10, %v1786_v27  ;;  %v1824_v27 = vld [vmem:[%s7867_s6 + $0x7b0] sm:$0xff] }
 0x4cb   : > { %v4209_v43 = vpack.c.bf16 %v1793_v16, %v1791_v23  ;;  %v1827_v10 = vld [vmem:[%s7867_s6 + $0x7c8] sm:$0xff]  ;;  %v1829_v23 = vld [vmem:[%s7867_s6 + $0x7d8] sm:$0xff] }
 0x4cd   : > { %4176 = vmatpush1.bf16.msra.mxu0 %v4175_v21  ;;  %v1792_v21 = vld [vmem:[%s7867_s6 + $0x6b0] sm:$0xff] }
 0x4ce   : > { %4178 = vmatprep.subr.bf16.mxu0 %v4177_v47  ;;  %v1795_v47 = vld [vmem:[%s7867_s6 + $0x6c8] sm:$0xff]  ;;  %v4211_v9 = vpack.c.bf16 %v1792_v21, %v1790_v29  ;;  %v1828_v29 = vld [vmem:[%s7867_s6 + $0x7d0] sm:$0xff] }
 0x4cf   : > { %v4213_v25 = vpack.c.bf16 %v1797_v8, %v1795_v47  ;;  %v1831_v21 = vld [vmem:[%s7867_s6 + $0x7e8] sm:$0xff]  ;;  %v1833_v47 = vld [vmem:[%s7867_s6 + $0x7f8] sm:$0xff] }
 0x4d1   : > { %4180 = vmatpush1.bf16.msra.mxu0 %v4179_v63  ;;  %v1796_v63 = vld [vmem:[%s7867_s6 + $0x6d0] sm:$0xff] }
 0x4d2   : > { %4182 = vmatprep.subr.bf16.mxu0 %v4181_v0  ;;  %v1799_v0 = vld [vmem:[%s7867_s6 + $0x6e8] sm:$0xff]  ;;  %v4215_v17 = vpack.c.bf16 %v1796_v63, %v1794_v28  ;;  %v1832_v28 = vld [vmem:[%s7867_s6 + $0x7f0] sm:$0xff] }
 0x4d3   : > { %v4217_v39 = vpack.c.bf16 %v1801_v5, %v1799_v0  ;;  %v1562_v0 = vsel %vm643_vm5, %v4867_v62, %v6679_v49 }
 0x4d4   : > { %v1576_v5 = vmax.f32 %v6299_v50, %v1562_v0  ;;  %v2119_v50 = vld [vmem:[%s7869_s8] sm:$0xff] }
 0x4d5   : > { %4184 = vmatpush1.bf16.msra.mxu0 %v4183_v60  ;;  %v1800_v60 = vld [vmem:[%s7867_s6 + $0x6f0] sm:$0xff] }
 0x4d6   : > { %4186 = vmatprep.subr.bf16.mxu0 %v4185_v4  ;;  %v1803_v4 = vld [vmem:[%s7867_s6 + $0x708] sm:$0xff]  ;;  %v4219_v37 = vpack.c.bf16 %v1800_v60, %v1798_v3 }
 0x4d7   : > { %v4221_v54 = vpack.c.bf16 %v1805_v22, %v1803_v4 }
 0x4d9   : > { %4188 = vmatpush1.bf16.msra.mxu0 %v4187_v42  ;;  %v1804_v42 = vld [vmem:[%s7867_s6 + $0x710] sm:$0xff] }
 0x4da   : > { %4190 = vmatprep.subr.bf16.mxu0 %v4189_v58  ;;  %v1807_v58 = vld [vmem:[%s7867_s6 + $0x728] sm:$0xff]  ;;  %v4223_v38 = vpack.c.bf16 %v1804_v42, %v1802_v34 }
 0x4db   : > { %v4225_v6 = vpack.c.bf16 %v1809_v15, %v1807_v58 }
 0x4dc   : > { %2041 = vmatmul.mubr.f32.vlgmr.msra.gmra.mrb[6].mxu0 %v1574_v40  ;;  %v4227_v40 = vpack.c.bf16 %v1808_v46, %v1806_v45 }
 0x4dd   : > { %4192 = vmatpush1.bf16.msra.mxu0 %v4191_v26  ;;  %2111 = vmatprep.mubr.f32.mxu0 %v1577_v14  ;;  %v1813_v26 = vld [vmem:[%s7867_s6 + $0x758] sm:$0xff]  ;;  %v1815_v14 = vld [vmem:[%s7867_s6 + $0x768] sm:$0xff] }
 0x4de   : > { %4194 = vmatprep.subr.bf16.mxu0 %v4193_v41  ;;  %v4229_v41 = vpack.c.bf16 %v1813_v26, %v1811_v30 }
 0x4e1   : > { %4196 = vmatpush1.bf16.msra.mxu0 %v4195_v59  ;;  %v4233_v59 = vpack.c.bf16 %v1817_v31, %v1815_v14 }
 0x4e2   : > { %4198 = vmatprep.subr.bf16.mxu0 %v4197_v55  ;;  %v1814_v55 = vld [vmem:[%s7867_s6 + $0x760] sm:$0xff] }
 0x4e3   : > { %v4235_v51 = vpack.c.bf16 %v1816_v19, %v1814_v55 }
 0x4e5   : > { %4200 = vmatpush1.bf16.msra.mxu0 %v4199_v57  ;;  %v4237_v57 = vpack.c.bf16 %v1821_v52, %v1819_v18 }
 0x4e6   : > { %4202 = vmatprep.subr.bf16.mxu0 %v4201_v48  ;;  %v1818_v48 = vld [vmem:[%s7867_s6 + $0x780] sm:$0xff] }
 0x4e7   : > { %v4239_v32 = vpack.c.bf16 %v1820_v33, %v1818_v48 }
 0x4e9   : > { %4204 = vmatpush1.bf16.msra.mxu0 %v4203_v36  ;;  %v4241_v36 = vpack.c.bf16 %v1825_v7, %v1823_v2 }
 0x4ea   : > { %4206 = vmatprep.subr.bf16.mxu0 %v4205_v44  ;;  %v1822_v44 = vld [vmem:[%s7867_s6 + $0x7a0] sm:$0xff] }
 0x4eb   : > { %v4243_v16 = vpack.c.bf16 %v1824_v27, %v1822_v44 }
 0x4ed   : > { %4208 = vmatpush1.bf16.msra.mxu0 %v4207_v24  ;;  %v4245_v24 = vpack.c.bf16 %v1829_v23, %v1827_v10 }
 0x4ee   : > { %4210 = vmatprep.subr.bf16.mxu0 %v4209_v43  ;;  %v1826_v43 = vld [vmem:[%s7867_s6 + $0x7c0] sm:$0xff] }
 0x4ef   : > { %v4247_v8 = vpack.c.bf16 %v1828_v29, %v1826_v43 }
 0x4f1   : > { %4212 = vmatpush1.bf16.msra.mxu0 %v4211_v9  ;;  %v4249_v9 = vpack.c.bf16 %v1833_v47, %v1831_v21  ;;  %v2118_v21 = vld [vmem:[%s7868_s7] sm:$0xff] }
 0x4f2   : > { %4214 = vmatprep.subr.bf16.mxu0 %v4213_v25  ;;  %v1830_v25 = vld [vmem:[%s7867_s6 + $0x7e0] sm:$0xff] }
 0x4f3   : > { %v4251_v63 = vpack.c.bf16 %v1832_v28, %v1830_v25 }
 0x4f5   : > { %4216 = vmatpush1.bf16.msra.mxu0 %v4215_v17 }
 0x4f6   : > { %4218 = vmatprep.subr.bf16.mxu0 %v4217_v39 }
 0x4f9   : > { %4220 = vmatpush1.bf16.msra.mxu0 %v4219_v37 }
 0x4fa   : > { %4222 = vmatprep.subr.bf16.mxu0 %v4221_v54 }
 0x4fd   : > { %4224 = vmatpush1.bf16.msra.mxu0 %v4223_v38 }
 0x4fe   : > { %4226 = vmatprep.subr.bf16.mxu0 %v4225_v6 }
 0x501   : > { %4228 = vmatpush1.bf16.msra.mxu0 %v4227_v40 }
 0x502   : > { %4230 = vmatprep.subr.bf16.mxu0 %v4229_v41 }
 0x505   : > { %4232 = vmatpush1.bf16.msra.mxu0 %v4231_v1 }
 0x506   : > { %4234 = vmatprep.subr.bf16.mxu0 %v4233_v59 }
 0x509   : > { %4236 = vmatpush1.bf16.msra.mxu0 %v4235_v51 }
 0x50a   : > { %4238 = vmatprep.subr.bf16.mxu0 %v4237_v57 }
 0x50d   : > { %4240 = vmatpush1.bf16.msra.mxu0 %v4239_v32 }
 0x50e   : > { %4242 = vmatprep.subr.bf16.mxu0 %v4241_v36 }
 0x511   : > { %4244 = vmatpush1.bf16.msra.mxu0 %v4243_v16 }
 0x512   : > { %4246 = vmatprep.subr.bf16.mxu0 %v4245_v24 }
 0x515   : > { %4248 = vmatpush1.bf16.msra.mxu0 %v4247_v8 }
 0x516   : > { %4250 = vmatprep.subr.bf16.mxu0 %v4249_v9  ;;  %v2255_v9 = vld [vmem:[%s7870_s9] sm:$0x3] }
 0x519   : > { %4252 = vmatpush1.bf16.msra.mxu0 %v4251_v63  ;;  %v2260_v63 = vrot.slane %v2255_v9, %v982_v53 }
 0x51c   : > { %2112 = vmatmul.mubr.f32.vlgmr.msra.gmra.mrb[6].mxu0 %v1576_v5 }
 0x5ef   : > { %v6885_v17 = vpop.f32.mrb[6].mxu0 }
 0x5f0   : > { %v6887_v39 = vpop.f32.mrb[7].mxu0 }
 0x5f1   : > { %v4873_v3 = vpack.i.bf16 %v6887_v39, %v6885_v17 }
 0x5f3   : > { %4874 = vrot.lane.b32.xlu0 %v4873_v3, %s5023_s27  ;;  %4869 = vrot.lane.b32.xlu1 %v4873_v3, %s5024_s1 }
 0x5f7   : > { %4884 = vrot.lane.b32.xlu0 %v4873_v3, %s7902_s21  ;;  %4879 = vrot.lane.b32.xlu1 %v4873_v3, %s5025_s18 }
 0x5fb   : > { %4894 = vrot.lane.b32.xlu0 %v4873_v3, %s5026_s22  ;;  %4889 = vrot.lane.b32.xlu1 %v4873_v3, %s7901_s20 }
 0x5ff   : > { %2167 = vrot.lane.b32.xlu0 %v6885_v17, %s5027_s15  ;;  %4899 = vrot.lane.b32.xlu1 %v4873_v3, %s5028_s25 }
 0x603   : > { %2169 = vrot.lane.b32.xlu1 %v6887_v39, %s5027_s15  ;;  %2176 = vperm.xlu0 %4903, %v2119_v50  }
 0x665   : > { %v4875_v12 = vpop.permute.xlu0 %4874  ;;  %v4870_v62 = vpop.permute.xlu1 %4869 }
 0x666   : > { %v4877_v49 = vunpack.i.h.bf16 %v4875_v12  ;;  %v4876_v60 = vunpack.i.l.bf16 %v4875_v12  ;;  %v4872_v4 = vunpack.i.h.bf16 %v4870_v62  ;;  %v4871_v22 = vunpack.i.l.bf16 %v4870_v62 }
 0x668   : > { %v2133_v37 = vsel %vm2131_vm9, %v4877_v49, %v4876_v60  ;;  %v2126_v54 = vsel %vm2124_vm10, %v4872_v4, %v4871_v22  ;;  %v2125_v34 = vsel %vm2124_vm10, %v4871_v22, %v4872_v4  ;;  %v2132_v42 = vsel %vm2131_vm9, %v4876_v60, %v4877_v49 }
 0x669   : > { %v4255_v58 = vpack.c.bf16 %v2133_v37, %v2126_v54  ;;  %v4885_v15 = vpop.permute.xlu0 %4884  ;;  %v4880_v38 = vpop.permute.xlu1 %4879  ;;  %v4253_v6 = vpack.c.bf16 %v2132_v42, %v2125_v34 }
 0x66a   : > { %v4887_v45 = vunpack.i.h.bf16 %v4885_v15  ;;  %v4886_v46 = vunpack.i.l.bf16 %v4885_v15  ;;  %v4882_v30 = vunpack.i.h.bf16 %v4880_v38  ;;  %v4881_v26 = vunpack.i.l.bf16 %v4880_v38 }
 0x66b   : > { %4254 = vmatprep.subr.bf16.mxu1 %v4253_v6 }
 0x66c   : > { %v2146_v40 = vsel %vm568_vm2, %v4887_v45, %v4886_v46  ;;  %v2140_v41 = vsel %vm2138_vm11, %v4882_v30, %v4881_v26  ;;  %4256 = vmatpush1.bf16.msra.mxu1 %v4255_v58  ;;  %v2139_v61 = vsel %vm2138_vm11, %v4881_v26, %v4882_v30  ;;  %v2145_v13 = vsel %vm568_vm2, %v4886_v46, %v4887_v45 }
 0x66d   : > { %v4259_v14 = vpack.c.bf16 %v2146_v40, %v2140_v41  ;;  %v4895_v31 = vpop.permute.xlu0 %4894  ;;  %v4890_v1 = vpop.permute.xlu1 %4889  ;;  %v4257_v59 = vpack.c.bf16 %v2145_v13, %v2139_v61 }
 0x66e   : > { %v4892_v55 = vunpack.i.h.bf16 %v4890_v1  ;;  %v4891_v19 = vunpack.i.l.bf16 %v4890_v1  ;;  %v4897_v18 = vunpack.i.h.bf16 %v4895_v31  ;;  %v4896_v52 = vunpack.i.l.bf16 %v4895_v31 }
 0x66f   : > { %4258 = vmatprep.subr.bf16.mxu1 %v4257_v59 }
 0x670   : > { %v2151_v51 = vsel %vm593_vm4, %v4891_v19, %v4892_v55  ;;  %4260 = vmatpush1.bf16.msra.mxu1 %v4259_v14  ;;  %v2152_v57 = vsel %vm593_vm4, %v4892_v55, %v4891_v19  ;;  %v2158_v36 = vsel %vm2157_vm12, %v4896_v52, %v4897_v18  ;;  %v2159_v27 = vsel %vm2157_vm12, %v4897_v18, %v4896_v52 }
 0x671   : > { %v4263_v48 = vpack.c.bf16 %v2151_v51, %v6885_v17  ;;  %v4900_v33 = vpop.permute.xlu1 %4899  ;;  %v4261_v2 = vpack.c.bf16 %v2152_v57, %v6887_v39  ;;  %v2168_v43 = vpop.permute.xlu0 %2167  ;;  %v2264_v17 = vrot.slane %v2255_v9, %v986_v56  ;;  %v2431_v9 = vld [vmem:[%s7873_s12 + $0x80] sm:$0xff] }
 0x672   : > { %v4902_v7 = vunpack.i.h.bf16 %v4900_v33  ;;  %v4901_v32 = vunpack.i.l.bf16 %v4900_v33 }
 0x673   : > { %4262 = vmatprep.subr.bf16.mxu1 %v4261_v2 }
 0x674   : > { %v2165_v44 = vsel %vm2164_vm13, %v4901_v32, %v4902_v7  ;;  %4264 = vmatpush1.bf16.msra.mxu1 %v4263_v48  ;;  %v2166_v10 = vsel %vm2164_vm13, %v4902_v7, %v4901_v32 }
 0x675   : > { %v4267_v23 = vpack.c.bf16 %v2165_v44, %v2158_v36  ;;  %v2170_v16 = vpop.permute.xlu1 %2169  ;;  %v4265_v24 = vpack.c.bf16 %v2166_v10, %v2159_v27 }
 0x676   : > { %v2173_v29 = vsel %vm2171_vm14, %v2170_v16, %v2168_v43  ;;  %v2172_v47 = vsel %vm2171_vm14, %v2168_v43, %v2170_v16 }
 0x677   : > { %4266 = vmatprep.subr.bf16.mxu1 %v4265_v24 }
 0x678   : > { %4268 = vmatpush1.bf16.msra.mxu1 %v4267_v23 }
 0x679   : > { %2198 = vmatprep.subr.mxu1 %v2173_v29  ;;  %v2269_v29 = vld [vmem:[%s7871_s10] sm:$0xff] }
 0x67c   : > { %2199 = vmatpush1.msra.mxu1 %v2172_v47 }
 0x67d   : > { %3359 = vmatmul.mubr.msk.f32.vlgmr.msra.gmra.mrb[10].mxu1 %vm682_vm8, %v2118_v21 }
 0x67e   : > { %2391 = vmatprep.mubr.f32.mxu1 %v5020_v11 }
 0x682   : > { %v2177_v8 = vpop.permute.xlu0 %2176 }
 0x750   : > { %v2248_v25 = vpop.f32.mrb[10].mxu1 }
 0x751   : > { %v2249_v28 = vadd.f32 %v2248_v25, %v2177_v8  ;;  %v2250_v0 = vpop.f32.mrb[11].mxu1  ;;  %v2432_v25 = vld [vmem:[%s7873_s12 + $0x88] sm:$0xff] }
 0x752   : > { %v2251_v5 = vadd.f32 %v2250_v0, %v2177_v8 }
 0x753   : > { %v2253_v39 = vmax.f32 %v2249_v28, 0.0  ;;  %v2415_v28 = vld [vmem:[%s7873_s12] sm:$0xff] }
 0x754   : > { %v2254_v3 = vmax.f32 %v2251_v5, 0.0  ;;  %v4285_v5 = vpack.c.bf16 %v2432_v25, %v2431_v9  ;;  %v3562_v9 = vld [vmem:[%s7873_s12 + $0x748] sm:$0xff] }
 0x755   : > { %v2267_v50 = vmul.f32 %v2260_v63, %v2253_v39  ;;  %v3569_v39 = vld [vmem:[%s7873_s12 + $0x780] sm:$0xff] }
 0x756   : > { %v2268_v12 = vmul.f32 %v2264_v17, %v2254_v3  ;;  %v2416_v17 = vld [vmem:[%s7873_s12 + $0x8] sm:$0xff] }
 0x757   : > { %v3570_v3 = vld [vmem:[%s7873_s12 + $0x788] sm:$0xff] }
 0x758   : > { %v4914_v11 = vpack.i.bf16 %v2268_v12, %v2267_v50 }
 0x75a   : > { %4915 = vrot.lane.b32.xlu0 %v4914_v11, %s5025_s18  ;;  %4905 = vrot.lane.b32.xlu1 %v4914_v11, %s5024_s1 }
 0x75e   : > { %4925 = vrot.lane.b32.xlu0 %v4914_v11, %s7901_s20  ;;  %4910 = vrot.lane.b32.xlu1 %v4914_v11, %s5023_s27  ;;  %s459_s27 = scalar_lea.vmem [#allocation2], %s458_s2 }
 0x762   : > { %4935 = vrot.lane.b32.xlu0 %v4914_v11, %s5028_s25  ;;  %4920 = vrot.lane.b32.xlu1 %v4914_v11, %s7902_s21  ;;  %s3585_s21 = sshll.u32 %s5126_s17, 4  ;;  %s5029_s17 = smov [#allocation2]  }
 0x763   : > { %s7819_s18 = scalar_lea.hbm %s7875_s14, %s3585_s21  ;;  %s4953_s3 = sshll.u32 %s5029_s17, 4  ;;  %s4954_s3 = int_to_ptr.vmem [resolvable:$false] %s4953_s3 }
 0x764   : > { %s4955_s26 = scalar_lea.vmem %s4954_s3, 32 }
 0x766   : > { %2315 = vrot.lane.b32.xlu0 %v2268_v12, %s5027_s15  ;;  %4930 = vrot.lane.b32.xlu1 %v4914_v11, %s5026_s22  ;;  %v4509_v11 = vpack.c.bf16 %v3570_v3, %v3569_v39  ;;  %v2426_v39 = vld [vmem:[%s7873_s12 + $0x58] sm:$0xff]  ;;  %s3278_s22 = scalar_lea.sflag [#allocation3], %s458_s2 }
 0x768   : > { %4510 = vmatprep.subr.bf16.mxu0 %v4509_v11  ;;  %v2444_v11 = vld [vmem:[%s7873_s12 + $0xe8] sm:$0xff] }
 0x76a   : > { %2313 = vrot.lane.b32.xlu1 %v2267_v50, %s5027_s15 }
 0x76e   : > { %2321 = vperm.xlu1 %4727, %v2270_v35   ;;  %v2433_v35 = vld [vmem:[%s7873_s12 + $0x90] sm:$0xff] }
 0x7cc   : > { %v4916_v53 = vpop.permute.xlu0 %4915  ;;  %v4906_v56 = vpop.permute.xlu1 %4905 }
 0x7cd   : > { %v4908_v62 = vunpack.i.h.bf16 %v4906_v56  ;;  %v4907_v49 = vunpack.i.l.bf16 %v4906_v56  ;;  %v4918_v54 = vunpack.i.h.bf16 %v4916_v53  ;;  %v4917_v34 = vunpack.i.l.bf16 %v4916_v53  ;;  %v2434_v53 = vld [vmem:[%s7873_s12 + $0x98] sm:$0xff]  ;;  %v3553_v56 = vld [vmem:[%s7873_s12 + $0x700] sm:$0xff] }
 0x7cf   : > { %v2276_v42 = vsel %vm2124_vm10, %v4908_v62, %v4907_v49  ;;  %v2275_v58 = vsel %vm2124_vm10, %v4907_v49, %v4908_v62  ;;  %v2288_v61 = vsel %vm2138_vm11, %v4918_v54, %v4917_v34  ;;  %v2287_v31 = vsel %vm2138_vm11, %v4917_v34, %v4918_v54  ;;  %v3554_v49 = vld [vmem:[%s7873_s12 + $0x708] sm:$0xff]  ;;  %v3571_v34 = vld [vmem:[%s7873_s12 + $0x790] sm:$0xff] }
 0x7d0   : > { %v4926_v60 = vpop.permute.xlu0 %4925  ;;  %v4911_v4 = vpop.permute.xlu1 %4910  ;;  %v4289_v62 = vpack.c.bf16 %v2434_v53, %v2433_v35  ;;  %v3563_v53 = vld [vmem:[%s7873_s12 + $0x750] sm:$0xff] }
 0x7d1   : > { %v4913_v22 = vunpack.i.h.bf16 %v4911_v4  ;;  %v4912_v37 = vunpack.i.l.bf16 %v4911_v4  ;;  %v4928_v15 = vunpack.i.h.bf16 %v4926_v60  ;;  %v4927_v38 = vunpack.i.l.bf16 %v4926_v60  ;;  %v2417_v60 = vld [vmem:[%s7873_s12 + $0x10] sm:$0xff]  ;;  %v2418_v4 = vld [vmem:[%s7873_s12 + $0x18] sm:$0xff] }
 0x7d2   : > { %v4291_v54 = vpack.c.bf16 %v2418_v4, %v2417_v60  ;;  %v2427_v60 = vld [vmem:[%s7873_s12 + $0x60] sm:$0xff]  ;;  %v2428_v4 = vld [vmem:[%s7873_s12 + $0x68] sm:$0xff] }
 0x7d3   : > { %v2282_v6 = vsel %vm2131_vm9, %v4913_v22, %v4912_v37  ;;  %v2281_v45 = vsel %vm2131_vm9, %v4912_v37, %v4913_v22  ;;  %v2300_v59 = vsel %vm593_vm4, %v4928_v15, %v4927_v38  ;;  %v2299_v33 = vsel %vm593_vm4, %v4927_v38, %v4928_v15  ;;  %v2436_v38 = vld [vmem:[%s7873_s12 + $0xa8] sm:$0xff] }
 0x7d4   : > { %v4271_v46 = vpack.c.bf16 %v2282_v6, %v2276_v42  ;;  %v4921_v30 = vpop.permute.xlu1 %4920  ;;  %v4269_v26 = vpack.c.bf16 %v2281_v45, %v2275_v58  ;;  %v4936_v13 = vpop.permute.xlu0 %4935  ;;  %v4277_v2 = vpack.c.bf16 %v2300_v59, %v2268_v12  ;;  %v4279_v32 = vpack.c.bf16 %v2299_v33, %v2267_v50  ;;  %v3572_v42 = vld [vmem:[%s7873_s12 + $0x798] sm:$0xff]  ;;  %v2435_v58 = vld [vmem:[%s7873_s12 + $0xa0] sm:$0xff]  ;;  %v3555_v6 = vld [vmem:[%s7873_s12 + $0x710] sm:$0xff] }
 0x7d5   : > { %v4923_v40 = vunpack.i.h.bf16 %v4921_v30  ;;  %v4922_v41 = vunpack.i.l.bf16 %v4921_v30  ;;  %v4938_v52 = vunpack.i.h.bf16 %v4936_v13  ;;  %v4937_v51 = vunpack.i.l.bf16 %v4936_v13  ;;  %v3556_v45 = vld [vmem:[%s7873_s12 + $0x718] sm:$0xff]  ;;  %v2437_v13 = vld [vmem:[%s7873_s12 + $0xb0] sm:$0xff]  ;;  %v3557_v59 = vld [vmem:[%s7873_s12 + $0x720] sm:$0xff] }
 0x7d6   : > { %4270 = vmatprep.subr.bf16.mxu1 %v4269_v26  ;;  %v4287_v12 = vpack.c.bf16 %v2416_v17, %v2415_v28  ;;  %v4511_v37 = vpack.c.bf16 %v3554_v49, %v3553_v56  ;;  %v4513_v15 = vpack.c.bf16 %v3572_v42, %v3571_v34  ;;  %v4515_v30 = vpack.c.bf16 %v3556_v45, %v3555_v6  ;;  %v2419_v26 = vld [vmem:[%s7873_s12 + $0x20] sm:$0xff]  ;;  %v3579_v28 = vld [vmem:[%s7873_s12 + $0x7d0] sm:$0xff]  ;;  %v3564_v56 = vld [vmem:[%s7873_s12 + $0x758] sm:$0xff] }
 0x7d7   : > { %v2294_v14 = vsel %vm568_vm2, %v4923_v40, %v4922_v41  ;;  %4272 = vmatpush1.bf16.msra.mxu1 %v4271_v46  ;;  %v2293_v1 = vsel %vm568_vm2, %v4922_v41, %v4923_v40  ;;  %v2312_v36 = vsel %vm2164_vm13, %v4938_v52, %v4937_v51  ;;  %v2311_v10 = vsel %vm2164_vm13, %v4937_v51, %v4938_v52  ;;  %v2420_v40 = vld [vmem:[%s7873_s12 + $0x28] sm:$0xff]  ;;  %v3573_v41 = vld [vmem:[%s7873_s12 + $0x7a0] sm:$0xff]  ;;  %v2422_v52 = vld [vmem:[%s7873_s12 + $0x38] sm:$0xff] }
 0x7d8   : > { %v4275_v55 = vpack.c.bf16 %v2294_v14, %v2288_v61  ;;  %v4931_v19 = vpop.permute.xlu1 %4930  ;;  %v4273_v18 = vpack.c.bf16 %v2293_v1, %v2287_v31  ;;  %v2316_v24 = vpop.permute.xlu0 %2315  ;;  %4512 = vmatpush3.bf16.msra.mxu0 %v4511_v37  ;;  %v4293_v46 = vpack.c.bf16 %v2436_v38, %v2435_v58  ;;  %v3574_v61 = vld [vmem:[%s7873_s12 + $0x7a8] sm:$0xff]  ;;  %v2438_v14 = vld [vmem:[%s7873_s12 + $0xb8] sm:$0xff]  ;;  %v4295_v31 = vpack.c.bf16 %v2420_v40, %v2419_v26  ;;  %v3575_v51 = vld [vmem:[%s7873_s12 + $0x7b0] sm:$0xff] }
 0x7d9   : > { %v4933_v57 = vunpack.i.h.bf16 %v4931_v19  ;;  %v4932_v48 = vunpack.i.l.bf16 %v4931_v19  ;;  %4514 = vmatprep.subr.bf16.mxu0 %v4513_v15  ;;  %v4517_v1 = vpack.c.bf16 %v3574_v61, %v3573_v41  ;;  %v2421_v19 = vld [vmem:[%s7873_s12 + $0x30] sm:$0xff]  ;;  %v2439_v33 = vld [vmem:[%s7873_s12 + $0xc0] sm:$0xff]  ;;  %v4311_v37 = vpack.c.bf16 %v2428_v4, %v2427_v60  ;;  %v3582_v34 = vld [vmem:[%s7873_s12 + $0x7e8] sm:$0xff] }
 0x7da   : > { %4274 = vmatprep.subr.bf16.mxu1 %v4273_v18  ;;  %v4297_v18 = vpack.c.bf16 %v2438_v14, %v2437_v13  ;;  %v2425_v17 = vld [vmem:[%s7873_s12 + $0x50] sm:$0xff]  ;;  %v2446_v15 = vld [vmem:[%s7873_s12 + $0xf8] sm:$0xff]  ;;  %v3565_v38 = vld [vmem:[%s7873_s12 + $0x760] sm:$0xff] }
 0x7db   : > { %4276 = vmatpush1.bf16.msra.mxu1 %v4275_v55  ;;  %v2306_v7 = vsel %vm2157_vm12, %v4933_v57, %v4932_v48  ;;  %v2305_v44 = vsel %vm2157_vm12, %v4932_v48, %v4933_v57  ;;  %v3558_v55 = vld [vmem:[%s7873_s12 + $0x728] sm:$0xff]  ;;  %v3576_v57 = vld [vmem:[%s7873_s12 + $0x7b8] sm:$0xff]  ;;  %v2445_v58 = vld [vmem:[%s7873_s12 + $0xf0] sm:$0xff] }
 0x7dc   : > { %4278 = vmatprep.subr.bf16.mxu1 %v4277_v2  ;;  %v4281_v27 = vpack.c.bf16 %v2312_v36, %v2306_v7  ;;  %v2314_v23 = vpop.permute.xlu1 %2313  ;;  %v4283_v16 = vpack.c.bf16 %v2311_v10, %v2305_v44  ;;  %4516 = vmatpush3.bf16.msra.mxu0 %v4515_v30  ;;  %v4519_v48 = vpack.c.bf16 %v3558_v55, %v3557_v59  ;;  %v2440_v2 = vld [vmem:[%s7873_s12 + $0xc8] sm:$0xff]  ;;  %v3560_v36 = vld [vmem:[%s7873_s12 + $0x738] sm:$0xff]  ;;  %v3583_v41 = vld [vmem:[%s7873_s12 + $0x7f0] sm:$0xff] }
 0x7dd   : > { %v2318_v43 = vsel %vm2171_vm14, %v2316_v24, %v2314_v23  ;;  %v2317_v21 = vsel %vm2171_vm14, %v2314_v23, %v2316_v24  ;;  %4518 = vmatprep.subr.bf16.mxu0 %v4517_v1  ;;  %v4521_v7 = vpack.c.bf16 %v3576_v57, %v3575_v51  ;;  %v4299_v44 = vpack.c.bf16 %v2422_v52, %v2421_v19  ;;  %v3578_v10 = vld [vmem:[%s7873_s12 + $0x7c8] sm:$0xff]  ;;  %v2430_v30 = vld [vmem:[%s7873_s12 + $0x78] sm:$0xff]  ;;  %v3377_v14 = vld [vmem:[%s7873_s12 + $0x180] sm:$0xff] }
 0x7de   : > { %v4301_v23 = vpack.c.bf16 %v2440_v2, %v2439_v33  ;;  %v2424_v24 = vld [vmem:[%s7873_s12 + $0x48] sm:$0xff]  ;;  %v4313_v6 = vpack.c.bf16 %v2446_v15, %v2445_v58  ;;  %v3584_v61 = vld [vmem:[%s7873_s12 + $0x7f8] sm:$0xff]  ;;  %v3567_v1 = vld [vmem:[%s7873_s12 + $0x770] sm:$0xff] }
 0x7df   : > { %4280 = vmatpush1.bf16.msra.mxu1 %v4279_v32  ;;  %v3559_v32 = vld [vmem:[%s7873_s12 + $0x730] sm:$0xff]  ;;  %v3566_v45 = vld [vmem:[%s7873_s12 + $0x768] sm:$0xff]  ;;  %v4537_v13 = vpack.c.bf16 %v3584_v61, %v3583_v41  ;;  %v3568_v55 = vld [vmem:[%s7873_s12 + $0x778] sm:$0xff] }
 0x7e0   : > { %4282 = vmatprep.subr.bf16.mxu1 %v4281_v27  ;;  %v3577_v27 = vld [vmem:[%s7873_s12 + $0x7c0] sm:$0xff]  ;;  %4520 = vmatpush3.bf16.msra.mxu0 %v4519_v48  ;;  %v4535_v26 = vpack.c.bf16 %v3566_v45, %v3565_v38  ;;  %v3386_v60 = vld [vmem:[%s7873_s12 + $0x1c8] sm:$0xff]  ;;  %v3371_v38 = vld [vmem:[%s7873_s12 + $0x150] sm:$0xff] }
 0x7e1   : > { %4522 = vmatprep.subr.bf16.mxu0 %v4521_v7  ;;  %v3389_v45 = vld [vmem:[%s7873_s12 + $0x1e0] sm:$0xff]  ;;  %v3374_v41 = vld [vmem:[%s7873_s12 + $0x168] sm:$0xff]  ;;  %v3391_v61 = vld [vmem:[%s7873_s12 + $0x1f0] sm:$0xff] }
 0x7e3   : > { %4284 = vmatpush1.bf16.msra.mxu1 %v4283_v16  ;;  %v2423_v16 = vld [vmem:[%s7873_s12 + $0x40] sm:$0xff] }
 0x7e4   : > { %2343 = vmatprep.subr.mxu1 %v2318_v43  ;;  %v4523_v43 = vpack.c.bf16 %v3560_v36, %v3559_v32  ;;  %v4303_v25 = vpack.c.bf16 %v2424_v24, %v2423_v16 }
 0x7e6   : > { %4524 = vmatpush3.bf16.msra.mxu0 %v4523_v43 }
 0x7e7   : > { %2344 = vmatpush1.msra.mxu1 %v2317_v21  ;;  %v2442_v21 = vld [vmem:[%s7873_s12 + $0xd8] sm:$0xff] }
 0x7e8   : > { %3360 = vmatmul.mubr.msk.f32.vlgmr.msra.gmra.mrb[12].mxu1 %vm682_vm8, %v2269_v29  ;;  %4286 = vmatprep.subr.bf16.mxu1 %v4285_v5  ;;  %v2441_v29 = vld [vmem:[%s7873_s12 + $0xd0] sm:$0xff] }
 0x7e9   : > { %4288 = vmatpush3.bf16.msra.mxu1 %v4287_v12  ;;  %v4305_v5 = vpack.c.bf16 %v2442_v21, %v2441_v29  ;;  %v2443_v12 = vld [vmem:[%s7873_s12 + $0xe0] sm:$0xff] }
 0x7ea   : > { %4290 = vmatprep.subr.bf16.mxu1 %v4289_v62  ;;  %v4307_v62 = vpack.c.bf16 %v2426_v39, %v2425_v17  ;;  %v4309_v49 = vpack.c.bf16 %v2444_v11, %v2443_v12  ;;  %v3365_v39 = vld [vmem:[%s7873_s12 + $0x120] sm:$0xff]  ;;  %v3383_v12 = vld [vmem:[%s7873_s12 + $0x1b0] sm:$0xff]  ;;  %v3384_v11 = vld [vmem:[%s7873_s12 + $0x1b8] sm:$0xff] }
 0x7ed   : > { %v2322_v47 = vpop.permute.xlu1 %2321  ;;  %4292 = vmatpush3.bf16.msra.mxu1 %v4291_v54  ;;  %v3581_v54 = vld [vmem:[%s7873_s12 + $0x7e0] sm:$0xff] }
 0x7ee   : > { %4294 = vmatprep.subr.bf16.mxu1 %v4293_v46  ;;  %v4533_v42 = vpack.c.bf16 %v3582_v34, %v3581_v54  ;;  %v2429_v46 = vld [vmem:[%s7873_s12 + $0x70] sm:$0xff]  ;;  %v3370_v54 = vld [vmem:[%s7873_s12 + $0x148] sm:$0xff] }
 0x7ef   : > { %v4315_v40 = vpack.c.bf16 %v2430_v30, %v2429_v46  ;;  %v3387_v34 = vld [vmem:[%s7873_s12 + $0x1d0] sm:$0xff]  ;;  %v3390_v46 = vld [vmem:[%s7873_s12 + $0x1e8] sm:$0xff] }
 0x7f1   : > { %4296 = vmatpush3.bf16.msra.mxu1 %v4295_v31  ;;  %v3378_v31 = vld [vmem:[%s7873_s12 + $0x188] sm:$0xff] }
 0x7f2   : > { %4298 = vmatprep.subr.bf16.mxu1 %v4297_v18  ;;  %v4317_v59 = vpack.c.bf16 %v3378_v31, %v3377_v14  ;;  %v4539_v18 = vpack.c.bf16 %v3568_v55, %v3567_v1  ;;  %v3375_v1 = vld [vmem:[%s7873_s12 + $0x170] sm:$0xff]  ;;  %v3409_v55 = vld [vmem:[%s7873_s12 + $0x280] sm:$0xff] }
 0x7f5   : > { %4300 = vmatpush3.bf16.msra.mxu1 %v4299_v44 }
 0x7f6   : > { %4302 = vmatprep.subr.bf16.mxu1 %v4301_v23 }
 0x7f9   : > { %4304 = vmatpush3.bf16.msra.mxu1 %v4303_v25 }
 0x7fa   : > { %4306 = vmatprep.subr.bf16.mxu1 %v4305_v5 }
 0x7fd   : > { %4308 = vmatpush3.bf16.msra.mxu1 %v4307_v62  ;;  %v3368_v62 = vld [vmem:[%s7873_s12 + $0x138] sm:$0xff] }
 0x7fe   : > { %4310 = vmatprep.subr.bf16.mxu1 %v4309_v49  ;;  %v3385_v49 = vld [vmem:[%s7873_s12 + $0x1c0] sm:$0xff] }
 0x801   : > { %4312 = vmatpush3.bf16.msra.mxu1 %v4311_v37  ;;  %v3369_v37 = vld [vmem:[%s7873_s12 + $0x140] sm:$0xff] }
 0x802   : > { %4314 = vmatprep.subr.bf16.mxu1 %v4313_v6  ;;  %v4335_v58 = vpack.c.bf16 %v3370_v54, %v3369_v37  ;;  %v3372_v6 = vld [vmem:[%s7873_s12 + $0x158] sm:$0xff]  ;;  %v3405_v37 = vld [vmem:[%s7873_s12 + $0x260] sm:$0xff]  ;;  %v3406_v54 = vld [vmem:[%s7873_s12 + $0x268] sm:$0xff] }
 0x803   : > { %v4339_v30 = vpack.c.bf16 %v3372_v6, %v3371_v38  ;;  %v3407_v38 = vld [vmem:[%s7873_s12 + $0x270] sm:$0xff]  ;;  %v3408_v6 = vld [vmem:[%s7873_s12 + $0x278] sm:$0xff] }
 0x805   : > { %4316 = vmatpush3.bf16.msra.mxu1 %v4315_v40  ;;  %v3373_v40 = vld [vmem:[%s7873_s12 + $0x160] sm:$0xff] }
 0x806   : > { %4318 = vmatprep.subr.bf16.mxu1 %v4317_v59  ;;  %v4343_v14 = vpack.c.bf16 %v3374_v41, %v3373_v40  ;;  %v3376_v59 = vld [vmem:[%s7873_s12 + $0x178] sm:$0xff]  ;;  %v3425_v40 = vld [vmem:[%s7873_s12 + $0x300] sm:$0xff]  ;;  %v3426_v41 = vld [vmem:[%s7873_s12 + $0x308] sm:$0xff] }
 0x8bb   : > { %v2393_v8 = vpop.f32.mrb[12].mxu1 }
 0x8bc   : > { %v7014_v63 = vadd.f32 %v2393_v8, %v2322_v47  ;;  %v2395_v0 = vpop.f32.mrb[13].mxu1  ;;  %v3561_v8 = vld [vmem:[%s7873_s12 + $0x740] sm:$0xff] }
 0x8bd   : > { %v7025_v50 = vadd.f32 %v2395_v0, %v2322_v47  ;;  %v4525_v47 = vpack.c.bf16 %v3578_v10, %v3577_v27  ;;  %v3580_v0 = vld [vmem:[%s7873_s12 + $0x7d8] sm:$0xff]  ;;  %v4527_v3 = vpack.c.bf16 %v3562_v9, %v3561_v8  ;;  %v3361_v27 = vld [vmem:[%s7873_s12 + $0x100] sm:$0xff]  ;;  %v3362_v10 = vld [vmem:[%s7873_s12 + $0x108] sm:$0xff] }
 0x8be   : > { %v4529_v35 = vpack.c.bf16 %v3580_v0, %v3579_v28  ;;  %v4319_v29 = vpack.c.bf16 %v3362_v10, %v3361_v27  ;;  %v3364_v8 = vld [vmem:[%s7873_s12 + $0x118] sm:$0xff]  ;;  %v3381_v28 = vld [vmem:[%s7873_s12 + $0x1a0] sm:$0xff]  ;;  %v3382_v0 = vld [vmem:[%s7873_s12 + $0x1a8] sm:$0xff] }
 0x8bf   : > { %v4939_v22 = vpack.i.bf16 %v7025_v50, %v7014_v63  ;;  %4526 = vmatprep.subr.bf16.mxu0 %v4525_v47  ;;  %v3363_v47 = vld [vmem:[%s7873_s12 + $0x110] sm:$0xff]  ;;  %v4325_v17 = vpack.c.bf16 %v3382_v0, %v3381_v28  ;;  %v3413_v10 = vld [vmem:[%s7873_s12 + $0x2a0] sm:$0xff]  ;;  %v3418_v0 = vld [vmem:[%s7873_s12 + $0x2c8] sm:$0xff] }
 0x8c0   : > { %4528 = vmatpush3.bf16.msra.mxu0 %v4527_v3  ;;  %v4323_v5 = vpack.c.bf16 %v3364_v8, %v3363_v47  ;;  %v3366_v3 = vld [vmem:[%s7873_s12 + $0x128] sm:$0xff]  ;;  %v3416_v47 = vld [vmem:[%s7873_s12 + $0x2b8] sm:$0xff]  ;;  %v3417_v28 = vld [vmem:[%s7873_s12 + $0x2c0] sm:$0xff] }
 0x8c1   : > { %4940 = vrot.lane.b32.xlu0 %v4939_v22, %s7901_s20  ;;  %v4531_v22 = vpack.c.bf16 %v3564_v56, %v3563_v53  ;;  %4530 = vmatprep.subr.bf16.mxu0 %v4529_v35  ;;  %v4327_v35 = vpack.c.bf16 %v3366_v3, %v3365_v39  ;;  %v4329_v53 = vpack.c.bf16 %v3384_v11, %v3383_v12  ;;  %v3367_v56 = vld [vmem:[%s7873_s12 + $0x130] sm:$0xff]  ;;  %v3401_v39 = vld [vmem:[%s7873_s12 + $0x240] sm:$0xff]  ;;  %v3402_v3 = vld [vmem:[%s7873_s12 + $0x248] sm:$0xff] }
 0x8c2   : > { %v4331_v4 = vpack.c.bf16 %v3368_v62, %v3367_v56  ;;  %v3419_v12 = vld [vmem:[%s7873_s12 + $0x2d0] sm:$0xff]  ;;  %v3420_v11 = vld [vmem:[%s7873_s12 + $0x2d8] sm:$0xff] }
 0x8c3   : > { %v3403_v56 = vld [vmem:[%s7873_s12 + $0x250] sm:$0xff]  ;;  %v3404_v62 = vld [vmem:[%s7873_s12 + $0x258] sm:$0xff] }
 0x8c4   : > { %4532 = vmatpush3.bf16.msra.mxu0 %v4531_v22  ;;  %v4333_v22 = vpack.c.bf16 %v3386_v60, %v3385_v49  ;;  %v3421_v49 = vld [vmem:[%s7873_s12 + $0x2e0] sm:$0xff]  ;;  %v3422_v60 = vld [vmem:[%s7873_s12 + $0x2e8] sm:$0xff] }
 0x8c5   : > { %4534 = vmatprep.subr.bf16.mxu0 %v4533_v42  ;;  %v3388_v42 = vld [vmem:[%s7873_s12 + $0x1d8] sm:$0xff] }
 0x8c6   : > { %v4337_v15 = vpack.c.bf16 %v3388_v42, %v3387_v34  ;;  %v3423_v34 = vld [vmem:[%s7873_s12 + $0x2f0] sm:$0xff]  ;;  %v3424_v42 = vld [vmem:[%s7873_s12 + $0x2f8] sm:$0xff] }
 0x8c8   : > { %4536 = vmatpush3.bf16.msra.mxu0 %v4535_v26  ;;  %v4341_v26 = vpack.c.bf16 %v3390_v46, %v3389_v45  ;;  %v3441_v45 = vld [vmem:[%s7873_s12 + $0x380] sm:$0xff]  ;;  %v3442_v46 = vld [vmem:[%s7873_s12 + $0x388] sm:$0xff] }
 0x8c9   : > { %4538 = vmatprep.subr.bf16.mxu0 %v4537_v13  ;;  %v3392_v13 = vld [vmem:[%s7873_s12 + $0x1f8] sm:$0xff] }
 0x8ca   : > { %v4345_v31 = vpack.c.bf16 %v3392_v13, %v3391_v61  ;;  %v3443_v61 = vld [vmem:[%s7873_s12 + $0x390] sm:$0xff]  ;;  %v3444_v13 = vld [vmem:[%s7873_s12 + $0x398] sm:$0xff] }
 0x8cc   : > { %4540 = vmatpush3.bf16.msra.mxu0 %v4539_v18  ;;  %v4347_v18 = vpack.c.bf16 %v3376_v59, %v3375_v1  ;;  %v4385_v1 = vpack.c.bf16 %v3444_v13, %v3443_v61  ;;  %v3427_v59 = vld [vmem:[%s7873_s12 + $0x310] sm:$0xff]  ;;  %v3461_v61 = vld [vmem:[%s7873_s12 + $0x420] sm:$0xff]  ;;  %v3462_v13 = vld [vmem:[%s7873_s12 + $0x428] sm:$0xff] }
 0x933   : > { %v4941_v19 = vpop.permute.xlu0 %4940 }
 0x934   : > { %v4943_v52 = vunpack.i.h.bf16 %v4941_v19  ;;  %v4942_v51 = vunpack.i.l.bf16 %v4941_v19  ;;  %v3410_v19 = vld [vmem:[%s7873_s12 + $0x288] sm:$0xff] }
 0x936   : > { %v2402_v57 = vsel %vm593_vm4, %v4942_v51, %v4943_v52  ;;  %v2403_v48 = vsel %vm593_vm4, %v4943_v52, %v4942_v51  ;;  %v4349_v52 = vpack.c.bf16 %v3410_v19, %v3409_v55  ;;  %v3393_v51 = vld [vmem:[%s7873_s12 + $0x200] sm:$0xff]  ;;  %v3428_v55 = vld [vmem:[%s7873_s12 + $0x318] sm:$0xff] }
 0x937   : > { %v2404_v33 = vmax.f32 %v7014_v63, %v2402_v57  ;;  %v2405_v2 = vmax.f32 %v7025_v50, %v2403_v48  ;;  %v3379_v63 = vld [vmem:[%s7873_s12 + $0x190] sm:$0xff]  ;;  %v3380_v50 = vld [vmem:[%s7873_s12 + $0x198] sm:$0xff]  ;;  %v3394_v57 = vld [vmem:[%s7873_s12 + $0x208] sm:$0xff] }
 0x938   : > { %v4321_v21 = vpack.c.bf16 %v3380_v50, %v3379_v63  ;;  %v3411_v48 = vld [vmem:[%s7873_s12 + $0x290] sm:$0xff]  ;;  %v3414_v63 = vld [vmem:[%s7873_s12 + $0x2a8] sm:$0xff] }
 0x939   : > { %v4944_v7 = vpack.i.bf16 %v2405_v2, %v2404_v33 }
 0x93b   : > { %4945 = vrot.lane.b32.xlu1 %v4944_v7, %s5028_s25  ;;  %s3290_s25 = sshll.u32 %s459_s27, 4  ;;  %s7821_s25 = int_to_ptr.vmem [resolvable:$true] %s3290_s25 }
 0x93c   : > { %s4949_s15 = scalar_lea.vmem %s7821_s25, 16  ;;  %p4956_p0 = scmp.lt.s32.totalorder %s7821_s25, %s4954_s3 }
 0x93d   : > { %p4950_p11 = scmp.ne.s32.totalorder %s7821_s25, %s4949_s15  ;;  %p4957_p1 = scmp.lt.s32.totalorder %s4955_s26, %s4949_s15 }
 0x93f   : > { %p4951_p12 = pnand %p4950_p11, %p5143_p5  ;;  %p4958_p2 = por %p4957_p1, %p4956_p0 }
 0x941   : > { %p4952_p13 = pneg %p4951_p12 }
 0x943   : > { %p4959_p3 = pnand %p4958_p2, %p4952_p13 }
 0x9ad   : > { %v4946_v32 = vpop.permute.xlu1 %4945 }
 0x9ae   : > { %v4948_v36 = vunpack.i.h.bf16 %v4946_v32  ;;  %v4947_v44 = vunpack.i.l.bf16 %v4946_v32 }
 0x9b0   : > { %v2410_v23 = vsel %vm2164_vm13, %v4947_v44, %v4948_v36  ;;  %v2411_v16 = vsel %vm2164_vm13, %v4948_v36, %v4947_v44  ;;  %v3395_v36 = vld [vmem:[%s7873_s12 + $0x210] sm:$0xff]  ;;  %v3396_v44 = vld [vmem:[%s7873_s12 + $0x218] sm:$0xff] }
 0x9b1   : > { %v7233_v24 = vmax.f32 %v2404_v33, %v2410_v23  ;;  %v7235_v43 = vmax.f32 %v2405_v2, %v2411_v16  ;;  %v3412_v33 = vld [vmem:[%s7873_s12 + $0x298] sm:$0xff]  ;;  %v4351_v2 = vpack.c.bf16 %v3394_v57, %v3393_v51  ;;  %v4355_v50 = vpack.c.bf16 %v3396_v44, %v3395_v36  ;;  %v3397_v16 = vld [vmem:[%s7873_s12 + $0x220] sm:$0xff]  ;;  %v3431_v44 = vld [vmem:[%s7873_s12 + $0x330] sm:$0xff] }
 0x9b2   : > { %v4353_v32 = vpack.c.bf16 %v3412_v33, %v3411_v48  ;;  %v4357_v23 = vpack.c.bf16 %v3414_v63, %v3413_v10  ;;  %v4387_v51 = vpack.c.bf16 %v3428_v55, %v3427_v59  ;;  %v3429_v48 = vld [vmem:[%s7873_s12 + $0x320] sm:$0xff]  ;;  %v3430_v33 = vld [vmem:[%s7873_s12 + $0x328] sm:$0xff]  ;;  %v3463_v55 = vld [vmem:[%s7873_s12 + $0x430] sm:$0xff] }
 0x9b3   : > { %2511 = vmatprep.mubr.f32.mxu1 %v7235_v43  ;;  %v2554_v9 = vrot.slane %v7235_v43, 1  ;;  %v3202_v20 = vrot.slane %v7235_v43, 7  ;;  %v3201_v25 = vrot.slane %v7233_v24, 7  ;;  %v2553_v7 = vrot.slane %v7233_v24, 1  ;;  %v3449_v10 = vld [vmem:[%s7873_s12 + $0x3c0] sm:$0xff]  ;;  %v3450_v63 = vld [vmem:[%s7873_s12 + $0x3c8] sm:$0xff] }
 0x9b4   : > { %2512 = vmatmul.mubr.f32.vlgmr.msra.gmra.mrb[14].mxu1 %v7233_v24  ;;  %v2662_v27 = vrot.slane %v7235_v43, 2  ;;  %v2770_v19 = vrot.slane %v7235_v43, 3 }
 0x9b5   : > { %4320 = vmatpush3.bf16.msra.mxu1 %v4319_v29  ;;  %2621 = vmatprep.mubr.f32.mxu1 %v2554_v9  ;;  %v3398_v29 = vld [vmem:[%s7873_s12 + $0x228] sm:$0xff] }
 0x9b6   : > { %3269 = vmatprep.mubr.f32.mxu0 %v3202_v20  ;;  %4322 = vmatprep.subr.bf16.mxu1 %v4321_v21  ;;  %v3415_v21 = vld [vmem:[%s7873_s12 + $0x2b0] sm:$0xff]  ;;  %v4359_v8 = vpack.c.bf16 %v3398_v29, %v3397_v16  ;;  %v3433_v16 = vld [vmem:[%s7873_s12 + $0x340] sm:$0xff]  ;;  %v3434_v29 = vld [vmem:[%s7873_s12 + $0x348] sm:$0xff] }
 0x9b7   : > { %3270 = vmatmul.mubr.f32.vlgmr.msra.gmra.mrb[8].mxu0 %v3201_v25  ;;  %v4361_v9 = vpack.c.bf16 %v3416_v47, %v3415_v21  ;;  %v3399_v20 = vld [vmem:[%s7873_s12 + $0x230] sm:$0xff]  ;;  %v3400_v25 = vld [vmem:[%s7873_s12 + $0x238] sm:$0xff] }
 0x9b8   : > { %v3451_v21 = vld [vmem:[%s7873_s12 + $0x3d0] sm:$0xff]  ;;  %v3452_v47 = vld [vmem:[%s7873_s12 + $0x3d8] sm:$0xff] }
 0x9b9   : > { %4324 = vmatpush3.bf16.msra.mxu1 %v4323_v5  ;;  %v4363_v5 = vpack.c.bf16 %v3400_v25, %v3399_v20  ;;  %v3435_v20 = vld [vmem:[%s7873_s12 + $0x350] sm:$0xff]  ;;  %v3436_v25 = vld [vmem:[%s7873_s12 + $0x358] sm:$0xff] }
 0x9ba   : > { %4326 = vmatprep.subr.bf16.mxu1 %v4325_v17  ;;  %v4365_v17 = vpack.c.bf16 %v3418_v0, %v3417_v28  ;;  %v3453_v28 = vld [vmem:[%s7873_s12 + $0x3e0] sm:$0xff]  ;;  %v3454_v0 = vld [vmem:[%s7873_s12 + $0x3e8] sm:$0xff] }
 0x9bd   : > { %4328 = vmatpush3.bf16.msra.mxu1 %v4327_v35  ;;  %v4367_v35 = vpack.c.bf16 %v3402_v3, %v3401_v39  ;;  %v3437_v39 = vld [vmem:[%s7873_s12 + $0x360] sm:$0xff]  ;;  %v3438_v3 = vld [vmem:[%s7873_s12 + $0x368] sm:$0xff] }
 0x9be   : > { %4330 = vmatprep.subr.bf16.mxu1 %v4329_v53  ;;  %v4369_v53 = vpack.c.bf16 %v3420_v11, %v3419_v12  ;;  %v3455_v12 = vld [vmem:[%s7873_s12 + $0x3f0] sm:$0xff]  ;;  %v3456_v11 = vld [vmem:[%s7873_s12 + $0x3f8] sm:$0xff] }
 0x9c1   : > { %4332 = vmatpush3.bf16.msra.mxu1 %v4331_v4  ;;  %v4371_v4 = vpack.c.bf16 %v3404_v62, %v3403_v56  ;;  %v3439_v56 = vld [vmem:[%s7873_s12 + $0x370] sm:$0xff]  ;;  %v3440_v62 = vld [vmem:[%s7873_s12 + $0x378] sm:$0xff] }
 0x9c2   : > { %4334 = vmatprep.subr.bf16.mxu1 %v4333_v22  ;;  %v4373_v22 = vpack.c.bf16 %v3422_v60, %v3421_v49  ;;  %v3473_v49 = vld [vmem:[%s7873_s12 + $0x480] sm:$0xff]  ;;  %v3474_v60 = vld [vmem:[%s7873_s12 + $0x488] sm:$0xff] }
 0x9c5   : > { %4336 = vmatpush3.bf16.msra.mxu1 %v4335_v58  ;;  %v4375_v58 = vpack.c.bf16 %v3406_v54, %v3405_v37  ;;  %v3457_v37 = vld [vmem:[%s7873_s12 + $0x400] sm:$0xff]  ;;  %v3458_v54 = vld [vmem:[%s7873_s12 + $0x408] sm:$0xff] }
 0x9c6   : > { %4338 = vmatprep.subr.bf16.mxu1 %v4337_v15  ;;  %v4377_v15 = vpack.c.bf16 %v3424_v42, %v3423_v34  ;;  %v3475_v34 = vld [vmem:[%s7873_s12 + $0x490] sm:$0xff]  ;;  %v3476_v42 = vld [vmem:[%s7873_s12 + $0x498] sm:$0xff] }
 0x9c9   : > { %4340 = vmatpush3.bf16.msra.mxu1 %v4339_v30  ;;  %v4379_v30 = vpack.c.bf16 %v3408_v6, %v3407_v38  ;;  %v4417_v38 = vpack.c.bf16 %v3476_v42, %v3475_v34  ;;  %v3459_v6 = vld [vmem:[%s7873_s12 + $0x410] sm:$0xff]  ;;  %v3493_v34 = vld [vmem:[%s7873_s12 + $0x520] sm:$0xff]  ;;  %v3494_v42 = vld [vmem:[%s7873_s12 + $0x528] sm:$0xff] }
 0x9ca   : > { %4342 = vmatprep.subr.bf16.mxu1 %v4341_v26  ;;  %v4381_v26 = vpack.c.bf16 %v3442_v46, %v3441_v45  ;;  %v3460_v45 = vld [vmem:[%s7873_s12 + $0x418] sm:$0xff]  ;;  %v2878_v46 = vrot.slane %v7235_v43, 4 }
 0x9cd   : > { %4344 = vmatpush3.bf16.msra.mxu1 %v4343_v14  ;;  %v4383_v14 = vpack.c.bf16 %v3426_v41, %v3425_v40  ;;  %v4419_v40 = vpack.c.bf16 %v3460_v45, %v3459_v6  ;;  %v3495_v45 = vld [vmem:[%s7873_s12 + $0x530] sm:$0xff] }
 0x9ce   : > { %4346 = vmatprep.subr.bf16.mxu1 %v4345_v31  ;;  %v2661_v31 = vrot.slane %v7233_v24, 2 }
 0x9d1   : > { %4348 = vmatpush3.bf16.msra.mxu1 %v4347_v18  ;;  %v3445_v18 = vld [vmem:[%s7873_s12 + $0x3a0] sm:$0xff] }
 0x9d2   : > { %4350 = vmatprep.subr.bf16.mxu1 %v4349_v52  ;;  %v3446_v52 = vld [vmem:[%s7873_s12 + $0x3a8] sm:$0xff] }
 0x9d3   : > { %v4389_v57 = vpack.c.bf16 %v3446_v52, %v3445_v18  ;;  %v3481_v18 = vld [vmem:[%s7873_s12 + $0x4c0] sm:$0xff]  ;;  %v3482_v52 = vld [vmem:[%s7873_s12 + $0x4c8] sm:$0xff] }
 0x9d4   : > { %2622 = vmatmul.mubr.f32.vlgmr.msra.gmra.mrb[16].mxu1 %v2553_v7  ;;  %v3448_v7 = vld [vmem:[%s7873_s12 + $0x3b8] sm:$0xff] }
 0x9d5   : > { %4352 = vmatpush3.bf16.msra.mxu1 %v4351_v2  ;;  %2729 = vmatprep.mubr.f32.mxu1 %v2662_v27  ;;  %v3447_v2 = vld [vmem:[%s7873_s12 + $0x3b0] sm:$0xff]  ;;  %v3432_v27 = vld [vmem:[%s7873_s12 + $0x338] sm:$0xff] }
 0x9d6   : > { %4354 = vmatprep.subr.bf16.mxu1 %v4353_v32  ;;  %v4391_v32 = vpack.c.bf16 %v3430_v33, %v3429_v48  ;;  %v4393_v36 = vpack.c.bf16 %v3448_v7, %v3447_v2  ;;  %v3465_v48 = vld [vmem:[%s7873_s12 + $0x440] sm:$0xff]  ;;  %v3466_v33 = vld [vmem:[%s7873_s12 + $0x448] sm:$0xff]  ;;  %v3483_v2 = vld [vmem:[%s7873_s12 + $0x4d0] sm:$0xff] }
 0x9d7   : > { %v3484_v7 = vld [vmem:[%s7873_s12 + $0x4d8] sm:$0xff] }
 0x9d9   : > { %4356 = vmatpush3.bf16.msra.mxu1 %v4355_v50  ;;  %v4395_v50 = vpack.c.bf16 %v3432_v27, %v3431_v44  ;;  %v3467_v44 = vld [vmem:[%s7873_s12 + $0x450] sm:$0xff]  ;;  %v3468_v27 = vld [vmem:[%s7873_s12 + $0x458] sm:$0xff] }
 0x9da   : > { %4358 = vmatprep.subr.bf16.mxu1 %v4357_v23  ;;  %v4397_v23 = vpack.c.bf16 %v3450_v63, %v3449_v10  ;;  %v3485_v10 = vld [vmem:[%s7873_s12 + $0x4e0] sm:$0xff]  ;;  %v3486_v63 = vld [vmem:[%s7873_s12 + $0x4e8] sm:$0xff] }
 0x9dd   : > { %4360 = vmatpush3.bf16.msra.mxu1 %v4359_v8  ;;  %v4399_v8 = vpack.c.bf16 %v3434_v29, %v3433_v16  ;;  %v3469_v16 = vld [vmem:[%s7873_s12 + $0x460] sm:$0xff]  ;;  %v3470_v29 = vld [vmem:[%s7873_s12 + $0x468] sm:$0xff] }
 0x9de   : > { %4362 = vmatprep.subr.bf16.mxu1 %v4361_v9  ;;  %v4401_v9 = vpack.c.bf16 %v3452_v47, %v3451_v21  ;;  %v3487_v21 = vld [vmem:[%s7873_s12 + $0x4f0] sm:$0xff]  ;;  %v3488_v47 = vld [vmem:[%s7873_s12 + $0x4f8] sm:$0xff] }
 0x9e1   : > { %4364 = vmatpush3.bf16.msra.mxu1 %v4363_v5  ;;  %v4403_v5 = vpack.c.bf16 %v3436_v25, %v3435_v20  ;;  %v3471_v20 = vld [vmem:[%s7873_s12 + $0x470] sm:$0xff]  ;;  %v3472_v25 = vld [vmem:[%s7873_s12 + $0x478] sm:$0xff] }
 0x9e2   : > { %4366 = vmatprep.subr.bf16.mxu1 %v4365_v17  ;;  %v4405_v17 = vpack.c.bf16 %v3454_v0, %v3453_v28  ;;  %v3505_v28 = vld [vmem:[%s7873_s12 + $0x580] sm:$0xff]  ;;  %v3506_v0 = vld [vmem:[%s7873_s12 + $0x588] sm:$0xff] }
 0x9e5   : > { %4368 = vmatpush3.bf16.msra.mxu1 %v4367_v35  ;;  %v4407_v35 = vpack.c.bf16 %v3438_v3, %v3437_v39  ;;  %v3489_v39 = vld [vmem:[%s7873_s12 + $0x500] sm:$0xff]  ;;  %v3490_v3 = vld [vmem:[%s7873_s12 + $0x508] sm:$0xff] }
 0x9e6   : > { %4370 = vmatprep.subr.bf16.mxu1 %v4369_v53  ;;  %v4409_v53 = vpack.c.bf16 %v3456_v11, %v3455_v12  ;;  %v3507_v12 = vld [vmem:[%s7873_s12 + $0x590] sm:$0xff]  ;;  %v3508_v11 = vld [vmem:[%s7873_s12 + $0x598] sm:$0xff] }
 0x9e9   : > { %4372 = vmatpush3.bf16.msra.mxu1 %v4371_v4  ;;  %v4411_v4 = vpack.c.bf16 %v3440_v62, %v3439_v56  ;;  %v4449_v56 = vpack.c.bf16 %v3508_v11, %v3507_v12  ;;  %v3491_v62 = vld [vmem:[%s7873_s12 + $0x510] sm:$0xff]  ;;  %v3525_v12 = vld [vmem:[%s7873_s12 + $0x620] sm:$0xff] }
 0x9ea   : > { %4374 = vmatprep.subr.bf16.mxu1 %v4373_v22  ;;  %v4413_v22 = vpack.c.bf16 %v3474_v60, %v3473_v49  ;;  %v3492_v49 = vld [vmem:[%s7873_s12 + $0x518] sm:$0xff]  ;;  %v2986_v60 = vrot.slane %v7235_v43, 5  ;;  %v3543_v11 = vld [vmem:[%s7873_s12 + $0x6b0] sm:$0xff] }
 0x9ed   : > { %4376 = vmatpush3.bf16.msra.mxu1 %v4375_v58  ;;  %v4415_v58 = vpack.c.bf16 %v3458_v54, %v3457_v37  ;;  %v4451_v37 = vpack.c.bf16 %v3492_v49, %v3491_v62  ;;  %v3527_v62 = vld [vmem:[%s7873_s12 + $0x630] sm:$0xff]  ;;  %v3528_v49 = vld [vmem:[%s7873_s12 + $0x638] sm:$0xff] }
 0x9ee   : > { %4378 = vmatprep.subr.bf16.mxu1 %v4377_v15  ;;  %v2769_v15 = vrot.slane %v7233_v24, 3 }
 0x9f1   : > { %4380 = vmatpush3.bf16.msra.mxu1 %v4379_v30  ;;  %v3477_v30 = vld [vmem:[%s7873_s12 + $0x4a0] sm:$0xff] }
 0x9f2   : > { %4382 = vmatprep.subr.bf16.mxu1 %v4381_v26  ;;  %v3478_v26 = vld [vmem:[%s7873_s12 + $0x4a8] sm:$0xff] }
 0x9f3   : > { %v4421_v41 = vpack.c.bf16 %v3478_v26, %v3477_v30  ;;  %v3513_v30 = vld [vmem:[%s7873_s12 + $0x5c0] sm:$0xff]  ;;  %v3514_v26 = vld [vmem:[%s7873_s12 + $0x5c8] sm:$0xff] }
 0x9f4   : > { %2730 = vmatmul.mubr.f32.vlgmr.msra.gmra.mrb[18].mxu1 %v2661_v31  ;;  %v3480_v31 = vld [vmem:[%s7873_s12 + $0x4b8] sm:$0xff] }
 0x9f5   : > { %4384 = vmatpush3.bf16.msra.mxu1 %v4383_v14  ;;  %2837 = vmatprep.mubr.f32.mxu1 %v2770_v19  ;;  %v3479_v14 = vld [vmem:[%s7873_s12 + $0x4b0] sm:$0xff]  ;;  %v3464_v19 = vld [vmem:[%s7873_s12 + $0x438] sm:$0xff] }
 0x9f6   : > { %4386 = vmatprep.subr.bf16.mxu1 %v4385_v1  ;;  %v4423_v1 = vpack.c.bf16 %v3462_v13, %v3461_v61  ;;  %v4425_v59 = vpack.c.bf16 %v3480_v31, %v3479_v14  ;;  %v3497_v61 = vld [vmem:[%s7873_s12 + $0x540] sm:$0xff]  ;;  %v3498_v13 = vld [vmem:[%s7873_s12 + $0x548] sm:$0xff]  ;;  %v3515_v14 = vld [vmem:[%s7873_s12 + $0x5d0] sm:$0xff] }
 0x9f7   : > { %v3516_v31 = vld [vmem:[%s7873_s12 + $0x5d8] sm:$0xff] }
 0x9f9   : > { %4388 = vmatpush3.bf16.msra.mxu1 %v4387_v51  ;;  %v4427_v51 = vpack.c.bf16 %v3464_v19, %v3463_v55  ;;  %v3499_v55 = vld [vmem:[%s7873_s12 + $0x550] sm:$0xff]  ;;  %v3500_v19 = vld [vmem:[%s7873_s12 + $0x558] sm:$0xff] }
 0x9fa   : > { %4390 = vmatprep.subr.bf16.mxu1 %v4389_v57  ;;  %v4429_v57 = vpack.c.bf16 %v3482_v52, %v3481_v18  ;;  %v3517_v18 = vld [vmem:[%s7873_s12 + $0x5e0] sm:$0xff]  ;;  %v3518_v52 = vld [vmem:[%s7873_s12 + $0x5e8] sm:$0xff] }
 0x9fd   : > { %4392 = vmatpush3.bf16.msra.mxu1 %v4391_v32  ;;  %v4431_v32 = vpack.c.bf16 %v3466_v33, %v3465_v48  ;;  %v3501_v48 = vld [vmem:[%s7873_s12 + $0x560] sm:$0xff]  ;;  %v3502_v33 = vld [vmem:[%s7873_s12 + $0x568] sm:$0xff] }
 0x9fe   : > { %4394 = vmatprep.subr.bf16.mxu1 %v4393_v36  ;;  %v4433_v36 = vpack.c.bf16 %v3484_v7, %v3483_v2  ;;  %v3519_v2 = vld [vmem:[%s7873_s12 + $0x5f0] sm:$0xff]  ;;  %v3520_v7 = vld [vmem:[%s7873_s12 + $0x5f8] sm:$0xff] }
 0xa01   : > { %4396 = vmatpush3.bf16.msra.mxu1 %v4395_v50  ;;  %v4435_v50 = vpack.c.bf16 %v3468_v27, %v3467_v44  ;;  %v3503_v44 = vld [vmem:[%s7873_s12 + $0x570] sm:$0xff]  ;;  %v3504_v27 = vld [vmem:[%s7873_s12 + $0x578] sm:$0xff] }
 0xa02   : > { %4398 = vmatprep.subr.bf16.mxu1 %v4397_v23  ;;  %v4437_v23 = vpack.c.bf16 %v3486_v63, %v3485_v10  ;;  %v3537_v10 = vld [vmem:[%s7873_s12 + $0x680] sm:$0xff]  ;;  %v3538_v63 = vld [vmem:[%s7873_s12 + $0x688] sm:$0xff] }
 0xa05   : > { %4400 = vmatpush3.bf16.msra.mxu1 %v4399_v8  ;;  %v4439_v8 = vpack.c.bf16 %v3470_v29, %v3469_v16  ;;  %v3521_v16 = vld [vmem:[%s7873_s12 + $0x600] sm:$0xff]  ;;  %v3522_v29 = vld [vmem:[%s7873_s12 + $0x608] sm:$0xff] }
 0xa06   : > { %4402 = vmatprep.subr.bf16.mxu1 %v4401_v9  ;;  %v4441_v9 = vpack.c.bf16 %v3488_v47, %v3487_v21  ;;  %v3539_v21 = vld [vmem:[%s7873_s12 + $0x690] sm:$0xff]  ;;  %v3540_v47 = vld [vmem:[%s7873_s12 + $0x698] sm:$0xff] }
 0xa09   : > { %4404 = vmatpush3.bf16.msra.mxu1 %v4403_v5  ;;  %v4443_v5 = vpack.c.bf16 %v3472_v25, %v3471_v20  ;;  %v4481_v20 = vpack.c.bf16 %v3540_v47, %v3539_v21  ;;  %v3523_v25 = vld [vmem:[%s7873_s12 + $0x610] sm:$0xff] }
 0xa0a   : > { %4406 = vmatprep.subr.bf16.mxu1 %v4405_v17  ;;  %v4445_v17 = vpack.c.bf16 %v3506_v0, %v3505_v28  ;;  %v3524_v28 = vld [vmem:[%s7873_s12 + $0x618] sm:$0xff]  ;;  %v3094_v0 = vrot.slane %v7235_v43, 6  ;;  %v3526_v43 = vld [vmem:[%s7873_s12 + $0x628] sm:$0xff] }
 0xa0d   : > { %4408 = vmatpush3.bf16.msra.mxu1 %v4407_v35  ;;  %v4447_v35 = vpack.c.bf16 %v3490_v3, %v3489_v39  ;;  %v4483_v39 = vpack.c.bf16 %v3524_v28, %v3523_v25 }
 0xa0e   : > { %4410 = vmatprep.subr.bf16.mxu1 %v4409_v53  ;;  %v2877_v53 = vrot.slane %v7233_v24, 4 }
 0xa11   : > { %4412 = vmatpush3.bf16.msra.mxu1 %v4411_v4  ;;  %v3509_v4 = vld [vmem:[%s7873_s12 + $0x5a0] sm:$0xff] }
 0xa12   : > { %4414 = vmatprep.subr.bf16.mxu1 %v4413_v22  ;;  %v3510_v22 = vld [vmem:[%s7873_s12 + $0x5a8] sm:$0xff] }
 0xa13   : > { %v4453_v54 = vpack.c.bf16 %v3510_v22, %v3509_v4  ;;  %v3546_v4 = vld [vmem:[%s7873_s12 + $0x6c8] sm:$0xff]  ;;  %v4491_v22 = vpack.c.bf16 %v3528_v49, %v3527_v62 }
 0xa14   : > { %2838 = vmatmul.mubr.f32.vlgmr.msra.gmra.mrb[20].mxu1 %v2769_v15  ;;  %v3512_v15 = vld [vmem:[%s7873_s12 + $0x5b8] sm:$0xff] }
 0xa15   : > { %4416 = vmatpush3.bf16.msra.mxu1 %v4415_v58  ;;  %2945 = vmatprep.mubr.f32.mxu1 %v2878_v46  ;;  %v3511_v58 = vld [vmem:[%s7873_s12 + $0x5b0] sm:$0xff]  ;;  %v3496_v46 = vld [vmem:[%s7873_s12 + $0x538] sm:$0xff] }
 0xa16   : > { %4418 = vmatprep.subr.bf16.mxu1 %v4417_v38  ;;  %v4455_v38 = vpack.c.bf16 %v3494_v42, %v3493_v34  ;;  %v4457_v6 = vpack.c.bf16 %v3512_v15, %v3511_v58  ;;  %v3530_v34 = vld [vmem:[%s7873_s12 + $0x648] sm:$0xff]  ;;  %v3547_v42 = vld [vmem:[%s7873_s12 + $0x6d0] sm:$0xff]  ;;  %v3548_v58 = vld [vmem:[%s7873_s12 + $0x6d8] sm:$0xff] }
 0xa19   : > { %4420 = vmatpush3.bf16.msra.mxu1 %v4419_v40  ;;  %v4459_v40 = vpack.c.bf16 %v3496_v46, %v3495_v45  ;;  %v3532_v45 = vld [vmem:[%s7873_s12 + $0x658] sm:$0xff]  ;;  %v3549_v46 = vld [vmem:[%s7873_s12 + $0x6e0] sm:$0xff] }
 0xa1a   : > { %4422 = vmatprep.subr.bf16.mxu1 %v4421_v41  ;;  %v4461_v41 = vpack.c.bf16 %v3514_v26, %v3513_v30  ;;  %v3550_v30 = vld [vmem:[%s7873_s12 + $0x6e8] sm:$0xff] }
 0xa1d   : > { %4424 = vmatpush3.bf16.msra.mxu1 %v4423_v1  ;;  %v4463_v1 = vpack.c.bf16 %v3498_v13, %v3497_v61  ;;  %v3534_v61 = vld [vmem:[%s7873_s12 + $0x668] sm:$0xff]  ;;  %v3551_v13 = vld [vmem:[%s7873_s12 + $0x6f0] sm:$0xff] }
 0xa1e   : > { %4426 = vmatprep.subr.bf16.mxu1 %v4425_v59  ;;  %v4465_v59 = vpack.c.bf16 %v3516_v31, %v3515_v14  ;;  %v3552_v14 = vld [vmem:[%s7873_s12 + $0x6f8] sm:$0xff] }
 0xa21   : > { %4428 = vmatpush3.bf16.msra.mxu1 %v4427_v51  ;;  %v4467_v51 = vpack.c.bf16 %v3500_v19, %v3499_v55  ;;  %v3536_v55 = vld [vmem:[%s7873_s12 + $0x678] sm:$0xff] }
 0xa22   : > { %4430 = vmatprep.subr.bf16.mxu1 %v4429_v57  ;;  %v4469_v57 = vpack.c.bf16 %v3518_v52, %v3517_v18  ;;  %v3093_v18 = vrot.slane %v7233_v24, 6 }
 0xa25   : > { %4432 = vmatpush3.bf16.msra.mxu1 %v4431_v32  ;;  %v4471_v32 = vpack.c.bf16 %v3502_v33, %v3501_v48 }
 0xa26   : > { %4434 = vmatprep.subr.bf16.mxu1 %v4433_v36  ;;  %v4473_v36 = vpack.c.bf16 %v3520_v7, %v3519_v2  ;;  %v2414_v7 = vld [vmem:[%s7874_s13] sm:$0x1] }
 0xa29   : > { %4436 = vmatpush3.bf16.msra.mxu1 %v4435_v50  ;;  %v4475_v50 = vpack.c.bf16 %v3504_v27, %v3503_v44 }
 0xa2a   : > { %4438 = vmatprep.subr.bf16.mxu1 %v4437_v23  ;;  %v4477_v23 = vpack.c.bf16 %v3538_v63, %v3537_v10 }
 0xa2d   : > { %4440 = vmatpush3.bf16.msra.mxu1 %v4439_v8  ;;  %v4479_v8 = vpack.c.bf16 %v3522_v29, %v3521_v16 }
 0xa2e   : > { %4442 = vmatprep.subr.bf16.mxu1 %v4441_v9  ;;  %v2985_v9 = vrot.slane %v7233_v24, 5 }
 0xa31   : > { %4444 = vmatpush3.bf16.msra.mxu1 %v4443_v5  ;;  %v3541_v5 = vld [vmem:[%s7873_s12 + $0x6a0] sm:$0xff] }
 0xa32   : > { %4446 = vmatprep.subr.bf16.mxu1 %v4445_v17  ;;  %v3542_v17 = vld [vmem:[%s7873_s12 + $0x6a8] sm:$0xff] }
 0xa33   : > { %v4485_v3 = vpack.c.bf16 %v3542_v17, %v3541_v5 }
 0xa34   : > { %2946 = vmatmul.mubr.f32.vlgmr.msra.gmra.mrb[22].mxu1 %v2877_v53  ;;  %v4487_v53 = vpack.c.bf16 %v3526_v43, %v3525_v12 }
 0xa35   : > { %4448 = vmatpush3.bf16.msra.mxu1 %v4447_v35  ;;  %3053 = vmatprep.mubr.f32.mxu1 %v2986_v60  ;;  %v3544_v35 = vld [vmem:[%s7873_s12 + $0x6b8] sm:$0xff]  ;;  %v3545_v60 = vld [vmem:[%s7873_s12 + $0x6c0] sm:$0xff] }
 0xa36   : > { %4450 = vmatprep.subr.bf16.mxu1 %v4449_v56  ;;  %v4489_v56 = vpack.c.bf16 %v3544_v35, %v3543_v11 }
 0xa39   : > { %4452 = vmatpush3.bf16.msra.mxu1 %v4451_v37  ;;  %v4493_v37 = vpack.c.bf16 %v3546_v4, %v3545_v60 }
 0xa3a   : > { %4454 = vmatprep.subr.bf16.mxu1 %v4453_v54  ;;  %v3529_v54 = vld [vmem:[%s7873_s12 + $0x640] sm:$0xff] }
 0xa3b   : > { %v4495_v15 = vpack.c.bf16 %v3530_v34, %v3529_v54 }
 0xa3d   : > { %4456 = vmatpush3.bf16.msra.mxu1 %v4455_v38  ;;  %v4497_v38 = vpack.c.bf16 %v3548_v58, %v3547_v42 }
 0xa3e   : > { %4458 = vmatprep.subr.bf16.mxu1 %v4457_v6  ;;  %v3531_v6 = vld [vmem:[%s7873_s12 + $0x650] sm:$0xff] }
 0xa3f   : > { %v4499_v26 = vpack.c.bf16 %v3532_v45, %v3531_v6 }
 0xa41   : > { %4460 = vmatpush3.bf16.msra.mxu1 %v4459_v40  ;;  %v4501_v40 = vpack.c.bf16 %v3550_v30, %v3549_v46 }
 0xa42   : > { %4462 = vmatprep.subr.bf16.mxu1 %v4461_v41  ;;  %v3533_v41 = vld [vmem:[%s7873_s12 + $0x660] sm:$0xff] }
 0xa43   : > { %v4503_v31 = vpack.c.bf16 %v3534_v61, %v3533_v41 }
 0xa45   : > { %4464 = vmatpush3.bf16.msra.mxu1 %v4463_v1  ;;  %v4505_v1 = vpack.c.bf16 %v3552_v14, %v3551_v13 }
 0xa46   : > { %4466 = vmatprep.subr.bf16.mxu1 %v4465_v59  ;;  %v3535_v59 = vld [vmem:[%s7873_s12 + $0x670] sm:$0xff] }
 0xa47   : > { %v4507_v19 = vpack.c.bf16 %v3536_v55, %v3535_v59 }
 0xa49   : > { %4468 = vmatpush3.bf16.msra.mxu1 %v4467_v51 }
 0xa4a   : > { %4470 = vmatprep.subr.bf16.mxu1 %v4469_v57 }
 0xa4d   : > { %4472 = vmatpush3.bf16.msra.mxu1 %v4471_v32 }
 0xa4e   : > { %4474 = vmatprep.subr.bf16.mxu1 %v4473_v36 }
 0xa51   : > { %4476 = vmatpush3.bf16.msra.mxu1 %v4475_v50 }
 0xa52   : > { %4478 = vmatprep.subr.bf16.mxu1 %v4477_v23 }
 0xa54   : > { %3054 = vmatmul.mubr.f32.vlgmr.msra.gmra.mrb[24].mxu1 %v2985_v9 }
 0xa55   : > { %4480 = vmatpush3.bf16.msra.mxu1 %v4479_v8  ;;  %3161 = vmatprep.mubr.f32.mxu1 %v3094_v0 }
 0xa56   : > { %4482 = vmatprep.subr.bf16.mxu1 %v4481_v20 }
 0xa59   : > { %4484 = vmatpush3.bf16.msra.mxu1 %v4483_v39 }
 0xa5a   : > { %4486 = vmatprep.subr.bf16.mxu1 %v4485_v3 }
 0xa5d   : > { %4488 = vmatpush3.bf16.msra.mxu1 %v4487_v53 }
 0xa5e   : > { %4490 = vmatprep.subr.bf16.mxu1 %v4489_v56 }
 0xa61   : > { %4492 = vmatpush3.bf16.msra.mxu1 %v4491_v22 }
 0xa62   : > { %4494 = vmatprep.subr.bf16.mxu1 %v4493_v37 }
 0xa65   : > { %4496 = vmatpush3.bf16.msra.mxu1 %v4495_v15 }
 0xa66   : > { %4498 = vmatprep.subr.bf16.mxu1 %v4497_v38 }
 0xa69   : > { %4500 = vmatpush3.bf16.msra.mxu1 %v4499_v26 }
 0xa6a   : > { %4502 = vmatprep.subr.bf16.mxu1 %v4501_v40 }
 0xa6d   : > { %4504 = vmatpush3.bf16.msra.mxu1 %v4503_v31 }
 0xa6e   : > { %4506 = vmatprep.subr.bf16.mxu1 %v4505_v1 }
 0xa71   : > { %4508 = vmatpush3.bf16.msra.mxu1 %v4507_v19 }
 0xa74   : > { %3162 = vmatmul.mubr.f32.vlgmr.msra.gmra.mrb[26].mxu1 %v3093_v18 }
 0xa87   : > { %v3621_v52 = vpop.f32.mrb[14].mxu1 }
 0xa88   : > { %v3622_v51 = vpop.f32.mrb[15].mxu1 }
 0xa89   : > { %v3623_v57 = vadd.f32 %v3622_v51, %v3621_v52 }
 0xa8a   : > { %v3866_v48 = vpop.f32.mrb[8].mxu0 }
 0xa8b   : > { %v3867_v33 = vpop.f32.mrb[9].mxu0  ;;  %v2517_v44 = vadd.f32 %v3623_v57, %v2414_v7 }
 0xa8c   : > { %v3868_v2 = vadd.f32 %v3867_v33, %v3866_v48 }
 0xaa7   : > { %v3656_v32 = vpop.f32.mrb[16].mxu1 }
 0xaa8   : > { %v3657_v36 = vpop.f32.mrb[17].mxu1 }
 0xaa9   : > { %v3658_v27 = vadd.f32 %v3657_v36, %v3656_v32 }
 0xaab   : > { %v2627_v10 = vadd.f32 %v3658_v27, %v2517_v44 }
 0xac7   : > { %v3691_v63 = vpop.f32.mrb[18].mxu1 }
 0xac8   : > { %v3692_v50 = vpop.f32.mrb[19].mxu1 }
 0xac9   : > { %v3693_v24 = vadd.f32 %v3692_v50, %v3691_v63 }
 0xacb   : > { %v2735_v23 = vadd.f32 %v3693_v24, %v2627_v10 }
 0xae7   : > { %v3726_v16 = vpop.f32.mrb[20].mxu1 }
 0xae8   : > { %v3727_v29 = vpop.f32.mrb[21].mxu1 }
 0xae9   : > { %v3728_v21 = vadd.f32 %v3727_v29, %v3726_v16 }
 0xaeb   : > { %v2843_v47 = vadd.f32 %v3728_v21, %v2735_v23 }
 0xb07   : > { %v3761_v8 = vpop.f32.mrb[22].mxu1 }
 0xb08   : > { %v3762_v9 = vpop.f32.mrb[23].mxu1 }
 0xb09   : > { %v3763_v20 = vadd.f32 %v3762_v9, %v3761_v8 }
 0xb0b   : > { %v2951_v25 = vadd.f32 %v3763_v20, %v2843_v47 }
 0xb27   : > { %v3796_v28 = vpop.f32.mrb[24].mxu1 }
 0xb28   : > { %v3797_v0 = vpop.f32.mrb[25].mxu1 }
 0xb29   : > { %v3798_v5 = vadd.f32 %v3797_v0, %v3796_v28 }
 0xb2b   : > { %v3059_v17 = vadd.f32 %v3798_v5, %v2951_v25 }
 0xb47   : > { %v3831_v39 = vpop.f32.mrb[26].mxu1 }
 0xb48   : > { %v3832_v3 = vpop.f32.mrb[27].mxu1 }
 0xb49   : > { %v3833_v12 = vadd.f32 %v3832_v3, %v3831_v39 }
 0xb4b   : > { %v3167_v43 = vadd.f32 %v3833_v12, %v3059_v17 }
 0xb4d   : > { %v3275_v11 = vadd.f32 %v3868_v2, %v3167_v43 }
 0xb4f   : > { %3276 = vst [vmem:[%s459_s27] sm:$0x1] %v3275_v11 }
 0xb50   : > { %4962 = shalt.err (!%p4959_p3)
}
 0xb51   : > { %s4963_s28 = scalar_lea.hbm %s7819_s18, 16  ;;  %s4967_s21 = scalar_lea.hbm %s7875_s14, 64 }
 0xb52   : > { %p4964_p4 = scmp.ne.s32.totalorder %s7819_s18, %s4963_s28  ;;  %p4968_p9 = scmp.lt.u32.totalorder %s7819_s18, %s7875_s14 }
 0xb53   : > { %p4969_p10 = scmp.lt.u32.totalorder %s4967_s21, %s4963_s28  ;;  %p4971_p12 = scmp.lt.u32.totalorder %s4963_s28, %s7819_s18 }
 0xb54   : > { %p4965_p7 = pnand %p4964_p4, %p5143_p5 }
 0xb55   : > { %p4970_p11 = por %p4969_p10, %p4968_p9 }
 0xb56   : > { %p4966_p8 = pneg %p4965_p7 }
 0xb57   : > { %p4972_p13 = por %p4971_p12, %p4970_p11 }
 0xb59   : > { %p4973_p0 = pnand %p4972_p13, %p4966_p8 }
 0xb5b   : > { %4976 = shalt.err (!%p4973_p0)
}
 0xb5c   : > { %4547 = dma.vmem_to_hbm [thread:$0]  (%p5143_p5), %s7821_s25, 16, %s7819_s18, %s3278_s22  }
 0xb5d PF: > { %p4553_p1 = scmp.ge.s32.totalorder %s5011_s16, 2  ;;  %s3302_s1 = sand.u32 1, %s4999_s29  }
 0xb5e   : > { %s3303_s15 = scalar_lea.sflag [#allocation3], %s3302_s1 }
 0xb5f   : > { %p4550_p2 = pnand %p4553_p1, %p5147_p6 }
 0xb61   : > { %4994 = dma.done.wait (!%p4550_p2), %s3303_s15, 16  }
 0xb62   : > { %4996 = vsyncadd (!%p4550_p2), %s3303_s15, 4294967280  ;;  %s7910_s17 = sld [smem:[#allocation5_spill]]  ;;  %s7911_s15 = sld [smem:[#allocation6_spill]] }
 0xb63   : > { %p24_p3 = scmp.ge.s32.totalorder %s5130_s19, 6   ;;  %s7912_s29 = smov %s5003_s30 }
 0xb64   : > { %s7914_s16 = smov %s5130_s19 }
 0xb65   :  { %26 = sbr.rel (!%p24_p3) target bundleno = 8 (0x8), region = 118 }
 0xb68   : > { %s7913_s30 = smov %s7910_s17 }
 0xb6c   :  { %3307 = vsyncpa [#allocation3], 1 }
 0xb6d   :  { %3309 = vsyncpa [#allocation3 + $0x1], 1 }

</bundles_post_ra>
